<compile_context>
chip_gen: v7x
topology: tpu7x:2x2x1
jax: 0.10.0
libtpu: 0.0.40
codegen_flags: <defaults>
</compile_context>

<pallas_src>
import math
import functools

import jax
import jax.numpy as jnp
from jax.experimental import pallas as pl
from jax.experimental.pallas import tpu as pltpu

_BN_EPS = 1e-5


# ------------------------------ small helpers -------------------------------

def _round_up(x, m):
    return ((x + m - 1) // m) * m


def _pad2d(a, rows, cols):
    r, c = a.shape
    if r == rows and c == cols:
        return a
    return jnp.pad(a, ((0, rows - r), (0, cols - c)))


# ----------------------- tiled fused matmul kernels --------------------------

def _mm_affine_kernel(x_ref, w_ref, s_ref, b_ref, o_ref, acc_ref, *, relu):
    k = pl.program_id(2)

    @pl.when(k == 0)
    def _():
        acc_ref[...] = jnp.zeros_like(acc_ref)

    acc_ref[...] += jnp.dot(x_ref[...], w_ref[...],
                            preferred_element_type=jnp.float32)

    @pl.when(k == pl.num_programs(2) - 1)
    def _():
        y = acc_ref[...] * s_ref[...] + b_ref[...]
        if relu:
            y = jnp.maximum(y, 0.0)
        o_ref[...] = y.astype(o_ref.dtype)


def _mm_affine_res_kernel(x_ref, w_ref, s_ref, b_ref, r_ref, o_ref, acc_ref,
                          *, relu):
    k = pl.program_id(2)

    @pl.when(k == 0)
    def _():
        acc_ref[...] = jnp.zeros_like(acc_ref)

    acc_ref[...] += jnp.dot(x_ref[...], w_ref[...],
                            preferred_element_type=jnp.float32)

    @pl.when(k == pl.num_programs(2) - 1)
    def _():
        y = acc_ref[...] * s_ref[...] + b_ref[...] + r_ref[...].astype(jnp.float32)
        if relu:
            y = jnp.maximum(y, 0.0)
        o_ref[...] = y.astype(o_ref.dtype)


def fused_matmul_affine(x, w, scale, bias, residual=None, relu=False,
                        out_dtype=jnp.bfloat16):
    """y = relu?((x @ w) * scale + bias [+ residual]) on a tiled (M,N,K) grid.

    x/w are fed to the MXU in bfloat16; accumulation and the folded-BN affine
    / residual / ReLU epilogue are float32.  Inputs are zero-padded to
    (8, 128)-aligned tiles; the result is sliced back to (M, N).
    """
    M, K = x.shape
    Kw, N = w.shape
    assert Kw == K

    TM = min(256, _round_up(M, 8))
    TN = min(256, _round_up(N, 128))
    TK = min(512, _round_up(K, 128))
    Mp, Np, Kp = _round_up(M, TM), _round_up(N, TN), _round_up(K, TK)

    xp = _pad2d(x.astype(jnp.bfloat16), Mp, Kp)
    wp = _pad2d(w.astype(jnp.bfloat16), Kp, Np)
    sp = _pad2d(scale.reshape(1, N).astype(jnp.float32), 1, Np)
    bp = _pad2d(bias.reshape(1, N).astype(jnp.float32), 1, Np)

    in_specs = [
        pl.BlockSpec((TM, TK), lambda i, j, k: (i, k)),
        pl.BlockSpec((TK, TN), lambda i, j, k: (k, j)),
        pl.BlockSpec((1, TN), lambda i, j, k: (0, j)),
        pl.BlockSpec((1, TN), lambda i, j, k: (0, j)),
    ]
    args = [xp, wp, sp, bp]
    io_alias = {}
    out_isize = jnp.dtype(out_dtype).itemsize
    bytes_accessed = xp.size * 2 + wp.size * 2 + (sp.size + bp.size) * 4
    bytes_accessed += Mp * Np * out_isize

    if residual is None:
        kern = functools.partial(_mm_affine_kernel, relu=relu)
    else:
        rp = _pad2d(residual.astype(out_dtype), Mp, Np)
        in_specs.append(pl.BlockSpec((TM, TN), lambda i, j, k: (i, j)))
        args.append(rp)
        kern = functools.partial(_mm_affine_res_kernel, relu=relu)
        io_alias = {4: 0}          # alias the residual buffer onto the output
        bytes_accessed += rp.size * out_isize

    out = pl.pallas_call(
        kern,
        out_shape=jax.ShapeDtypeStruct((Mp, Np), out_dtype),
        grid_spec=pltpu.PrefetchScalarGridSpec(
            num_scalar_prefetch=0,
            grid=(Mp // TM, Np // TN, Kp // TK),
            in_specs=in_specs,
            out_specs=pl.BlockSpec((TM, TN), lambda i, j, k: (i, j)),
            scratch_shapes=[pltpu.VMEM((TM, TN), jnp.float32)],
        ),
        compiler_params=pltpu.CompilerParams(
            dimension_semantics=("parallel", "parallel", "arbitrary"),
            vmem_limit_bytes=32 * 1024 * 1024,
        ),
        cost_estimate=pl.CostEstimate(
            flops=2 * Mp * Np * Kp, transcendentals=0,
            bytes_accessed=int(bytes_accessed)),
        input_output_aliases=io_alias,
    )(*args)
    return out[:M, :N]


# ---------------------- temporal statistics pooling --------------------------

def _tsp_kernel(x_ref, o_ref, *, var_denom):
    # x_ref: (1, F, T, C) bf16 block (one batch element); o_ref: (1, 2, F, C) f32
    x = x_ref[0, :, :, :].astype(jnp.float32)            # (F, T, C)
    t = x.shape[1]
    mean = jnp.sum(x, axis=1) * (1.0 / t)                # (F, C)
    diff = x - mean[:, None, :]
    var = jnp.sum(diff * diff, axis=1) * (1.0 / var_denom)   # unbiased (torch.var)
    o_ref[0, 0, :, :] = mean                             # two aligned slab writes
    o_ref[0, 1, :, :] = var


def temporal_statistics_pooling(x_nhwc):
    """Mean / unbiased var over the time axis of the NHWC activation, computed
    directly in NHWC (no HBM transpose of the big tensor).  Output (B,2,F,C)."""
    B, F, T, C = x_nhwc.shape
    denom = float(max(T - 1, 1))
    return pl.pallas_call(
        functools.partial(_tsp_kernel, var_denom=denom),
        out_shape=jax.ShapeDtypeStruct((B, 2, F, C), jnp.float32),
        grid=(B,),
        in_specs=[pl.BlockSpec((1, F, T, C), lambda b: (b, 0, 0, 0))],
        out_specs=pl.BlockSpec((1, 2, F, C), lambda b: (b, 0, 0, 0)),
        compiler_params=pltpu.CompilerParams(
            dimension_semantics=("parallel",)),
    )(x_nhwc)


# ------------------------------- conv glue -----------------------------------

def _im2col(x_nhwc, kh, kw, stride, pad):
    sh, sw = stride
    if pad:
        x_nhwc = jnp.pad(x_nhwc, ((0, 0), (pad, pad), (pad, pad), (0, 0)))
    N, Hp, Wp, C = x_nhwc.shape
    Ho = (Hp - kh) // sh + 1
    Wo = (Wp - kw) // sw + 1
    patches = []
    for i in range(kh):
        for j in range(kw):
            patches.append(
                x_nhwc[:, i:i + (Ho - 1) * sh + 1:sh,
                       j:j + (Wo - 1) * sw + 1:sw, :])
    cols = jnp.concatenate(patches, axis=-1)            # (N, Ho, Wo, kh*kw*C)
    return cols.reshape(N * Ho * Wo, kh * kw * C), (N, Ho, Wo)


def conv_bn(x_nhwc, w_oihw, bn_scale, bn_bias, stride=(1, 1), relu=False,
            residual_nhwc=None):
    # TODO(synk): the 3x3 im2col is still materialized (in bf16) on the XLA
    # side; an in-kernel halo-window gather would remove the remaining ~9x
    # HBM read duplication.
    cout, cin, kh, kw = w_oihw.shape
    pad = (kh - 1) // 2                                 # 1 for 3x3, 0 for 1x1
    cols, (N, Ho, Wo) = _im2col(x_nhwc.astype(jnp.bfloat16), kh, kw, stride, pad)
    w_mat = jnp.transpose(w_oihw, (2, 3, 1, 0)).reshape(kh * kw * cin, cout)
    res = None
    if residual_nhwc is not None:
        res = residual_nhwc.reshape(N * Ho * Wo, cout)
    out = fused_matmul_affine(cols, w_mat, bn_scale, bn_bias,
                              residual=res, relu=relu, out_dtype=jnp.bfloat16)
    return out.reshape(N, Ho, Wo, cout)


# ------------------------------ parameters -----------------------------------

def _kaiming_conv(key, cout, cin, kh, kw):
    # kaiming_normal_(mode='fan_out', nonlinearity='relu')
    fan_out = cout * kh * kw
    std = math.sqrt(2.0 / fan_out)
    return std * jax.random.normal(key, (cout, cin, kh, kw), jnp.float32)


def _bn_fold(c):
    # TODO(synk): BatchNorm reproduced in eval mode with freshly-initialized
    # stats (running_mean=0, running_var=1, gamma=1, beta=0); training-mode
    # batch statistics are not emulated.
    scale = jnp.full((c,), 1.0 / math.sqrt(1.0 + _BN_EPS), jnp.float32)
    bias = jnp.zeros((c,), jnp.float32)
    return scale, bias


def init_resnet_params(key, layers, num_filters, embedding_dim, n_mels):
    keys = iter(jax.random.split(key, 256))
    params = {}
    params['conv1_w'] = _kaiming_conv(next(keys), num_filters[0], 1, 3, 3)
    params['bn1'] = _bn_fold(num_filters[0])

    inplanes = num_filters[0]
    strides = [(1, 1), (2, 2), (2, 2), (2, 2)]
    stages = []
    for stage_idx, (planes, nblocks) in enumerate(zip(num_filters, layers)):
        blocks = []
        for b in range(nblocks):
            stride = strides[stage_idx] if b == 0 else (1, 1)
            blk = {
                'conv1_w': _kaiming_conv(next(keys), planes, inplanes, 3, 3),
                'bn1': _bn_fold(planes),
                'conv2_w': _kaiming_conv(next(keys), planes, planes, 3, 3),
                'bn2': _bn_fold(planes),
                'stride': stride,
            }
            if stride != (1, 1) or inplanes != planes:   # BasicBlock.expansion == 1
                blk['ds_w'] = _kaiming_conv(next(keys), planes, inplanes, 1, 1)
                blk['ds_bn'] = _bn_fold(planes)
            inplanes = planes
            blocks.append(blk)
        stages.append(blocks)
    params['stages'] = stages

    out_dim = num_filters[3] * (n_mels // 8)
    feat_dim = 2 * out_dim                               # TSP -> mean || var
    params['bn2'] = _bn_fold(feat_dim)
    params['fc_w'] = 0.05 * jax.random.normal(
        next(keys), (feat_dim, embedding_dim), jnp.float32)
    params['fc_b'] = jnp.zeros((embedding_dim,), jnp.float32)
    params['bn3'] = _bn_fold(embedding_dim)
    return params


# -------------------------------- forward ------------------------------------

def resnet_forward(params, x):
    # x: (B, n_mels, T)  ==  PyTorch input before .unsqueeze(1); NHWC layout.
    x = x[:, :, :, None].astype(jnp.bfloat16)            # (B, F, T, 1)
    x = conv_bn(x, params['conv1_w'], *params['bn1'], stride=(1, 1), relu=True)

    for blocks in params['stages']:
        for blk in blocks:
            identity = x
            out = conv_bn(x, blk['conv1_w'], *blk['bn1'],
                          stride=blk['stride'], relu=True)
            if 'ds_w' in blk:
                identity = conv_bn(x, blk['ds_w'], *blk['ds_bn'],
                                   stride=blk['stride'], relu=False)
            # conv2 + BN + residual + ReLU fused into one tiled kernel call
            x = conv_bn(out, blk['conv2_w'], *blk['bn2'], stride=(1, 1),
                        relu=True, residual_nhwc=identity)

    B, F, T, C = x.shape
    pooled = temporal_statistics_pooling(x)              # (B, 2, F, C) f32
    # Re-order the *small* pooled tensor to PyTorch feature order
    # d = c*F + f, mean||var (the big activation was never transposed).
    pooled = jnp.transpose(pooled, (0, 1, 3, 2)).reshape(B, 2 * C * F)

    # BN1d -> Linear -> BN1d head with BN2 folded into the FC weights so the
    # whole head is a single tiled matmul+affine kernel call.
    s2, b2 = params['bn2']
    s3, b3 = params['bn3']
    w_fold = s2[:, None] * params['fc_w']
    b_fold = b2 @ params['fc_w'] + params['fc_b']
    emb = fused_matmul_affine(pooled, w_fold, s3, b_fold * s3 + b3,
                              relu=False, out_dtype=jnp.float32)
    return emb


# ---------------------------------- main --------------------------------------

if __name__ == "__main__":
    key = jax.random.PRNGKey(0)
    k_param, k_x = jax.random.split(key)

    layers = [1, 1, 1, 1]            # small synthetic depth (ResNet34 uses [3,4,6,3])
    num_filters = [4, 8, 16, 32]
    n_mels, T, B, embedding_dim = 16, 16, 2, 16

    params = init_resnet_params(k_param, layers, num_filters, embedding_dim, n_mels)
    x = jax.random.normal(k_x, (B, n_mels, T), jnp.float32)

    fwd = jax.jit(functools.partial(resnet_forward, params))
    out = fwd(x)
    jax.block_until_ready(out)

    assert out.shape == (B, embedding_dim), out.shape
    assert out.dtype == jnp.float32
    print("KERNEL_OK")
</pallas_src>

<mosaic_0001>
module attributes {stable_mosaic.version = 11 : i64} {
  func.func @_mm_affine_kernel(%arg0: i32, %arg1: i32, %arg2: i32, %arg3: memref<256x128xbf16, #tpu.memory_space<vmem>>, %arg4: memref<128x128xbf16, #tpu.memory_space<vmem>>, %arg5: memref<1x128xf32, #tpu.memory_space<vmem>>, %arg6: memref<1x128xf32, #tpu.memory_space<vmem>>, %arg7: memref<256x128xbf16, #tpu.memory_space<vmem>>, %arg8: memref<256x128xf32, #tpu.memory_space<vmem>>) attributes {dimension_semantics = [#tpu.dimension_semantics<parallel>, #tpu.dimension_semantics<parallel>, #tpu.dimension_semantics<arbitrary>], iteration_bounds = array<i64: 2, 1, 1>, scalar_prefetch = 0 : i64, scratch_operands = 1 : i64, tpu.core_type = #tpu.core_type<tc>, window_params = [{transform_indices = @transform_0, window_bounds = array<i64: 256, 128>}, {transform_indices = @transform_1, window_bounds = array<i64: 128, 128>}, {transform_indices = @transform_2, window_bounds = array<i64: 1, 128>}, {transform_indices = @transform_3, window_bounds = array<i64: 1, 128>}, {transform_indices = @transform_4, window_bounds = array<i64: 256, 128>}]} {
    %c0_i32 = arith.constant 0 : i32
    %0 = arith.cmpi eq, %arg2, %c0_i32 : i32
    %1 = arith.extui %0 : i1 to i32
    %c0_i32_0 = arith.constant 0 : i32
    %2 = arith.cmpi ne, %1, %c0_i32_0 : i32
    scf.if %2 {
      %cst_10 = arith.constant 0.000000e+00 : f32
      %12 = vector.broadcast %cst_10 : f32 to vector<256x128xf32>
      %c0_11 = arith.constant 0 : index
      %c0_12 = arith.constant 0 : index
      %13 = vector.load %arg8[%c0_11, %c0_12] : memref<256x128xf32, #tpu.memory_space<vmem>>, vector<256x128xf32>
      tpu.vector_store %arg8[%c0_11, %c0_12], %12 {strides = array<i32>} : memref<256x128xf32, #tpu.memory_space<vmem>>, vector<256x128xf32>,
    } else {
    }
    %c0 = arith.constant 0 : index
    %c0_1 = arith.constant 0 : index
    %3 = vector.load %arg8[%c0, %c0_1] : memref<256x128xf32, #tpu.memory_space<vmem>>, vector<256x128xf32>
    %c0_2 = arith.constant 0 : index
    %c0_3 = arith.constant 0 : index
    %4 = vector.load %arg3[%c0_2, %c0_3] : memref<256x128xbf16, #tpu.memory_space<vmem>>, vector<256x128xbf16>
    %c0_4 = arith.constant 0 : index
    %c0_5 = arith.constant 0 : index
    %5 = vector.load %arg4[%c0_4, %c0_5] : memref<128x128xbf16, #tpu.memory_space<vmem>>, vector<128x128xbf16>
    %cst = arith.constant dense<0.000000e+00> : vector<256x128xf32>
    %6 = tpu.matmul %4, %5, %cst {dimension_numbers = #tpu.dot_dimension_numbers<[1], [0], [0], [1], [0, 0, 1, 1], [], []>} : vector<256x128xbf16>, vector<128x128xbf16>, vector<256x128xf32> -> vector<256x128xf32>
    %7 = arith.addf %3, %6 : vector<256x128xf32>
    %c0_6 = arith.constant 0 : index
    %c0_7 = arith.constant 0 : index
    %8 = vector.load %arg8[%c0_6, %c0_7] : memref<256x128xf32, #tpu.memory_space<vmem>>, vector<256x128xf32>
    tpu.vector_store %arg8[%c0_6, %c0_7], %7 {strides = array<i32>} : memref<256x128xf32, #tpu.memory_space<vmem>>, vector<256x128xf32>,
    %c0_i32_8 = arith.constant 0 : i32
    %9 = arith.cmpi eq, %arg2, %c0_i32_8 : i32
    %10 = arith.extui %9 : i1 to i32
    %c0_i32_9 = arith.constant 0 : i32
    %11 = arith.cmpi ne, %10, %c0_i32_9 : i32
    scf.if %11 {
      %c0_10 = arith.constant 0 : index
      %c0_11 = arith.constant 0 : index
      %12 = vector.load %arg8[%c0_10, %c0_11] : memref<256x128xf32, #tpu.memory_space<vmem>>, vector<256x128xf32>
      %c0_12 = arith.constant 0 : index
      %c0_13 = arith.constant 0 : index
      %13 = vector.load %arg5[%c0_12, %c0_13] : memref<1x128xf32, #tpu.memory_space<vmem>>, vector<1x128xf32>
      %14 = vector.broadcast %13 : vector<1x128xf32> to vector<256x128xf32>
      %15 = arith.mulf %12, %14 : vector<256x128xf32>
      %c0_14 = arith.constant 0 : index
      %c0_15 = arith.constant 0 : index
      %16 = vector.load %arg6[%c0_14, %c0_15] : memref<1x128xf32, #tpu.memory_space<vmem>>, vector<1x128xf32>
      %17 = vector.broadcast %16 : vector<1x128xf32> to vector<256x128xf32>
      %18 = arith.addf %15, %17 : vector<256x128xf32>
      %cst_16 = arith.constant 0.000000e+00 : f32
      %19 = vector.broadcast %cst_16 : f32 to vector<256x128xf32>
      %20 = arith.maximumf %18, %19 : vector<256x128xf32>
      %21 = arith.truncf %20 : vector<256x128xf32> to vector<256x128xbf16>
      %c0_17 = arith.constant 0 : index
      %c0_18 = arith.constant 0 : index
      %22 = vector.load %arg7[%c0_17, %c0_18] : memref<256x128xbf16, #tpu.memory_space<vmem>>, vector<256x128xbf16>
      tpu.vector_store %arg7[%c0_17, %c0_18], %21 {strides = array<i32>} : memref<256x128xbf16, #tpu.memory_space<vmem>>, vector<256x128xbf16>,
    } else {
    }
    return
  }
  func.func @transform_0(%arg0: i32, %arg1: i32, %arg2: i32) -> (i32, i32) {
    %c0_i32 = arith.constant 0 : i32
    return %arg0, %arg2 : i32, i32
  }
  func.func @transform_1(%arg0: i32, %arg1: i32, %arg2: i32) -> (i32, i32) {
    %c0_i32 = arith.constant 0 : i32
    return %arg2, %arg1 : i32, i32
  }
  func.func @transform_2(%arg0: i32, %arg1: i32, %arg2: i32) -> (i32, i32) {
    %c0_i32 = arith.constant 0 : i32
    %c0_i32_0 = arith.constant 0 : i32
    return %c0_i32, %arg1 : i32, i32
  }
  func.func @transform_3(%arg0: i32, %arg1: i32, %arg2: i32) -> (i32, i32) {
    %c0_i32 = arith.constant 0 : i32
    %c0_i32_0 = arith.constant 0 : i32
    return %c0_i32, %arg1 : i32, i32
  }
  func.func @transform_4(%arg0: i32, %arg1: i32, %arg2: i32) -> (i32, i32) {
    %c0_i32 = arith.constant 0 : i32
    return %arg0, %arg1 : i32, i32
  }
}

module attributes {stable_mosaic.version = 11 : i64} {
  func.func @_mm_affine_res_kernel(%arg0: i32, %arg1: i32, %arg2: i32, %arg3: memref<256x128xbf16, #tpu.memory_space<vmem>>, %arg4: memref<128x128xbf16, #tpu.memory_space<vmem>>, %arg5: memref<1x128xf32, #tpu.memory_space<vmem>>, %arg6: memref<1x128xf32, #tpu.memory_space<vmem>>, %arg7: memref<256x128xbf16, #tpu.memory_space<vmem>>, %arg8: memref<256x128xbf16, #tpu.memory_space<vmem>>, %arg9: memref<256x128xf32, #tpu.memory_space<vmem>>) attributes {dimension_semantics = [#tpu.dimension_semantics<parallel>, #tpu.dimension_semantics<parallel>, #tpu.dimension_semantics<arbitrary>], iteration_bounds = array<i64: 2, 1, 1>, scalar_prefetch = 0 : i64, scratch_operands = 1 : i64, tpu.core_type = #tpu.core_type<tc>, window_params = [{transform_indices = @transform_0, window_bounds = array<i64: 256, 128>}, {transform_indices = @transform_1, window_bounds = array<i64: 128, 128>}, {transform_indices = @transform_2, window_bounds = array<i64: 1, 128>}, {transform_indices = @transform_3, window_bounds = array<i64: 1, 128>}, {transform_indices = @transform_4, window_bounds = array<i64: 256, 128>}, {transform_indices = @transform_5, window_bounds = array<i64: 256, 128>}]} {
    %c0_i32 = arith.constant 0 : i32
    %0 = arith.cmpi eq, %arg2, %c0_i32 : i32
    %1 = arith.extui %0 : i1 to i32
    %c0_i32_0 = arith.constant 0 : i32
    %2 = arith.cmpi ne, %1, %c0_i32_0 : i32
    scf.if %2 {
      %cst_10 = arith.constant 0.000000e+00 : f32
      %12 = vector.broadcast %cst_10 : f32 to vector<256x128xf32>
      %c0_11 = arith.constant 0 : index
      %c0_12 = arith.constant 0 : index
      %13 = vector.load %arg9[%c0_11, %c0_12] : memref<256x128xf32, #tpu.memory_space<vmem>>, vector<256x128xf32>
      tpu.vector_store %arg9[%c0_11, %c0_12], %12 {strides = array<i32>} : memref<256x128xf32, #tpu.memory_space<vmem>>, vector<256x128xf32>,
    } else {
    }
    %c0 = arith.constant 0 : index
    %c0_1 = arith.constant 0 : index
    %3 = vector.load %arg9[%c0, %c0_1] : memref<256x128xf32, #tpu.memory_space<vmem>>, vector<256x128xf32>
    %c0_2 = arith.constant 0 : index
    %c0_3 = arith.constant 0 : index
    %4 = vector.load %arg3[%c0_2, %c0_3] : memref<256x128xbf16, #tpu.memory_space<vmem>>, vector<256x128xbf16>
    %c0_4 = arith.constant 0 : index
    %c0_5 = arith.constant 0 : index
    %5 = vector.load %arg4[%c0_4, %c0_5] : memref<128x128xbf16, #tpu.memory_space<vmem>>, vector<128x128xbf16>
    %cst = arith.constant dense<0.000000e+00> : vector<256x128xf32>
    %6 = tpu.matmul %4, %5, %cst {dimension_numbers = #tpu.dot_dimension_numbers<[1], [0], [0], [1], [0, 0, 1, 1], [], []>} : vector<256x128xbf16>, vector<128x128xbf16>, vector<256x128xf32> -> vector<256x128xf32>
    %7 = arith.addf %3, %6 : vector<256x128xf32>
    %c0_6 = arith.constant 0 : index
    %c0_7 = arith.constant 0 : index
    %8 = vector.load %arg9[%c0_6, %c0_7] : memref<256x128xf32, #tpu.memory_space<vmem>>, vector<256x128xf32>
    tpu.vector_store %arg9[%c0_6, %c0_7], %7 {strides = array<i32>} : memref<256x128xf32, #tpu.memory_space<vmem>>, vector<256x128xf32>,
    %c0_i32_8 = arith.constant 0 : i32
    %9 = arith.cmpi eq, %arg2, %c0_i32_8 : i32
    %10 = arith.extui %9 : i1 to i32
    %c0_i32_9 = arith.constant 0 : i32
    %11 = arith.cmpi ne, %10, %c0_i32_9 : i32
    scf.if %11 {
      %c0_10 = arith.constant 0 : index
      %c0_11 = arith.constant 0 : index
      %12 = vector.load %arg9[%c0_10, %c0_11] : memref<256x128xf32, #tpu.memory_space<vmem>>, vector<256x128xf32>
      %c0_12 = arith.constant 0 : index
      %c0_13 = arith.constant 0 : index
      %13 = vector.load %arg5[%c0_12, %c0_13] : memref<1x128xf32, #tpu.memory_space<vmem>>, vector<1x128xf32>
      %14 = vector.broadcast %13 : vector<1x128xf32> to vector<256x128xf32>
      %15 = arith.mulf %12, %14 : vector<256x128xf32>
      %c0_14 = arith.constant 0 : index
      %c0_15 = arith.constant 0 : index
      %16 = vector.load %arg6[%c0_14, %c0_15] : memref<1x128xf32, #tpu.memory_space<vmem>>, vector<1x128xf32>
      %17 = vector.broadcast %16 : vector<1x128xf32> to vector<256x128xf32>
      %18 = arith.addf %15, %17 : vector<256x128xf32>
      %c0_16 = arith.constant 0 : index
      %c0_17 = arith.constant 0 : index
      %19 = vector.load %arg7[%c0_16, %c0_17] : memref<256x128xbf16, #tpu.memory_space<vmem>>, vector<256x128xbf16>
      %20 = arith.extf %19 : vector<256x128xbf16> to vector<256x128xf32>
      %21 = arith.addf %18, %20 : vector<256x128xf32>
      %cst_18 = arith.constant 0.000000e+00 : f32
      %22 = vector.broadcast %cst_18 : f32 to vector<256x128xf32>
      %23 = arith.maximumf %21, %22 : vector<256x128xf32>
      %24 = arith.truncf %23 : vector<256x128xf32> to vector<256x128xbf16>
      %c0_19 = arith.constant 0 : index
      %c0_20 = arith.constant 0 : index
      %25 = vector.load %arg8[%c0_19, %c0_20] : memref<256x128xbf16, #tpu.memory_space<vmem>>, vector<256x128xbf16>
      tpu.vector_store %arg8[%c0_19, %c0_20], %24 {strides = array<i32>} : memref<256x128xbf16, #tpu.memory_space<vmem>>, vector<256x128xbf16>,
    } else {
    }
    return
  }
  func.func @transform_0(%arg0: i32, %arg1: i32, %arg2: i32) -> (i32, i32) {
    %c0_i32 = arith.constant 0 : i32
    return %arg0, %arg2 : i32, i32
  }
  func.func @transform_1(%arg0: i32, %arg1: i32, %arg2: i32) -> (i32, i32) {
    %c0_i32 = arith.constant 0 : i32
    return %arg2, %arg1 : i32, i32
  }
  func.func @transform_2(%arg0: i32, %arg1: i32, %arg2: i32) -> (i32, i32) {
    %c0_i32 = arith.constant 0 : i32
    %c0_i32_0 = arith.constant 0 : i32
    return %c0_i32, %arg1 : i32, i32
  }
  func.func @transform_3(%arg0: i32, %arg1: i32, %arg2: i32) -> (i32, i32) {
    %c0_i32 = arith.constant 0 : i32
    %c0_i32_0 = arith.constant 0 : i32
    return %c0_i32, %arg1 : i32, i32
  }
  func.func @transform_4(%arg0: i32, %arg1: i32, %arg2: i32) -> (i32, i32) {
    %c0_i32 = arith.constant 0 : i32
    return %arg0, %arg1 : i32, i32
  }
  func.func @transform_5(%arg0: i32, %arg1: i32, %arg2: i32) -> (i32, i32) {
    %c0_i32 = arith.constant 0 : i32
    return %arg0, %arg1 : i32, i32
  }
}

module attributes {stable_mosaic.version = 11 : i64} {
  func.func @_mm_affine_kernel(%arg0: i32, %arg1: i32, %arg2: i32, %arg3: memref<128x128xbf16, #tpu.memory_space<vmem>>, %arg4: memref<128x128xbf16, #tpu.memory_space<vmem>>, %arg5: memref<1x128xf32, #tpu.memory_space<vmem>>, %arg6: memref<1x128xf32, #tpu.memory_space<vmem>>, %arg7: memref<128x128xbf16, #tpu.memory_space<vmem>>, %arg8: memref<128x128xf32, #tpu.memory_space<vmem>>) attributes {dimension_semantics = [#tpu.dimension_semantics<parallel>, #tpu.dimension_semantics<parallel>, #tpu.dimension_semantics<arbitrary>], iteration_bounds = array<i64: 1, 1, 1>, scalar_prefetch = 0 : i64, scratch_operands = 1 : i64, tpu.core_type = #tpu.core_type<tc>, window_params = [{transform_indices = @transform_0, window_bounds = array<i64: 128, 128>}, {transform_indices = @transform_1, window_bounds = array<i64: 128, 128>}, {transform_indices = @transform_2, window_bounds = array<i64: 1, 128>}, {transform_indices = @transform_3, window_bounds = array<i64: 1, 128>}, {transform_indices = @transform_4, window_bounds = array<i64: 128, 128>}]} {
    %c0_i32 = arith.constant 0 : i32
    %0 = arith.cmpi eq, %arg2, %c0_i32 : i32
    %1 = arith.extui %0 : i1 to i32
    %c0_i32_0 = arith.constant 0 : i32
    %2 = arith.cmpi ne, %1, %c0_i32_0 : i32
    scf.if %2 {
      %cst_10 = arith.constant 0.000000e+00 : f32
      %12 = vector.broadcast %cst_10 : f32 to vector<128x128xf32>
      %c0_11 = arith.constant 0 : index
      %c0_12 = arith.constant 0 : index
      %13 = vector.load %arg8[%c0_11, %c0_12] : memref<128x128xf32, #tpu.memory_space<vmem>>, vector<128x128xf32>
      tpu.vector_store %arg8[%c0_11, %c0_12], %12 {strides = array<i32>} : memref<128x128xf32, #tpu.memory_space<vmem>>, vector<128x128xf32>,
    } else {
    }
    %c0 = arith.constant 0 : index
    %c0_1 = arith.constant 0 : index
    %3 = vector.load %arg8[%c0, %c0_1] : memref<128x128xf32, #tpu.memory_space<vmem>>, vector<128x128xf32>
    %c0_2 = arith.constant 0 : index
    %c0_3 = arith.constant 0 : index
    %4 = vector.load %arg3[%c0_2, %c0_3] : memref<128x128xbf16, #tpu.memory_space<vmem>>, vector<128x128xbf16>
    %c0_4 = arith.constant 0 : index
    %c0_5 = arith.constant 0 : index
    %5 = vector.load %arg4[%c0_4, %c0_5] : memref<128x128xbf16, #tpu.memory_space<vmem>>, vector<128x128xbf16>
    %cst = arith.constant dense<0.000000e+00> : vector<128x128xf32>
    %6 = tpu.matmul %4, %5, %cst {dimension_numbers = #tpu.dot_dimension_numbers<[1], [0], [0], [1], [0, 0, 1, 1], [], []>} : vector<128x128xbf16>, vector<128x128xbf16>, vector<128x128xf32> -> vector<128x128xf32>
    %7 = arith.addf %3, %6 : vector<128x128xf32>
    %c0_6 = arith.constant 0 : index
    %c0_7 = arith.constant 0 : index
    %8 = vector.load %arg8[%c0_6, %c0_7] : memref<128x128xf32, #tpu.memory_space<vmem>>, vector<128x128xf32>
    tpu.vector_store %arg8[%c0_6, %c0_7], %7 {strides = array<i32>} : memref<128x128xf32, #tpu.memory_space<vmem>>, vector<128x128xf32>,
    %c0_i32_8 = arith.constant 0 : i32
    %9 = arith.cmpi eq, %arg2, %c0_i32_8 : i32
    %10 = arith.extui %9 : i1 to i32
    %c0_i32_9 = arith.constant 0 : i32
    %11 = arith.cmpi ne, %10, %c0_i32_9 : i32
    scf.if %11 {
      %c0_10 = arith.constant 0 : index
      %c0_11 = arith.constant 0 : index
      %12 = vector.load %arg8[%c0_10, %c0_11] : memref<128x128xf32, #tpu.memory_space<vmem>>, vector<128x128xf32>
      %c0_12 = arith.constant 0 : index
      %c0_13 = arith.constant 0 : index
      %13 = vector.load %arg5[%c0_12, %c0_13] : memref<1x128xf32, #tpu.memory_space<vmem>>, vector<1x128xf32>
      %14 = vector.broadcast %13 : vector<1x128xf32> to vector<128x128xf32>
      %15 = arith.mulf %12, %14 : vector<128x128xf32>
      %c0_14 = arith.constant 0 : index
      %c0_15 = arith.constant 0 : index
      %16 = vector.load %arg6[%c0_14, %c0_15] : memref<1x128xf32, #tpu.memory_space<vmem>>, vector<1x128xf32>
      %17 = vector.broadcast %16 : vector<1x128xf32> to vector<128x128xf32>
      %18 = arith.addf %15, %17 : vector<128x128xf32>
      %cst_16 = arith.constant 0.000000e+00 : f32
      %19 = vector.broadcast %cst_16 : f32 to vector<128x128xf32>
      %20 = arith.maximumf %18, %19 : vector<128x128xf32>
      %21 = arith.truncf %20 : vector<128x128xf32> to vector<128x128xbf16>
      %c0_17 = arith.constant 0 : index
      %c0_18 = arith.constant 0 : index
      %22 = vector.load %arg7[%c0_17, %c0_18] : memref<128x128xbf16, #tpu.memory_space<vmem>>, vector<128x128xbf16>
      tpu.vector_store %arg7[%c0_17, %c0_18], %21 {strides = array<i32>} : memref<128x128xbf16, #tpu.memory_space<vmem>>, vector<128x128xbf16>,
    } else {
    }
    return
  }
  func.func @transform_0(%arg0: i32, %arg1: i32, %arg2: i32) -> (i32, i32) {
    %c0_i32 = arith.constant 0 : i32
    return %arg0, %arg2 : i32, i32
  }
  func.func @transform_1(%arg0: i32, %arg1: i32, %arg2: i32) -> (i32, i32) {
    %c0_i32 = arith.constant 0 : i32
    return %arg2, %arg1 : i32, i32
  }
  func.func @transform_2(%arg0: i32, %arg1: i32, %arg2: i32) -> (i32, i32) {
    %c0_i32 = arith.constant 0 : i32
    %c0_i32_0 = arith.constant 0 : i32
    return %c0_i32, %arg1 : i32, i32
  }
  func.func @transform_3(%arg0: i32, %arg1: i32, %arg2: i32) -> (i32, i32) {
    %c0_i32 = arith.constant 0 : i32
    %c0_i32_0 = arith.constant 0 : i32
    return %c0_i32, %arg1 : i32, i32
  }
  func.func @transform_4(%arg0: i32, %arg1: i32, %arg2: i32) -> (i32, i32) {
    %c0_i32 = arith.constant 0 : i32
    return %arg0, %arg1 : i32, i32
  }
}

module attributes {stable_mosaic.version = 11 : i64} {
  func.func @_mm_affine_kernel(%arg0: i32, %arg1: i32, %arg2: i32, %arg3: memref<128x128xbf16, #tpu.memory_space<vmem>>, %arg4: memref<128x128xbf16, #tpu.memory_space<vmem>>, %arg5: memref<1x128xf32, #tpu.memory_space<vmem>>, %arg6: memref<1x128xf32, #tpu.memory_space<vmem>>, %arg7: memref<128x128xbf16, #tpu.memory_space<vmem>>, %arg8: memref<128x128xf32, #tpu.memory_space<vmem>>) attributes {dimension_semantics = [#tpu.dimension_semantics<parallel>, #tpu.dimension_semantics<parallel>, #tpu.dimension_semantics<arbitrary>], iteration_bounds = array<i64: 1, 1, 1>, scalar_prefetch = 0 : i64, scratch_operands = 1 : i64, tpu.core_type = #tpu.core_type<tc>, window_params = [{transform_indices = @transform_0, window_bounds = array<i64: 128, 128>}, {transform_indices = @transform_1, window_bounds = array<i64: 128, 128>}, {transform_indices = @transform_2, window_bounds = array<i64: 1, 128>}, {transform_indices = @transform_3, window_bounds = array<i64: 1, 128>}, {transform_indices = @transform_4, window_bounds = array<i64: 128, 128>}]} {
    %c0_i32 = arith.constant 0 : i32
    %0 = arith.cmpi eq, %arg2, %c0_i32 : i32
    %1 = arith.extui %0 : i1 to i32
    %c0_i32_0 = arith.constant 0 : i32
    %2 = arith.cmpi ne, %1, %c0_i32_0 : i32
    scf.if %2 {
      %cst_10 = arith.constant 0.000000e+00 : f32
      %12 = vector.broadcast %cst_10 : f32 to vector<128x128xf32>
      %c0_11 = arith.constant 0 : index
      %c0_12 = arith.constant 0 : index
      %13 = vector.load %arg8[%c0_11, %c0_12] : memref<128x128xf32, #tpu.memory_space<vmem>>, vector<128x128xf32>
      tpu.vector_store %arg8[%c0_11, %c0_12], %12 {strides = array<i32>} : memref<128x128xf32, #tpu.memory_space<vmem>>, vector<128x128xf32>,
    } else {
    }
    %c0 = arith.constant 0 : index
    %c0_1 = arith.constant 0 : index
    %3 = vector.load %arg8[%c0, %c0_1] : memref<128x128xf32, #tpu.memory_space<vmem>>, vector<128x128xf32>
    %c0_2 = arith.constant 0 : index
    %c0_3 = arith.constant 0 : index
    %4 = vector.load %arg3[%c0_2, %c0_3] : memref<128x128xbf16, #tpu.memory_space<vmem>>, vector<128x128xbf16>
    %c0_4 = arith.constant 0 : index
    %c0_5 = arith.constant 0 : index
    %5 = vector.load %arg4[%c0_4, %c0_5] : memref<128x128xbf16, #tpu.memory_space<vmem>>, vector<128x128xbf16>
    %cst = arith.constant dense<0.000000e+00> : vector<128x128xf32>
    %6 = tpu.matmul %4, %5, %cst {dimension_numbers = #tpu.dot_dimension_numbers<[1], [0], [0], [1], [0, 0, 1, 1], [], []>} : vector<128x128xbf16>, vector<128x128xbf16>, vector<128x128xf32> -> vector<128x128xf32>
    %7 = arith.addf %3, %6 : vector<128x128xf32>
    %c0_6 = arith.constant 0 : index
    %c0_7 = arith.constant 0 : index
    %8 = vector.load %arg8[%c0_6, %c0_7] : memref<128x128xf32, #tpu.memory_space<vmem>>, vector<128x128xf32>
    tpu.vector_store %arg8[%c0_6, %c0_7], %7 {strides = array<i32>} : memref<128x128xf32, #tpu.memory_space<vmem>>, vector<128x128xf32>,
    %c0_i32_8 = arith.constant 0 : i32
    %9 = arith.cmpi eq, %arg2, %c0_i32_8 : i32
    %10 = arith.extui %9 : i1 to i32
    %c0_i32_9 = arith.constant 0 : i32
    %11 = arith.cmpi ne, %10, %c0_i32_9 : i32
    scf.if %11 {
      %c0_10 = arith.constant 0 : index
      %c0_11 = arith.constant 0 : index
      %12 = vector.load %arg8[%c0_10, %c0_11] : memref<128x128xf32, #tpu.memory_space<vmem>>, vector<128x128xf32>
      %c0_12 = arith.constant 0 : index
      %c0_13 = arith.constant 0 : index
      %13 = vector.load %arg5[%c0_12, %c0_13] : memref<1x128xf32, #tpu.memory_space<vmem>>, vector<1x128xf32>
      %14 = vector.broadcast %13 : vector<1x128xf32> to vector<128x128xf32>
      %15 = arith.mulf %12, %14 : vector<128x128xf32>
      %c0_14 = arith.constant 0 : index
      %c0_15 = arith.constant 0 : index
      %16 = vector.load %arg6[%c0_14, %c0_15] : memref<1x128xf32, #tpu.memory_space<vmem>>, vector<1x128xf32>
      %17 = vector.broadcast %16 : vector<1x128xf32> to vector<128x128xf32>
      %18 = arith.addf %15, %17 : vector<128x128xf32>
      %19 = arith.truncf %18 : vector<128x128xf32> to vector<128x128xbf16>
      %c0_16 = arith.constant 0 : index
      %c0_17 = arith.constant 0 : index
      %20 = vector.load %arg7[%c0_16, %c0_17] : memref<128x128xbf16, #tpu.memory_space<vmem>>, vector<128x128xbf16>
      tpu.vector_store %arg7[%c0_16, %c0_17], %19 {strides = array<i32>} : memref<128x128xbf16, #tpu.memory_space<vmem>>, vector<128x128xbf16>,
    } else {
    }
    return
  }
  func.func @transform_0(%arg0: i32, %arg1: i32, %arg2: i32) -> (i32, i32) {
    %c0_i32 = arith.constant 0 : i32
    return %arg0, %arg2 : i32, i32
  }
  func.func @transform_1(%arg0: i32, %arg1: i32, %arg2: i32) -> (i32, i32) {
    %c0_i32 = arith.constant 0 : i32
    return %arg2, %arg1 : i32, i32
  }
  func.func @transform_2(%arg0: i32, %arg1: i32, %arg2: i32) -> (i32, i32) {
    %c0_i32 = arith.constant 0 : i32
    %c0_i32_0 = arith.constant 0 : i32
    return %c0_i32, %arg1 : i32, i32
  }
  func.func @transform_3(%arg0: i32, %arg1: i32, %arg2: i32) -> (i32, i32) {
    %c0_i32 = arith.constant 0 : i32
    %c0_i32_0 = arith.constant 0 : i32
    return %c0_i32, %arg1 : i32, i32
  }
  func.func @transform_4(%arg0: i32, %arg1: i32, %arg2: i32) -> (i32, i32) {
    %c0_i32 = arith.constant 0 : i32
    return %arg0, %arg1 : i32, i32
  }
}

module attributes {stable_mosaic.version = 11 : i64} {
  func.func @_mm_affine_res_kernel(%arg0: i32, %arg1: i32, %arg2: i32, %arg3: memref<128x128xbf16, #tpu.memory_space<vmem>>, %arg4: memref<128x128xbf16, #tpu.memory_space<vmem>>, %arg5: memref<1x128xf32, #tpu.memory_space<vmem>>, %arg6: memref<1x128xf32, #tpu.memory_space<vmem>>, %arg7: memref<128x128xbf16, #tpu.memory_space<vmem>>, %arg8: memref<128x128xbf16, #tpu.memory_space<vmem>>, %arg9: memref<128x128xf32, #tpu.memory_space<vmem>>) attributes {dimension_semantics = [#tpu.dimension_semantics<parallel>, #tpu.dimension_semantics<parallel>, #tpu.dimension_semantics<arbitrary>], iteration_bounds = array<i64: 1, 1, 1>, scalar_prefetch = 0 : i64, scratch_operands = 1 : i64, tpu.core_type = #tpu.core_type<tc>, window_params = [{transform_indices = @transform_0, window_bounds = array<i64: 128, 128>}, {transform_indices = @transform_1, window_bounds = array<i64: 128, 128>}, {transform_indices = @transform_2, window_bounds = array<i64: 1, 128>}, {transform_indices = @transform_3, window_bounds = array<i64: 1, 128>}, {transform_indices = @transform_4, window_bounds = array<i64: 128, 128>}, {transform_indices = @transform_5, window_bounds = array<i64: 128, 128>}]} {
    %c0_i32 = arith.constant 0 : i32
    %0 = arith.cmpi eq, %arg2, %c0_i32 : i32
    %1 = arith.extui %0 : i1 to i32
    %c0_i32_0 = arith.constant 0 : i32
    %2 = arith.cmpi ne, %1, %c0_i32_0 : i32
    scf.if %2 {
      %cst_10 = arith.constant 0.000000e+00 : f32
      %12 = vector.broadcast %cst_10 : f32 to vector<128x128xf32>
      %c0_11 = arith.constant 0 : index
      %c0_12 = arith.constant 0 : index
      %13 = vector.load %arg9[%c0_11, %c0_12] : memref<128x128xf32, #tpu.memory_space<vmem>>, vector<128x128xf32>
      tpu.vector_store %arg9[%c0_11, %c0_12], %12 {strides = array<i32>} : memref<128x128xf32, #tpu.memory_space<vmem>>, vector<128x128xf32>,
    } else {
    }
    %c0 = arith.constant 0 : index
    %c0_1 = arith.constant 0 : index
    %3 = vector.load %arg9[%c0, %c0_1] : memref<128x128xf32, #tpu.memory_space<vmem>>, vector<128x128xf32>
    %c0_2 = arith.constant 0 : index
    %c0_3 = arith.constant 0 : index
    %4 = vector.load %arg3[%c0_2, %c0_3] : memref<128x128xbf16, #tpu.memory_space<vmem>>, vector<128x128xbf16>
    %c0_4 = arith.constant 0 : index
    %c0_5 = arith.constant 0 : index
    %5 = vector.load %arg4[%c0_4, %c0_5] : memref<128x128xbf16, #tpu.memory_space<vmem>>, vector<128x128xbf16>
    %cst = arith.constant dense<0.000000e+00> : vector<128x128xf32>
    %6 = tpu.matmul %4, %5, %cst {dimension_numbers = #tpu.dot_dimension_numbers<[1], [0], [0], [1], [0, 0, 1, 1], [], []>} : vector<128x128xbf16>, vector<128x128xbf16>, vector<128x128xf32> -> vector<128x128xf32>
    %7 = arith.addf %3, %6 : vector<128x128xf32>
    %c0_6 = arith.constant 0 : index
    %c0_7 = arith.constant 0 : index
    %8 = vector.load %arg9[%c0_6, %c0_7] : memref<128x128xf32, #tpu.memory_space<vmem>>, vector<128x128xf32>
    tpu.vector_store %arg9[%c0_6, %c0_7], %7 {strides = array<i32>} : memref<128x128xf32, #tpu.memory_space<vmem>>, vector<128x128xf32>,
    %c0_i32_8 = arith.constant 0 : i32
    %9 = arith.cmpi eq, %arg2, %c0_i32_8 : i32
    %10 = arith.extui %9 : i1 to i32
    %c0_i32_9 = arith.constant 0 : i32
    %11 = arith.cmpi ne, %10, %c0_i32_9 : i32
    scf.if %11 {
      %c0_10 = arith.constant 0 : index
      %c0_11 = arith.constant 0 : index
      %12 = vector.load %arg9[%c0_10, %c0_11] : memref<128x128xf32, #tpu.memory_space<vmem>>, vector<128x128xf32>
      %c0_12 = arith.constant 0 : index
      %c0_13 = arith.constant 0 : index
      %13 = vector.load %arg5[%c0_12, %c0_13] : memref<1x128xf32, #tpu.memory_space<vmem>>, vector<1x128xf32>
      %14 = vector.broadcast %13 : vector<1x128xf32> to vector<128x128xf32>
      %15 = arith.mulf %12, %14 : vector<128x128xf32>
      %c0_14 = arith.constant 0 : index
      %c0_15 = arith.constant 0 : index
      %16 = vector.load %arg6[%c0_14, %c0_15] : memref<1x128xf32, #tpu.memory_space<vmem>>, vector<1x128xf32>
      %17 = vector.broadcast %16 : vector<1x128xf32> to vector<128x128xf32>
      %18 = arith.addf %15, %17 : vector<128x128xf32>
      %c0_16 = arith.constant 0 : index
      %c0_17 = arith.constant 0 : index
      %19 = vector.load %arg7[%c0_16, %c0_17] : memref<128x128xbf16, #tpu.memory_space<vmem>>, vector<128x128xbf16>
      %20 = arith.extf %19 : vector<128x128xbf16> to vector<128x128xf32>
      %21 = arith.addf %18, %20 : vector<128x128xf32>
      %cst_18 = arith.constant 0.000000e+00 : f32
      %22 = vector.broadcast %cst_18 : f32 to vector<128x128xf32>
      %23 = arith.maximumf %21, %22 : vector<128x128xf32>
      %24 = arith.truncf %23 : vector<128x128xf32> to vector<128x128xbf16>
      %c0_19 = arith.constant 0 : index
      %c0_20 = arith.constant 0 : index
      %25 = vector.load %arg8[%c0_19, %c0_20] : memref<128x128xbf16, #tpu.memory_space<vmem>>, vector<128x128xbf16>
      tpu.vector_store %arg8[%c0_19, %c0_20], %24 {strides = array<i32>} : memref<128x128xbf16, #tpu.memory_space<vmem>>, vector<128x128xbf16>,
    } else {
    }
    return
  }
  func.func @transform_0(%arg0: i32, %arg1: i32, %arg2: i32) -> (i32, i32) {
    %c0_i32 = arith.constant 0 : i32
    return %arg0, %arg2 : i32, i32
  }
  func.func @transform_1(%arg0: i32, %arg1: i32, %arg2: i32) -> (i32, i32) {
    %c0_i32 = arith.constant 0 : i32
    return %arg2, %arg1 : i32, i32
  }
  func.func @transform_2(%arg0: i32, %arg1: i32, %arg2: i32) -> (i32, i32) {
    %c0_i32 = arith.constant 0 : i32
    %c0_i32_0 = arith.constant 0 : i32
    return %c0_i32, %arg1 : i32, i32
  }
  func.func @transform_3(%arg0: i32, %arg1: i32, %arg2: i32) -> (i32, i32) {
    %c0_i32 = arith.constant 0 : i32
    %c0_i32_0 = arith.constant 0 : i32
    return %c0_i32, %arg1 : i32, i32
  }
  func.func @transform_4(%arg0: i32, %arg1: i32, %arg2: i32) -> (i32, i32) {
    %c0_i32 = arith.constant 0 : i32
    return %arg0, %arg1 : i32, i32
  }
  func.func @transform_5(%arg0: i32, %arg1: i32, %arg2: i32) -> (i32, i32) {
    %c0_i32 = arith.constant 0 : i32
    return %arg0, %arg1 : i32, i32
  }
}

module attributes {stable_mosaic.version = 11 : i64} {
  func.func @_mm_affine_kernel(%arg0: i32, %arg1: i32, %arg2: i32, %arg3: memref<32x128xbf16, #tpu.memory_space<vmem>>, %arg4: memref<128x128xbf16, #tpu.memory_space<vmem>>, %arg5: memref<1x128xf32, #tpu.memory_space<vmem>>, %arg6: memref<1x128xf32, #tpu.memory_space<vmem>>, %arg7: memref<32x128xbf16, #tpu.memory_space<vmem>>, %arg8: memref<32x128xf32, #tpu.memory_space<vmem>>) attributes {dimension_semantics = [#tpu.dimension_semantics<parallel>, #tpu.dimension_semantics<parallel>, #tpu.dimension_semantics<arbitrary>], iteration_bounds = array<i64: 1, 1, 1>, scalar_prefetch = 0 : i64, scratch_operands = 1 : i64, tpu.core_type = #tpu.core_type<tc>, window_params = [{transform_indices = @transform_0, window_bounds = array<i64: 32, 128>}, {transform_indices = @transform_1, window_bounds = array<i64: 128, 128>}, {transform_indices = @transform_2, window_bounds = array<i64: 1, 128>}, {transform_indices = @transform_3, window_bounds = array<i64: 1, 128>}, {transform_indices = @transform_4, window_bounds = array<i64: 32, 128>}]} {
    %c0_i32 = arith.constant 0 : i32
    %0 = arith.cmpi eq, %arg2, %c0_i32 : i32
    %1 = arith.extui %0 : i1 to i32
    %c0_i32_0 = arith.constant 0 : i32
    %2 = arith.cmpi ne, %1, %c0_i32_0 : i32
    scf.if %2 {
      %cst_10 = arith.constant 0.000000e+00 : f32
      %12 = vector.broadcast %cst_10 : f32 to vector<32x128xf32>
      %c0_11 = arith.constant 0 : index
      %c0_12 = arith.constant 0 : index
      %13 = vector.load %arg8[%c0_11, %c0_12] : memref<32x128xf32, #tpu.memory_space<vmem>>, vector<32x128xf32>
      tpu.vector_store %arg8[%c0_11, %c0_12], %12 {strides = array<i32>} : memref<32x128xf32, #tpu.memory_space<vmem>>, vector<32x128xf32>,
    } else {
    }
    %c0 = arith.constant 0 : index
    %c0_1 = arith.constant 0 : index
    %3 = vector.load %arg8[%c0, %c0_1] : memref<32x128xf32, #tpu.memory_space<vmem>>, vector<32x128xf32>
    %c0_2 = arith.constant 0 : index
    %c0_3 = arith.constant 0 : index
    %4 = vector.load %arg3[%c0_2, %c0_3] : memref<32x128xbf16, #tpu.memory_space<vmem>>, vector<32x128xbf16>
    %c0_4 = arith.constant 0 : index
    %c0_5 = arith.constant 0 : index
    %5 = vector.load %arg4[%c0_4, %c0_5] : memref<128x128xbf16, #tpu.memory_space<vmem>>, vector<128x128xbf16>
    %cst = arith.constant dense<0.000000e+00> : vector<32x128xf32>
    %6 = tpu.matmul %4, %5, %cst {dimension_numbers = #tpu.dot_dimension_numbers<[1], [0], [0], [1], [0, 0, 1, 1], [], []>} : vector<32x128xbf16>, vector<128x128xbf16>, vector<32x128xf32> -> vector<32x128xf32>
    %7 = arith.addf %3, %6 : vector<32x128xf32>
    %c0_6 = arith.constant 0 : index
    %c0_7 = arith.constant 0 : index
    %8 = vector.load %arg8[%c0_6, %c0_7] : memref<32x128xf32, #tpu.memory_space<vmem>>, vector<32x128xf32>
    tpu.vector_store %arg8[%c0_6, %c0_7], %7 {strides = array<i32>} : memref<32x128xf32, #tpu.memory_space<vmem>>, vector<32x128xf32>,
    %c0_i32_8 = arith.constant 0 : i32
    %9 = arith.cmpi eq, %arg2, %c0_i32_8 : i32
    %10 = arith.extui %9 : i1 to i32
    %c0_i32_9 = arith.constant 0 : i32
    %11 = arith.cmpi ne, %10, %c0_i32_9 : i32
    scf.if %11 {
      %c0_10 = arith.constant 0 : index
      %c0_11 = arith.constant 0 : index
      %12 = vector.load %arg8[%c0_10, %c0_11] : memref<32x128xf32, #tpu.memory_space<vmem>>, vector<32x128xf32>
      %c0_12 = arith.constant 0 : index
      %c0_13 = arith.constant 0 : index
      %13 = vector.load %arg5[%c0_12, %c0_13] : memref<1x128xf32, #tpu.memory_space<vmem>>, vector<1x128xf32>
      %14 = vector.broadcast %13 : vector<1x128xf32> to vector<32x128xf32>
      %15 = arith.mulf %12, %14 : vector<32x128xf32>
      %c0_14 = arith.constant 0 : index
      %c0_15 = arith.constant 0 : index
      %16 = vector.load %arg6[%c0_14, %c0_15] : memref<1x128xf32, #tpu.memory_space<vmem>>, vector<1x128xf32>
      %17 = vector.broadcast %16 : vector<1x128xf32> to vector<32x128xf32>
      %18 = arith.addf %15, %17 : vector<32x128xf32>
      %cst_16 = arith.constant 0.000000e+00 : f32
      %19 = vector.broadcast %cst_16 : f32 to vector<32x128xf32>
      %20 = arith.maximumf %18, %19 : vector<32x128xf32>
      %21 = arith.truncf %20 : vector<32x128xf32> to vector<32x128xbf16>
      %c0_17 = arith.constant 0 : index
      %c0_18 = arith.constant 0 : index
      %22 = vector.load %arg7[%c0_17, %c0_18] : memref<32x128xbf16, #tpu.memory_space<vmem>>, vector<32x128xbf16>
      tpu.vector_store %arg7[%c0_17, %c0_18], %21 {strides = array<i32>} : memref<32x128xbf16, #tpu.memory_space<vmem>>, vector<32x128xbf16>,
    } else {
    }
    return
  }
  func.func @transform_0(%arg0: i32, %arg1: i32, %arg2: i32) -> (i32, i32) {
    %c0_i32 = arith.constant 0 : i32
    return %arg0, %arg2 : i32, i32
  }
  func.func @transform_1(%arg0: i32, %arg1: i32, %arg2: i32) -> (i32, i32) {
    %c0_i32 = arith.constant 0 : i32
    return %arg2, %arg1 : i32, i32
  }
  func.func @transform_2(%arg0: i32, %arg1: i32, %arg2: i32) -> (i32, i32) {
    %c0_i32 = arith.constant 0 : i32
    %c0_i32_0 = arith.constant 0 : i32
    return %c0_i32, %arg1 : i32, i32
  }
  func.func @transform_3(%arg0: i32, %arg1: i32, %arg2: i32) -> (i32, i32) {
    %c0_i32 = arith.constant 0 : i32
    %c0_i32_0 = arith.constant 0 : i32
    return %c0_i32, %arg1 : i32, i32
  }
  func.func @transform_4(%arg0: i32, %arg1: i32, %arg2: i32) -> (i32, i32) {
    %c0_i32 = arith.constant 0 : i32
    return %arg0, %arg1 : i32, i32
  }
}

module attributes {stable_mosaic.version = 11 : i64} {
  func.func @_mm_affine_kernel(%arg0: i32, %arg1: i32, %arg2: i32, %arg3: memref<32x128xbf16, #tpu.memory_space<vmem>>, %arg4: memref<128x128xbf16, #tpu.memory_space<vmem>>, %arg5: memref<1x128xf32, #tpu.memory_space<vmem>>, %arg6: memref<1x128xf32, #tpu.memory_space<vmem>>, %arg7: memref<32x128xbf16, #tpu.memory_space<vmem>>, %arg8: memref<32x128xf32, #tpu.memory_space<vmem>>) attributes {dimension_semantics = [#tpu.dimension_semantics<parallel>, #tpu.dimension_semantics<parallel>, #tpu.dimension_semantics<arbitrary>], iteration_bounds = array<i64: 1, 1, 1>, scalar_prefetch = 0 : i64, scratch_operands = 1 : i64, tpu.core_type = #tpu.core_type<tc>, window_params = [{transform_indices = @transform_0, window_bounds = array<i64: 32, 128>}, {transform_indices = @transform_1, window_bounds = array<i64: 128, 128>}, {transform_indices = @transform_2, window_bounds = array<i64: 1, 128>}, {transform_indices = @transform_3, window_bounds = array<i64: 1, 128>}, {transform_indices = @transform_4, window_bounds = array<i64: 32, 128>}]} {
    %c0_i32 = arith.constant 0 : i32
    %0 = arith.cmpi eq, %arg2, %c0_i32 : i32
    %1 = arith.extui %0 : i1 to i32
    %c0_i32_0 = arith.constant 0 : i32
    %2 = arith.cmpi ne, %1, %c0_i32_0 : i32
    scf.if %2 {
      %cst_10 = arith.constant 0.000000e+00 : f32
      %12 = vector.broadcast %cst_10 : f32 to vector<32x128xf32>
      %c0_11 = arith.constant 0 : index
      %c0_12 = arith.constant 0 : index
      %13 = vector.load %arg8[%c0_11, %c0_12] : memref<32x128xf32, #tpu.memory_space<vmem>>, vector<32x128xf32>
      tpu.vector_store %arg8[%c0_11, %c0_12], %12 {strides = array<i32>} : memref<32x128xf32, #tpu.memory_space<vmem>>, vector<32x128xf32>,
    } else {
    }
    %c0 = arith.constant 0 : index
    %c0_1 = arith.constant 0 : index
    %3 = vector.load %arg8[%c0, %c0_1] : memref<32x128xf32, #tpu.memory_space<vmem>>, vector<32x128xf32>
    %c0_2 = arith.constant 0 : index
    %c0_3 = arith.constant 0 : index
    %4 = vector.load %arg3[%c0_2, %c0_3] : memref<32x128xbf16, #tpu.memory_space<vmem>>, vector<32x128xbf16>
    %c0_4 = arith.constant 0 : index
    %c0_5 = arith.constant 0 : index
    %5 = vector.load %arg4[%c0_4, %c0_5] : memref<128x128xbf16, #tpu.memory_space<vmem>>, vector<128x128xbf16>
    %cst = arith.constant dense<0.000000e+00> : vector<32x128xf32>
    %6 = tpu.matmul %4, %5, %cst {dimension_numbers = #tpu.dot_dimension_numbers<[1], [0], [0], [1], [0, 0, 1, 1], [], []>} : vector<32x128xbf16>, vector<128x128xbf16>, vector<32x128xf32> -> vector<32x128xf32>
    %7 = arith.addf %3, %6 : vector<32x128xf32>
    %c0_6 = arith.constant 0 : index
    %c0_7 = arith.constant 0 : index
    %8 = vector.load %arg8[%c0_6, %c0_7] : memref<32x128xf32, #tpu.memory_space<vmem>>, vector<32x128xf32>
    tpu.vector_store %arg8[%c0_6, %c0_7], %7 {strides = array<i32>} : memref<32x128xf32, #tpu.memory_space<vmem>>, vector<32x128xf32>,
    %c0_i32_8 = arith.constant 0 : i32
    %9 = arith.cmpi eq, %arg2, %c0_i32_8 : i32
    %10 = arith.extui %9 : i1 to i32
    %c0_i32_9 = arith.constant 0 : i32
    %11 = arith.cmpi ne, %10, %c0_i32_9 : i32
    scf.if %11 {
      %c0_10 = arith.constant 0 : index
      %c0_11 = arith.constant 0 : index
      %12 = vector.load %arg8[%c0_10, %c0_11] : memref<32x128xf32, #tpu.memory_space<vmem>>, vector<32x128xf32>
      %c0_12 = arith.constant 0 : index
      %c0_13 = arith.constant 0 : index
      %13 = vector.load %arg5[%c0_12, %c0_13] : memref<1x128xf32, #tpu.memory_space<vmem>>, vector<1x128xf32>
      %14 = vector.broadcast %13 : vector<1x128xf32> to vector<32x128xf32>
      %15 = arith.mulf %12, %14 : vector<32x128xf32>
      %c0_14 = arith.constant 0 : index
      %c0_15 = arith.constant 0 : index
      %16 = vector.load %arg6[%c0_14, %c0_15] : memref<1x128xf32, #tpu.memory_space<vmem>>, vector<1x128xf32>
      %17 = vector.broadcast %16 : vector<1x128xf32> to vector<32x128xf32>
      %18 = arith.addf %15, %17 : vector<32x128xf32>
      %19 = arith.truncf %18 : vector<32x128xf32> to vector<32x128xbf16>
      %c0_16 = arith.constant 0 : index
      %c0_17 = arith.constant 0 : index
      %20 = vector.load %arg7[%c0_16, %c0_17] : memref<32x128xbf16, #tpu.memory_space<vmem>>, vector<32x128xbf16>
      tpu.vector_store %arg7[%c0_16, %c0_17], %19 {strides = array<i32>} : memref<32x128xbf16, #tpu.memory_space<vmem>>, vector<32x128xbf16>,
    } else {
    }
    return
  }
  func.func @transform_0(%arg0: i32, %arg1: i32, %arg2: i32) -> (i32, i32) {
    %c0_i32 = arith.constant 0 : i32
    return %arg0, %arg2 : i32, i32
  }
  func.func @transform_1(%arg0: i32, %arg1: i32, %arg2: i32) -> (i32, i32) {
    %c0_i32 = arith.constant 0 : i32
    return %arg2, %arg1 : i32, i32
  }
  func.func @transform_2(%arg0: i32, %arg1: i32, %arg2: i32) -> (i32, i32) {
    %c0_i32 = arith.constant 0 : i32
    %c0_i32_0 = arith.constant 0 : i32
    return %c0_i32, %arg1 : i32, i32
  }
  func.func @transform_3(%arg0: i32, %arg1: i32, %arg2: i32) -> (i32, i32) {
    %c0_i32 = arith.constant 0 : i32
    %c0_i32_0 = arith.constant 0 : i32
    return %c0_i32, %arg1 : i32, i32
  }
  func.func @transform_4(%arg0: i32, %arg1: i32, %arg2: i32) -> (i32, i32) {
    %c0_i32 = arith.constant 0 : i32
    return %arg0, %arg1 : i32, i32
  }
}

module attributes {stable_mosaic.version = 11 : i64} {
  func.func @_mm_affine_res_kernel(%arg0: i32, %arg1: i32, %arg2: i32, %arg3: memref<32x256xbf16, #tpu.memory_space<vmem>>, %arg4: memref<256x128xbf16, #tpu.memory_space<vmem>>, %arg5: memref<1x128xf32, #tpu.memory_space<vmem>>, %arg6: memref<1x128xf32, #tpu.memory_space<vmem>>, %arg7: memref<32x128xbf16, #tpu.memory_space<vmem>>, %arg8: memref<32x128xbf16, #tpu.memory_space<vmem>>, %arg9: memref<32x128xf32, #tpu.memory_space<vmem>>) attributes {dimension_semantics = [#tpu.dimension_semantics<parallel>, #tpu.dimension_semantics<parallel>, #tpu.dimension_semantics<arbitrary>], iteration_bounds = array<i64: 1, 1, 1>, scalar_prefetch = 0 : i64, scratch_operands = 1 : i64, tpu.core_type = #tpu.core_type<tc>, window_params = [{transform_indices = @transform_0, window_bounds = array<i64: 32, 256>}, {transform_indices = @transform_1, window_bounds = array<i64: 256, 128>}, {transform_indices = @transform_2, window_bounds = array<i64: 1, 128>}, {transform_indices = @transform_3, window_bounds = array<i64: 1, 128>}, {transform_indices = @transform_4, window_bounds = array<i64: 32, 128>}, {transform_indices = @transform_5, window_bounds = array<i64: 32, 128>}]} {
    %c0_i32 = arith.constant 0 : i32
    %0 = arith.cmpi eq, %arg2, %c0_i32 : i32
    %1 = arith.extui %0 : i1 to i32
    %c0_i32_0 = arith.constant 0 : i32
    %2 = arith.cmpi ne, %1, %c0_i32_0 : i32
    scf.if %2 {
      %cst_10 = arith.constant 0.000000e+00 : f32
      %12 = vector.broadcast %cst_10 : f32 to vector<32x128xf32>
      %c0_11 = arith.constant 0 : index
      %c0_12 = arith.constant 0 : index
      %13 = vector.load %arg9[%c0_11, %c0_12] : memref<32x128xf32, #tpu.memory_space<vmem>>, vector<32x128xf32>
      tpu.vector_store %arg9[%c0_11, %c0_12], %12 {strides = array<i32>} : memref<32x128xf32, #tpu.memory_space<vmem>>, vector<32x128xf32>,
    } else {
    }
    %c0 = arith.constant 0 : index
    %c0_1 = arith.constant 0 : index
    %3 = vector.load %arg9[%c0, %c0_1] : memref<32x128xf32, #tpu.memory_space<vmem>>, vector<32x128xf32>
    %c0_2 = arith.constant 0 : index
    %c0_3 = arith.constant 0 : index
    %4 = vector.load %arg3[%c0_2, %c0_3] : memref<32x256xbf16, #tpu.memory_space<vmem>>, vector<32x256xbf16>
    %c0_4 = arith.constant 0 : index
    %c0_5 = arith.constant 0 : index
    %5 = vector.load %arg4[%c0_4, %c0_5] : memref<256x128xbf16, #tpu.memory_space<vmem>>, vector<256x128xbf16>
    %cst = arith.constant dense<0.000000e+00> : vector<32x128xf32>
    %6 = tpu.matmul %4, %5, %cst {dimension_numbers = #tpu.dot_dimension_numbers<[1], [0], [0], [1], [0, 0, 1, 1], [], []>} : vector<32x256xbf16>, vector<256x128xbf16>, vector<32x128xf32> -> vector<32x128xf32>
    %7 = arith.addf %3, %6 : vector<32x128xf32>
    %c0_6 = arith.constant 0 : index
    %c0_7 = arith.constant 0 : index
    %8 = vector.load %arg9[%c0_6, %c0_7] : memref<32x128xf32, #tpu.memory_space<vmem>>, vector<32x128xf32>
    tpu.vector_store %arg9[%c0_6, %c0_7], %7 {strides = array<i32>} : memref<32x128xf32, #tpu.memory_space<vmem>>, vector<32x128xf32>,
    %c0_i32_8 = arith.constant 0 : i32
    %9 = arith.cmpi eq, %arg2, %c0_i32_8 : i32
    %10 = arith.extui %9 : i1 to i32
    %c0_i32_9 = arith.constant 0 : i32
    %11 = arith.cmpi ne, %10, %c0_i32_9 : i32
    scf.if %11 {
      %c0_10 = arith.constant 0 : index
      %c0_11 = arith.constant 0 : index
      %12 = vector.load %arg9[%c0_10, %c0_11] : memref<32x128xf32, #tpu.memory_space<vmem>>, vector<32x128xf32>
      %c0_12 = arith.constant 0 : index
      %c0_13 = arith.constant 0 : index
      %13 = vector.load %arg5[%c0_12, %c0_13] : memref<1x128xf32, #tpu.memory_space<vmem>>, vector<1x128xf32>
      %14 = vector.broadcast %13 : vector<1x128xf32> to vector<32x128xf32>
      %15 = arith.mulf %12, %14 : vector<32x128xf32>
      %c0_14 = arith.constant 0 : index
      %c0_15 = arith.constant 0 : index
      %16 = vector.load %arg6[%c0_14, %c0_15] : memref<1x128xf32, #tpu.memory_space<vmem>>, vector<1x128xf32>
      %17 = vector.broadcast %16 : vector<1x128xf32> to vector<32x128xf32>
      %18 = arith.addf %15, %17 : vector<32x128xf32>
      %c0_16 = arith.constant 0 : index
      %c0_17 = arith.constant 0 : index
      %19 = vector.load %arg7[%c0_16, %c0_17] : memref<32x128xbf16, #tpu.memory_space<vmem>>, vector<32x128xbf16>
      %20 = arith.extf %19 : vector<32x128xbf16> to vector<32x128xf32>
      %21 = arith.addf %18, %20 : vector<32x128xf32>
      %cst_18 = arith.constant 0.000000e+00 : f32
      %22 = vector.broadcast %cst_18 : f32 to vector<32x128xf32>
      %23 = arith.maximumf %21, %22 : vector<32x128xf32>
      %24 = arith.truncf %23 : vector<32x128xf32> to vector<32x128xbf16>
      %c0_19 = arith.constant 0 : index
      %c0_20 = arith.constant 0 : index
      %25 = vector.load %arg8[%c0_19, %c0_20] : memref<32x128xbf16, #tpu.memory_space<vmem>>, vector<32x128xbf16>
      tpu.vector_store %arg8[%c0_19, %c0_20], %24 {strides = array<i32>} : memref<32x128xbf16, #tpu.memory_space<vmem>>, vector<32x128xbf16>,
    } else {
    }
    return
  }
  func.func @transform_0(%arg0: i32, %arg1: i32, %arg2: i32) -> (i32, i32) {
    %c0_i32 = arith.constant 0 : i32
    return %arg0, %arg2 : i32, i32
  }
  func.func @transform_1(%arg0: i32, %arg1: i32, %arg2: i32) -> (i32, i32) {
    %c0_i32 = arith.constant 0 : i32
    return %arg2, %arg1 : i32, i32
  }
  func.func @transform_2(%arg0: i32, %arg1: i32, %arg2: i32) -> (i32, i32) {
    %c0_i32 = arith.constant 0 : i32
    %c0_i32_0 = arith.constant 0 : i32
    return %c0_i32, %arg1 : i32, i32
  }
  func.func @transform_3(%arg0: i32, %arg1: i32, %arg2: i32) -> (i32, i32) {
    %c0_i32 = arith.constant 0 : i32
    %c0_i32_0 = arith.constant 0 : i32
    return %c0_i32, %arg1 : i32, i32
  }
  func.func @transform_4(%arg0: i32, %arg1: i32, %arg2: i32) -> (i32, i32) {
    %c0_i32 = arith.constant 0 : i32
    return %arg0, %arg1 : i32, i32
  }
  func.func @transform_5(%arg0: i32, %arg1: i32, %arg2: i32) -> (i32, i32) {
    %c0_i32 = arith.constant 0 : i32
    return %arg0, %arg1 : i32, i32
  }
}

module attributes {stable_mosaic.version = 11 : i64} {
  func.func @_mm_affine_kernel(%arg0: i32, %arg1: i32, %arg2: i32, %arg3: memref<8x256xbf16, #tpu.memory_space<vmem>>, %arg4: memref<256x128xbf16, #tpu.memory_space<vmem>>, %arg5: memref<1x128xf32, #tpu.memory_space<vmem>>, %arg6: memref<1x128xf32, #tpu.memory_space<vmem>>, %arg7: memref<8x128xbf16, #tpu.memory_space<vmem>>, %arg8: memref<8x128xf32, #tpu.memory_space<vmem>>) attributes {dimension_semantics = [#tpu.dimension_semantics<parallel>, #tpu.dimension_semantics<parallel>, #tpu.dimension_semantics<arbitrary>], iteration_bounds = array<i64: 1, 1, 1>, scalar_prefetch = 0 : i64, scratch_operands = 1 : i64, tpu.core_type = #tpu.core_type<tc>, window_params = [{transform_indices = @transform_0, window_bounds = array<i64: 8, 256>}, {transform_indices = @transform_1, window_bounds = array<i64: 256, 128>}, {transform_indices = @transform_2, window_bounds = array<i64: 1, 128>}, {transform_indices = @transform_3, window_bounds = array<i64: 1, 128>}, {transform_indices = @transform_4, window_bounds = array<i64: 8, 128>}]} {
    %c0_i32 = arith.constant 0 : i32
    %0 = arith.cmpi eq, %arg2, %c0_i32 : i32
    %1 = arith.extui %0 : i1 to i32
    %c0_i32_0 = arith.constant 0 : i32
    %2 = arith.cmpi ne, %1, %c0_i32_0 : i32
    scf.if %2 {
      %cst_10 = arith.constant 0.000000e+00 : f32
      %12 = vector.broadcast %cst_10 : f32 to vector<8x128xf32>
      %c0_11 = arith.constant 0 : index
      %c0_12 = arith.constant 0 : index
      %13 = vector.load %arg8[%c0_11, %c0_12] : memref<8x128xf32, #tpu.memory_space<vmem>>, vector<8x128xf32>
      tpu.vector_store %arg8[%c0_11, %c0_12], %12 {strides = array<i32>} : memref<8x128xf32, #tpu.memory_space<vmem>>, vector<8x128xf32>,
    } else {
    }
    %c0 = arith.constant 0 : index
    %c0_1 = arith.constant 0 : index
    %3 = vector.load %arg8[%c0, %c0_1] : memref<8x128xf32, #tpu.memory_space<vmem>>, vector<8x128xf32>
    %c0_2 = arith.constant 0 : index
    %c0_3 = arith.constant 0 : index
    %4 = vector.load %arg3[%c0_2, %c0_3] : memref<8x256xbf16, #tpu.memory_space<vmem>>, vector<8x256xbf16>
    %c0_4 = arith.constant 0 : index
    %c0_5 = arith.constant 0 : index
    %5 = vector.load %arg4[%c0_4, %c0_5] : memref<256x128xbf16, #tpu.memory_space<vmem>>, vector<256x128xbf16>
    %cst = arith.constant dense<0.000000e+00> : vector<8x128xf32>
    %6 = tpu.matmul %4, %5, %cst {dimension_numbers = #tpu.dot_dimension_numbers<[1], [0], [0], [1], [0, 0, 1, 1], [], []>} : vector<8x256xbf16>, vector<256x128xbf16>, vector<8x128xf32> -> vector<8x128xf32>
    %7 = arith.addf %3, %6 : vector<8x128xf32>
    %c0_6 = arith.constant 0 : index
    %c0_7 = arith.constant 0 : index
    %8 = vector.load %arg8[%c0_6, %c0_7] : memref<8x128xf32, #tpu.memory_space<vmem>>, vector<8x128xf32>
    tpu.vector_store %arg8[%c0_6, %c0_7], %7 {strides = array<i32>} : memref<8x128xf32, #tpu.memory_space<vmem>>, vector<8x128xf32>,
    %c0_i32_8 = arith.constant 0 : i32
    %9 = arith.cmpi eq, %arg2, %c0_i32_8 : i32
    %10 = arith.extui %9 : i1 to i32
    %c0_i32_9 = arith.constant 0 : i32
    %11 = arith.cmpi ne, %10, %c0_i32_9 : i32
    scf.if %11 {
      %c0_10 = arith.constant 0 : index
      %c0_11 = arith.constant 0 : index
      %12 = vector.load %arg8[%c0_10, %c0_11] : memref<8x128xf32, #tpu.memory_space<vmem>>, vector<8x128xf32>
      %c0_12 = arith.constant 0 : index
      %c0_13 = arith.constant 0 : index
      %13 = vector.load %arg5[%c0_12, %c0_13] : memref<1x128xf32, #tpu.memory_space<vmem>>, vector<1x128xf32>
      %14 = vector.broadcast %13 : vector<1x128xf32> to vector<8x128xf32>
      %15 = arith.mulf %12, %14 : vector<8x128xf32>
      %c0_14 = arith.constant 0 : index
      %c0_15 = arith.constant 0 : index
      %16 = vector.load %arg6[%c0_14, %c0_15] : memref<1x128xf32, #tpu.memory_space<vmem>>, vector<1x128xf32>
      %17 = vector.broadcast %16 : vector<1x128xf32> to vector<8x128xf32>
      %18 = arith.addf %15, %17 : vector<8x128xf32>
      %cst_16 = arith.constant 0.000000e+00 : f32
      %19 = vector.broadcast %cst_16 : f32 to vector<8x128xf32>
      %20 = arith.maximumf %18, %19 : vector<8x128xf32>
      %21 = arith.truncf %20 : vector<8x128xf32> to vector<8x128xbf16>
      %c0_17 = arith.constant 0 : index
      %c0_18 = arith.constant 0 : index
      %22 = vector.load %arg7[%c0_17, %c0_18] : memref<8x128xbf16, #tpu.memory_space<vmem>>, vector<8x128xbf16>
      tpu.vector_store %arg7[%c0_17, %c0_18], %21 {strides = array<i32>} : memref<8x128xbf16, #tpu.memory_space<vmem>>, vector<8x128xbf16>,
    } else {
    }
    return
  }
  func.func @transform_0(%arg0: i32, %arg1: i32, %arg2: i32) -> (i32, i32) {
    %c0_i32 = arith.constant 0 : i32
    return %arg0, %arg2 : i32, i32
  }
  func.func @transform_1(%arg0: i32, %arg1: i32, %arg2: i32) -> (i32, i32) {
    %c0_i32 = arith.constant 0 : i32
    return %arg2, %arg1 : i32, i32
  }
  func.func @transform_2(%arg0: i32, %arg1: i32, %arg2: i32) -> (i32, i32) {
    %c0_i32 = arith.constant 0 : i32
    %c0_i32_0 = arith.constant 0 : i32
    return %c0_i32, %arg1 : i32, i32
  }
  func.func @transform_3(%arg0: i32, %arg1: i32, %arg2: i32) -> (i32, i32) {
    %c0_i32 = arith.constant 0 : i32
    %c0_i32_0 = arith.constant 0 : i32
    return %c0_i32, %arg1 : i32, i32
  }
  func.func @transform_4(%arg0: i32, %arg1: i32, %arg2: i32) -> (i32, i32) {
    %c0_i32 = arith.constant 0 : i32
    return %arg0, %arg1 : i32, i32
  }
}

module attributes {stable_mosaic.version = 11 : i64} {
  func.func @_mm_affine_res_kernel(%arg0: i32, %arg1: i32, %arg2: i32, %arg3: memref<8x384xbf16, #tpu.memory_space<vmem>>, %arg4: memref<384x128xbf16, #tpu.memory_space<vmem>>, %arg5: memref<1x128xf32, #tpu.memory_space<vmem>>, %arg6: memref<1x128xf32, #tpu.memory_space<vmem>>, %arg7: memref<8x128xbf16, #tpu.memory_space<vmem>>, %arg8: memref<8x128xbf16, #tpu.memory_space<vmem>>, %arg9: memref<8x128xf32, #tpu.memory_space<vmem>>) attributes {dimension_semantics = [#tpu.dimension_semantics<parallel>, #tpu.dimension_semantics<parallel>, #tpu.dimension_semantics<arbitrary>], iteration_bounds = array<i64: 1, 1, 1>, scalar_prefetch = 0 : i64, scratch_operands = 1 : i64, tpu.core_type = #tpu.core_type<tc>, window_params = [{transform_indices = @transform_0, window_bounds = array<i64: 8, 384>}, {transform_indices = @transform_1, window_bounds = array<i64: 384, 128>}, {transform_indices = @transform_2, window_bounds = array<i64: 1, 128>}, {transform_indices = @transform_3, window_bounds = array<i64: 1, 128>}, {transform_indices = @transform_4, window_bounds = array<i64: 8, 128>}, {transform_indices = @transform_5, window_bounds = array<i64: 8, 128>}]} {
    %c0_i32 = arith.constant 0 : i32
    %0 = arith.cmpi eq, %arg2, %c0_i32 : i32
    %1 = arith.extui %0 : i1 to i32
    %c0_i32_0 = arith.constant 0 : i32
    %2 = arith.cmpi ne, %1, %c0_i32_0 : i32
    scf.if %2 {
      %cst_10 = arith.constant 0.000000e+00 : f32
      %12 = vector.broadcast %cst_10 : f32 to vector<8x128xf32>
      %c0_11 = arith.constant 0 : index
      %c0_12 = arith.constant 0 : index
      %13 = vector.load %arg9[%c0_11, %c0_12] : memref<8x128xf32, #tpu.memory_space<vmem>>, vector<8x128xf32>
      tpu.vector_store %arg9[%c0_11, %c0_12], %12 {strides = array<i32>} : memref<8x128xf32, #tpu.memory_space<vmem>>, vector<8x128xf32>,
    } else {
    }
    %c0 = arith.constant 0 : index
    %c0_1 = arith.constant 0 : index
    %3 = vector.load %arg9[%c0, %c0_1] : memref<8x128xf32, #tpu.memory_space<vmem>>, vector<8x128xf32>
    %c0_2 = arith.constant 0 : index
    %c0_3 = arith.constant 0 : index
    %4 = vector.load %arg3[%c0_2, %c0_3] : memref<8x384xbf16, #tpu.memory_space<vmem>>, vector<8x384xbf16>
    %c0_4 = arith.constant 0 : index
    %c0_5 = arith.constant 0 : index
    %5 = vector.load %arg4[%c0_4, %c0_5] : memref<384x128xbf16, #tpu.memory_space<vmem>>, vector<384x128xbf16>
    %cst = arith.constant dense<0.000000e+00> : vector<8x128xf32>
    %6 = tpu.matmul %4, %5, %cst {dimension_numbers = #tpu.dot_dimension_numbers<[1], [0], [0], [1], [0, 0, 1, 1], [], []>} : vector<8x384xbf16>, vector<384x128xbf16>, vector<8x128xf32> -> vector<8x128xf32>
    %7 = arith.addf %3, %6 : vector<8x128xf32>
    %c0_6 = arith.constant 0 : index
    %c0_7 = arith.constant 0 : index
    %8 = vector.load %arg9[%c0_6, %c0_7] : memref<8x128xf32, #tpu.memory_space<vmem>>, vector<8x128xf32>
    tpu.vector_store %arg9[%c0_6, %c0_7], %7 {strides = array<i32>} : memref<8x128xf32, #tpu.memory_space<vmem>>, vector<8x128xf32>,
    %c0_i32_8 = arith.constant 0 : i32
    %9 = arith.cmpi eq, %arg2, %c0_i32_8 : i32
    %10 = arith.extui %9 : i1 to i32
    %c0_i32_9 = arith.constant 0 : i32
    %11 = arith.cmpi ne, %10, %c0_i32_9 : i32
    scf.if %11 {
      %c0_10 = arith.constant 0 : index
      %c0_11 = arith.constant 0 : index
      %12 = vector.load %arg9[%c0_10, %c0_11] : memref<8x128xf32, #tpu.memory_space<vmem>>, vector<8x128xf32>
      %c0_12 = arith.constant 0 : index
      %c0_13 = arith.constant 0 : index
      %13 = vector.load %arg5[%c0_12, %c0_13] : memref<1x128xf32, #tpu.memory_space<vmem>>, vector<1x128xf32>
      %14 = vector.broadcast %13 : vector<1x128xf32> to vector<8x128xf32>
      %15 = arith.mulf %12, %14 : vector<8x128xf32>
      %c0_14 = arith.constant 0 : index
      %c0_15 = arith.constant 0 : index
      %16 = vector.load %arg6[%c0_14, %c0_15] : memref<1x128xf32, #tpu.memory_space<vmem>>, vector<1x128xf32>
      %17 = vector.broadcast %16 : vector<1x128xf32> to vector<8x128xf32>
      %18 = arith.addf %15, %17 : vector<8x128xf32>
      %c0_16 = arith.constant 0 : index
      %c0_17 = arith.constant 0 : index
      %19 = vector.load %arg7[%c0_16, %c0_17] : memref<8x128xbf16, #tpu.memory_space<vmem>>, vector<8x128xbf16>
      %20 = arith.extf %19 : vector<8x128xbf16> to vector<8x128xf32>
      %21 = arith.addf %18, %20 : vector<8x128xf32>
      %cst_18 = arith.constant 0.000000e+00 : f32
      %22 = vector.broadcast %cst_18 : f32 to vector<8x128xf32>
      %23 = arith.maximumf %21, %22 : vector<8x128xf32>
      %24 = arith.truncf %23 : vector<8x128xf32> to vector<8x128xbf16>
      %c0_19 = arith.constant 0 : index
      %c0_20 = arith.constant 0 : index
      %25 = vector.load %arg8[%c0_19, %c0_20] : memref<8x128xbf16, #tpu.memory_space<vmem>>, vector<8x128xbf16>
      tpu.vector_store %arg8[%c0_19, %c0_20], %24 {strides = array<i32>} : memref<8x128xbf16, #tpu.memory_space<vmem>>, vector<8x128xbf16>,
    } else {
    }
    return
  }
  func.func @transform_0(%arg0: i32, %arg1: i32, %arg2: i32) -> (i32, i32) {
    %c0_i32 = arith.constant 0 : i32
    return %arg0, %arg2 : i32, i32
  }
  func.func @transform_1(%arg0: i32, %arg1: i32, %arg2: i32) -> (i32, i32) {
    %c0_i32 = arith.constant 0 : i32
    return %arg2, %arg1 : i32, i32
  }
  func.func @transform_2(%arg0: i32, %arg1: i32, %arg2: i32) -> (i32, i32) {
    %c0_i32 = arith.constant 0 : i32
    %c0_i32_0 = arith.constant 0 : i32
    return %c0_i32, %arg1 : i32, i32
  }
  func.func @transform_3(%arg0: i32, %arg1: i32, %arg2: i32) -> (i32, i32) {
    %c0_i32 = arith.constant 0 : i32
    %c0_i32_0 = arith.constant 0 : i32
    return %c0_i32, %arg1 : i32, i32
  }
  func.func @transform_4(%arg0: i32, %arg1: i32, %arg2: i32) -> (i32, i32) {
    %c0_i32 = arith.constant 0 : i32
    return %arg0, %arg1 : i32, i32
  }
  func.func @transform_5(%arg0: i32, %arg1: i32, %arg2: i32) -> (i32, i32) {
    %c0_i32 = arith.constant 0 : i32
    return %arg0, %arg1 : i32, i32
  }
}

module attributes {stable_mosaic.version = 11 : i64} {
  func.func @_tsp_kernel(%arg0: i32, %arg1: memref<1x2x2x32xbf16, #tpu.memory_space<vmem>>, %arg2: memref<1x2x2x32xf32, #tpu.memory_space<vmem>>) attributes {dimension_semantics = [#tpu.dimension_semantics<parallel>], iteration_bounds = array<i64: 2>, scalar_prefetch = 0 : i64, scratch_operands = 0 : i64, tpu.core_type = #tpu.core_type<tc>, window_params = [{transform_indices = @transform_0, window_bounds = array<i64: 1, 2, 2, 32>}, {transform_indices = @transform_1, window_bounds = array<i64: 1, 2, 2, 32>}]} {
    %c0 = arith.constant 0 : index
    %c0_0 = arith.constant 0 : index
    %c0_1 = arith.constant 0 : index
    %c0_2 = arith.constant 0 : index
    %0 = vector.load %arg1[%c0, %c0_0, %c0_1, %c0_2] : memref<1x2x2x32xbf16, #tpu.memory_space<vmem>>, vector<1x2x2x32xbf16>
    %1 = vector.shape_cast %0 : vector<1x2x2x32xbf16> to vector<2x2x32xbf16>
    %2 = arith.extf %1 : vector<2x2x32xbf16> to vector<2x2x32xf32>
    %cst = arith.constant dense<0.000000e+00> : vector<2x32xf32>
    %3 = vector.multi_reduction <add>, %2, %cst [1] : vector<2x2x32xf32> to vector<2x32xf32>
    %cst_3 = arith.constant 5.000000e-01 : f32
    %4 = vector.broadcast %cst_3 : f32 to vector<2x32xf32>
    %5 = arith.mulf %3, %4 : vector<2x32xf32>
    %6 = vector.shape_cast %5 : vector<2x32xf32> to vector<2x1x32xf32>
    %7 = vector.broadcast %6 : vector<2x1x32xf32> to vector<2x2x32xf32>
    %8 = arith.subf %2, %7 : vector<2x2x32xf32>
    %9 = arith.mulf %8, %8 : vector<2x2x32xf32>
    %cst_4 = arith.constant dense<0.000000e+00> : vector<2x32xf32>
    %10 = vector.multi_reduction <add>, %9, %cst_4 [1] : vector<2x2x32xf32> to vector<2x32xf32>
    %cst_5 = arith.constant 1.000000e+00 : f32
    %11 = vector.broadcast %cst_5 : f32 to vector<2x32xf32>
    %12 = arith.mulf %10, %11 : vector<2x32xf32>
    %c0_6 = arith.constant 0 : index
    %c0_7 = arith.constant 0 : index
    %c0_8 = arith.constant 0 : index
    %c0_9 = arith.constant 0 : index
    %13 = vector.load %arg2[%c0_6, %c0_7, %c0_8, %c0_9] : memref<1x2x2x32xf32, #tpu.memory_space<vmem>>, vector<1x1x2x32xf32>
    %14 = vector.shape_cast %13 : vector<1x1x2x32xf32> to vector<2x32xf32>
    %15 = vector.shape_cast %5 : vector<2x32xf32> to vector<1x1x2x32xf32>
    tpu.vector_store %arg2[%c0_6, %c0_7, %c0_8, %c0_9], %15 {strides = array<i32>} : memref<1x2x2x32xf32, #tpu.memory_space<vmem>>, vector<1x1x2x32xf32>,
    %c0_10 = arith.constant 0 : index
    %c1 = arith.constant 1 : index
    %c0_11 = arith.constant 0 : index
    %c0_12 = arith.constant 0 : index
    %16 = vector.load %arg2[%c0_10, %c1, %c0_11, %c0_12] : memref<1x2x2x32xf32, #tpu.memory_space<vmem>>, vector<1x1x2x32xf32>
    %17 = vector.shape_cast %16 : vector<1x1x2x32xf32> to vector<2x32xf32>
    %18 = vector.shape_cast %12 : vector<2x32xf32> to vector<1x1x2x32xf32>
    tpu.vector_store %arg2[%c0_10, %c1, %c0_11, %c0_12], %18 {strides = array<i32>} : memref<1x2x2x32xf32, #tpu.memory_space<vmem>>, vector<1x1x2x32xf32>,
    return
  }
  func.func @transform_0(%arg0: i32) -> (i32, i32, i32, i32) {
    %c0_i32 = arith.constant 0 : i32
    %c0_i32_0 = arith.constant 0 : i32
    %c0_i32_1 = arith.constant 0 : i32
    %c0_i32_2 = arith.constant 0 : i32
    return %arg0, %c0_i32, %c0_i32_0, %c0_i32_1 : i32, i32, i32, i32
  }
  func.func @transform_1(%arg0: i32) -> (i32, i32, i32, i32) {
    %c0_i32 = arith.constant 0 : i32
    %c0_i32_0 = arith.constant 0 : i32
    %c0_i32_1 = arith.constant 0 : i32
    %c0_i32_2 = arith.constant 0 : i32
    return %arg0, %c0_i32, %c0_i32_0, %c0_i32_1 : i32, i32, i32, i32
  }
}

module attributes {stable_mosaic.version = 11 : i64} {
  func.func @_mm_affine_kernel(%arg0: i32, %arg1: i32, %arg2: i32, %arg3: memref<8x128xbf16, #tpu.memory_space<vmem>>, %arg4: memref<128x128xbf16, #tpu.memory_space<vmem>>, %arg5: memref<1x128xf32, #tpu.memory_space<vmem>>, %arg6: memref<1x128xf32, #tpu.memory_space<vmem>>, %arg7: memref<8x128xbf16, #tpu.memory_space<vmem>>, %arg8: memref<8x128xf32, #tpu.memory_space<vmem>>) attributes {dimension_semantics = [#tpu.dimension_semantics<parallel>, #tpu.dimension_semantics<parallel>, #tpu.dimension_semantics<arbitrary>], iteration_bounds = array<i64: 1, 1, 1>, scalar_prefetch = 0 : i64, scratch_operands = 1 : i64, tpu.core_type = #tpu.core_type<tc>, window_params = [{transform_indices = @transform_0, window_bounds = array<i64: 8, 128>}, {transform_indices = @transform_1, window_bounds = array<i64: 128, 128>}, {transform_indices = @transform_2, window_bounds = array<i64: 1, 128>}, {transform_indices = @transform_3, window_bounds = array<i64: 1, 128>}, {transform_indices = @transform_4, window_bounds = array<i64: 8, 128>}]} {
    %c0_i32 = arith.constant 0 : i32
    %0 = arith.cmpi eq, %arg2, %c0_i32 : i32
    %1 = arith.extui %0 : i1 to i32
    %c0_i32_0 = arith.constant 0 : i32
    %2 = arith.cmpi ne, %1, %c0_i32_0 : i32
    scf.if %2 {
      %cst_10 = arith.constant 0.000000e+00 : f32
      %12 = vector.broadcast %cst_10 : f32 to vector<8x128xf32>
      %c0_11 = arith.constant 0 : index
      %c0_12 = arith.constant 0 : index
      %13 = vector.load %arg8[%c0_11, %c0_12] : memref<8x128xf32, #tpu.memory_space<vmem>>, vector<8x128xf32>
      tpu.vector_store %arg8[%c0_11, %c0_12], %12 {strides = array<i32>} : memref<8x128xf32, #tpu.memory_space<vmem>>, vector<8x128xf32>,
    } else {
    }
    %c0 = arith.constant 0 : index
    %c0_1 = arith.constant 0 : index
    %3 = vector.load %arg8[%c0, %c0_1] : memref<8x128xf32, #tpu.memory_space<vmem>>, vector<8x128xf32>
    %c0_2 = arith.constant 0 : index
    %c0_3 = arith.constant 0 : index
    %4 = vector.load %arg3[%c0_2, %c0_3] : memref<8x128xbf16, #tpu.memory_space<vmem>>, vector<8x128xbf16>
    %c0_4 = arith.constant 0 : index
    %c0_5 = arith.constant 0 : index
    %5 = vector.load %arg4[%c0_4, %c0_5] : memref<128x128xbf16, #tpu.memory_space<vmem>>, vector<128x128xbf16>
    %cst = arith.constant dense<0.000000e+00> : vector<8x128xf32>
    %6 = tpu.matmul %4, %5, %cst {dimension_numbers = #tpu.dot_dimension_numbers<[1], [0], [0], [1], [0, 0, 1, 1], [], []>} : vector<8x128xbf16>, vector<128x128xbf16>, vector<8x128xf32> -> vector<8x128xf32>
    %7 = arith.addf %3, %6 : vector<8x128xf32>
    %c0_6 = arith.constant 0 : index
    %c0_7 = arith.constant 0 : index
    %8 = vector.load %arg8[%c0_6, %c0_7] : memref<8x128xf32, #tpu.memory_space<vmem>>, vector<8x128xf32>
    tpu.vector_store %arg8[%c0_6, %c0_7], %7 {strides = array<i32>} : memref<8x128xf32, #tpu.memory_space<vmem>>, vector<8x128xf32>,
    %c0_i32_8 = arith.constant 0 : i32
    %9 = arith.cmpi eq, %arg2, %c0_i32_8 : i32
    %10 = arith.extui %9 : i1 to i32
    %c0_i32_9 = arith.constant 0 : i32
    %11 = arith.cmpi ne, %10, %c0_i32_9 : i32
    scf.if %11 {
      %c0_10 = arith.constant 0 : index
      %c0_11 = arith.constant 0 : index
      %12 = vector.load %arg8[%c0_10, %c0_11] : memref<8x128xf32, #tpu.memory_space<vmem>>, vector<8x128xf32>
      %c0_12 = arith.constant 0 : index
      %c0_13 = arith.constant 0 : index
      %13 = vector.load %arg5[%c0_12, %c0_13] : memref<1x128xf32, #tpu.memory_space<vmem>>, vector<1x128xf32>
      %14 = vector.broadcast %13 : vector<1x128xf32> to vector<8x128xf32>
      %15 = arith.mulf %12, %14 : vector<8x128xf32>
      %c0_14 = arith.constant 0 : index
      %c0_15 = arith.constant 0 : index
      %16 = vector.load %arg6[%c0_14, %c0_15] : memref<1x128xf32, #tpu.memory_space<vmem>>, vector<1x128xf32>
      %17 = vector.broadcast %16 : vector<1x128xf32> to vector<8x128xf32>
      %18 = arith.addf %15, %17 : vector<8x128xf32>
      %19 = arith.truncf %18 : vector<8x128xf32> to vector<8x128xbf16>
      %c0_16 = arith.constant 0 : index
      %c0_17 = arith.constant 0 : index
      %20 = vector.load %arg7[%c0_16, %c0_17] : memref<8x128xbf16, #tpu.memory_space<vmem>>, vector<8x128xbf16>
      tpu.vector_store %arg7[%c0_16, %c0_17], %19 {strides = array<i32>} : memref<8x128xbf16, #tpu.memory_space<vmem>>, vector<8x128xbf16>,
    } else {
    }
    return
  }
  func.func @transform_0(%arg0: i32, %arg1: i32, %arg2: i32) -> (i32, i32) {
    %c0_i32 = arith.constant 0 : i32
    return %arg0, %arg2 : i32, i32
  }
  func.func @transform_1(%arg0: i32, %arg1: i32, %arg2: i32) -> (i32, i32) {
    %c0_i32 = arith.constant 0 : i32
    return %arg2, %arg1 : i32, i32
  }
  func.func @transform_2(%arg0: i32, %arg1: i32, %arg2: i32) -> (i32, i32) {
    %c0_i32 = arith.constant 0 : i32
    %c0_i32_0 = arith.constant 0 : i32
    return %c0_i32, %arg1 : i32, i32
  }
  func.func @transform_3(%arg0: i32, %arg1: i32, %arg2: i32) -> (i32, i32) {
    %c0_i32 = arith.constant 0 : i32
    %c0_i32_0 = arith.constant 0 : i32
    return %c0_i32, %arg1 : i32, i32
  }
  func.func @transform_4(%arg0: i32, %arg1: i32, %arg2: i32) -> (i32, i32) {
    %c0_i32 = arith.constant 0 : i32
    return %arg0, %arg1 : i32, i32
  }
}

module attributes {stable_mosaic.version = 11 : i64} {
  func.func @_mm_affine_kernel(%arg0: i32, %arg1: i32, %arg2: i32, %arg3: memref<8x128xbf16, #tpu.memory_space<vmem>>, %arg4: memref<128x128xbf16, #tpu.memory_space<vmem>>, %arg5: memref<1x128xf32, #tpu.memory_space<vmem>>, %arg6: memref<1x128xf32, #tpu.memory_space<vmem>>, %arg7: memref<8x128xf32, #tpu.memory_space<vmem>>, %arg8: memref<8x128xf32, #tpu.memory_space<vmem>>) attributes {dimension_semantics = [#tpu.dimension_semantics<parallel>, #tpu.dimension_semantics<parallel>, #tpu.dimension_semantics<arbitrary>], iteration_bounds = array<i64: 1, 1, 1>, scalar_prefetch = 0 : i64, scratch_operands = 1 : i64, tpu.core_type = #tpu.core_type<tc>, window_params = [{transform_indices = @transform_0, window_bounds = array<i64: 8, 128>}, {transform_indices = @transform_1, window_bounds = array<i64: 128, 128>}, {transform_indices = @transform_2, window_bounds = array<i64: 1, 128>}, {transform_indices = @transform_3, window_bounds = array<i64: 1, 128>}, {transform_indices = @transform_4, window_bounds = array<i64: 8, 128>}]} {
    %c0_i32 = arith.constant 0 : i32
    %0 = arith.cmpi eq, %arg2, %c0_i32 : i32
    %1 = arith.extui %0 : i1 to i32
    %c0_i32_0 = arith.constant 0 : i32
    %2 = arith.cmpi ne, %1, %c0_i32_0 : i32
    scf.if %2 {
      %cst_10 = arith.constant 0.000000e+00 : f32
      %12 = vector.broadcast %cst_10 : f32 to vector<8x128xf32>
      %c0_11 = arith.constant 0 : index
      %c0_12 = arith.constant 0 : index
      %13 = vector.load %arg8[%c0_11, %c0_12] : memref<8x128xf32, #tpu.memory_space<vmem>>, vector<8x128xf32>
      tpu.vector_store %arg8[%c0_11, %c0_12], %12 {strides = array<i32>} : memref<8x128xf32, #tpu.memory_space<vmem>>, vector<8x128xf32>,
    } else {
    }
    %c0 = arith.constant 0 : index
    %c0_1 = arith.constant 0 : index
    %3 = vector.load %arg8[%c0, %c0_1] : memref<8x128xf32, #tpu.memory_space<vmem>>, vector<8x128xf32>
    %c0_2 = arith.constant 0 : index
    %c0_3 = arith.constant 0 : index
    %4 = vector.load %arg3[%c0_2, %c0_3] : memref<8x128xbf16, #tpu.memory_space<vmem>>, vector<8x128xbf16>
    %c0_4 = arith.constant 0 : index
    %c0_5 = arith.constant 0 : index
    %5 = vector.load %arg4[%c0_4, %c0_5] : memref<128x128xbf16, #tpu.memory_space<vmem>>, vector<128x128xbf16>
    %cst = arith.constant dense<0.000000e+00> : vector<8x128xf32>
    %6 = tpu.matmul %4, %5, %cst {dimension_numbers = #tpu.dot_dimension_numbers<[1], [0], [0], [1], [0, 0, 1, 1], [], []>} : vector<8x128xbf16>, vector<128x128xbf16>, vector<8x128xf32> -> vector<8x128xf32>
    %7 = arith.addf %3, %6 : vector<8x128xf32>
    %c0_6 = arith.constant 0 : index
    %c0_7 = arith.constant 0 : index
    %8 = vector.load %arg8[%c0_6, %c0_7] : memref<8x128xf32, #tpu.memory_space<vmem>>, vector<8x128xf32>
    tpu.vector_store %arg8[%c0_6, %c0_7], %7 {strides = array<i32>} : memref<8x128xf32, #tpu.memory_space<vmem>>, vector<8x128xf32>,
    %c0_i32_8 = arith.constant 0 : i32
    %9 = arith.cmpi eq, %arg2, %c0_i32_8 : i32
    %10 = arith.extui %9 : i1 to i32
    %c0_i32_9 = arith.constant 0 : i32
    %11 = arith.cmpi ne, %10, %c0_i32_9 : i32
    scf.if %11 {
      %c0_10 = arith.constant 0 : index
      %c0_11 = arith.constant 0 : index
      %12 = vector.load %arg8[%c0_10, %c0_11] : memref<8x128xf32, #tpu.memory_space<vmem>>, vector<8x128xf32>
      %c0_12 = arith.constant 0 : index
      %c0_13 = arith.constant 0 : index
      %13 = vector.load %arg5[%c0_12, %c0_13] : memref<1x128xf32, #tpu.memory_space<vmem>>, vector<1x128xf32>
      %14 = vector.broadcast %13 : vector<1x128xf32> to vector<8x128xf32>
      %15 = arith.mulf %12, %14 : vector<8x128xf32>
      %c0_14 = arith.constant 0 : index
      %c0_15 = arith.constant 0 : index
      %16 = vector.load %arg6[%c0_14, %c0_15] : memref<1x128xf32, #tpu.memory_space<vmem>>, vector<1x128xf32>
      %17 = vector.broadcast %16 : vector<1x128xf32> to vector<8x128xf32>
      %18 = arith.addf %15, %17 : vector<8x128xf32>
      %c0_16 = arith.constant 0 : index
      %c0_17 = arith.constant 0 : index
      %19 = vector.load %arg7[%c0_16, %c0_17] : memref<8x128xf32, #tpu.memory_space<vmem>>, vector<8x128xf32>
      tpu.vector_store %arg7[%c0_16, %c0_17], %18 {strides = array<i32>} : memref<8x128xf32, #tpu.memory_space<vmem>>, vector<8x128xf32>,
    } else {
    }
    return
  }
  func.func @transform_0(%arg0: i32, %arg1: i32, %arg2: i32) -> (i32, i32) {
    %c0_i32 = arith.constant 0 : i32
    return %arg0, %arg2 : i32, i32
  }
  func.func @transform_1(%arg0: i32, %arg1: i32, %arg2: i32) -> (i32, i32) {
    %c0_i32 = arith.constant 0 : i32
    return %arg2, %arg1 : i32, i32
  }
  func.func @transform_2(%arg0: i32, %arg1: i32, %arg2: i32) -> (i32, i32) {
    %c0_i32 = arith.constant 0 : i32
    %c0_i32_0 = arith.constant 0 : i32
    return %c0_i32, %arg1 : i32, i32
  }
  func.func @transform_3(%arg0: i32, %arg1: i32, %arg2: i32) -> (i32, i32) {
    %c0_i32 = arith.constant 0 : i32
    %c0_i32_0 = arith.constant 0 : i32
    return %c0_i32, %arg1 : i32, i32
  }
  func.func @transform_4(%arg0: i32, %arg1: i32, %arg2: i32) -> (i32, i32) {
    %c0_i32 = arith.constant 0 : i32
    return %arg0, %arg1 : i32, i32
  }
}

</mosaic_0001>

<bundles_post_ra>
// kernel: resnet_forward.14
= control target key start
LH: loop header
LB: loop body
LE: loop exit
PB: predicated region body
PF: predicated region fallthrough
CT: control target
= control target key end

     0   :  { %s1598_s15 = smov 0   ;;  %s1600_s16 = smov 0   ;;  %s1772_s0 = inlined_call_operand.vmem [shape: bf16[512,128], index: 0, kind: input, shape index: {}]   ;;  %s1773_s1 = inlined_call_operand.vmem [shape: bf16[128,128], index: 1, kind: input, shape index: {}]   ;;  %s1774_s2 = inlined_call_operand.vmem [shape: f32[1,128], index: 2, kind: input, shape index: {}]   ;;  %s1775_s3 = inlined_call_operand.vmem [shape: f32[1,128], index: 3, kind: input, shape index: {}]   ;;  %s1776_s4 = inlined_call_operand.vmem [shape: bf16[512,128], index: 4, kind: output, shape index: {}]  }
   0x1   :  { %s1602_s17 = smov 0  }
   0x2 LB: > { %s33_s18 = sadd.s32 1, %s1567_s16  ;;  %p1221_p0 = scmp.ge.s32.totalorder %s1571_s17, 1  ;;  %s1571_s17 = sphi %s1602_s17, %s14_s17   ;;  %s1567_s16 = sphi %s1600_s16, %s1778_s16   ;;  %s1563_s15 = sphi %s1598_s15, %s1777_s15  }
   0x3   : > { %p35_p1 = scmp.ge.s32.totalorder %s33_s18, 2  ;;  %p221_p2 = scmp.lt.s32.totalorder %s1571_s17, 3 }
   0x5   : > { %s1780_s18 = smov (%p35_p1, %s33_s18), 0  ;;  %p222_p3 = pnand %p1221_p0, %p221_p2 }
   0x6   : > { %v1525_v0 = vld [vmem:[%s1773_s1] sm:$0xff] (!%p222_p3)   ;;  %s1222_s21 = sshll.u32 (!%p222_p3), %s1563_s15, 5  ;;  %v1526_v1 = vld [vmem:[%s1773_s1 + $0x8] sm:$0xff] (!%p222_p3)   ;;  %v1527_v2 = vld [vmem:[%s1773_s1 + $0x10] sm:$0xff] (!%p222_p3)  }
   0x7   : > { %225 = sbr.rel (%p222_p3) target bundleno = 288 (0x120), region = 36  ;;  %p268_p4 = scmp.lt.s32.totalorder (!%p222_p3), %s1222_s21, 63  ;;  %1437 = vmatprep.subr.bf16.mxu0 (!%p222_p3), %v1525_v0  ;;  %1485 = vmatprep.subr.bf16.mxu1 (!%p222_p3), %v1525_v0  ;;  %v1528_v3 = vld [vmem:[%s1773_s1 + $0x18] sm:$0xff] (!%p222_p3)   ;;  %v1529_v6 = vld [vmem:[%s1773_s1 + $0x20] sm:$0xff] (!%p222_p3)   ;;  %v1530_v7 = vld [vmem:[%s1773_s1 + $0x28] sm:$0xff] (!%p222_p3)  }
   0x8   : > { %1438 = vmatpush3.bf16.msra.mxu0 (!%p222_p3), %v1525_v0  ;;  %1493 = vmatpush3.bf16.msra.mxu1 (!%p222_p3), %v1525_v0  ;;  %v1531_v8 = vld [vmem:[%s1773_s1 + $0x30] sm:$0xff] (!%p222_p3)   ;;  %v1532_v9 = vld [vmem:[%s1773_s1 + $0x38] sm:$0xff] (!%p222_p3)   ;;  %v1669_v24 = vld [vmem:[%s1774_s2] ss:$0 sm:$0xff] (!%p222_p3) }
   0x9   : > { %1439 = vmatprep.subr.bf16.mxu0 (!%p222_p3), %v1526_v1  ;;  %1486 = vmatprep.subr.bf16.mxu1 (!%p222_p3), %v1526_v1  ;;  %v1674_v26 = vld [vmem:[%s1775_s3] ss:$0 sm:$0xff] (!%p222_p3) }
   0xc   : > { %1440 = vmatpush3.bf16.msra.mxu0 (!%p222_p3), %v1526_v1  ;;  %1494 = vmatpush3.bf16.msra.mxu1 (!%p222_p3), %v1526_v1 }
   0xd   : > { %1441 = vmatprep.subr.bf16.mxu0 (!%p222_p3), %v1527_v2  ;;  %1487 = vmatprep.subr.bf16.mxu1 (!%p222_p3), %v1527_v2 }
   0xe   : > { %s1782_s21 = smov (!%p268_p4, %s1222_s21), 63 }
   0xf   : > { %s1223_s26 = sshll.u32 %s1782_s21, 2 }
  0x10   : > { %s1633_s29 = scalar_lea.vmem %s1772_s0, %s1223_s26  ;;  %1442 = vmatpush3.bf16.msra.mxu0 %v1527_v2  ;;  %1495 = vmatpush3.bf16.msra.mxu1 %v1527_v2  ;;  %s1697_s24 = scalar_lea.vmem %s1776_s4, %s1223_s26 }
  0x11   : > { %v1533_v4 = vld [vmem:[%s1633_s29] sm:$0xff]   ;;  %1443 = vmatprep.subr.bf16.mxu0 %v1528_v3  ;;  %1488 = vmatprep.subr.bf16.mxu1 %v1528_v3  ;;  %v1535_v10 = vld [vmem:[%s1633_s29 + $0x8] sm:$0xff]   ;;  %v1537_v12 = vld [vmem:[%s1633_s29 + $0x10] sm:$0xff]  }
  0x12   : > { %v1534_v5 = vld [vmem:[%s1633_s29 + $0x40] sm:$0xff]   ;;  %1453 = vmatprep.mubr.bf16.mxu0 %v1533_v4  ;;  %v1536_v11 = vld [vmem:[%s1633_s29 + $0x48] sm:$0xff]   ;;  %v1538_v13 = vld [vmem:[%s1633_s29 + $0x50] sm:$0xff]  }
  0x13   : > { %1469 = vmatprep.mubr.bf16.mxu1 %v1534_v5  ;;  %v1539_v14 = vld [vmem:[%s1633_s29 + $0x18] sm:$0xff]   ;;  %v1541_v16 = vld [vmem:[%s1633_s29 + $0x20] sm:$0xff]   ;;  %v1543_v18 = vld [vmem:[%s1633_s29 + $0x28] sm:$0xff]  }
  0x14   : > { %1444 = vmatpush3.bf16.msra.mxu0 %v1528_v3  ;;  %1496 = vmatpush3.bf16.msra.mxu1 %v1528_v3  ;;  %v1540_v15 = vld [vmem:[%s1633_s29 + $0x58] sm:$0xff]   ;;  %v1542_v17 = vld [vmem:[%s1633_s29 + $0x60] sm:$0xff]   ;;  %v1544_v19 = vld [vmem:[%s1633_s29 + $0x68] sm:$0xff]  }
  0x15   : > { %1445 = vmatprep.subr.bf16.mxu0 %v1529_v6  ;;  %1489 = vmatprep.subr.bf16.mxu1 %v1529_v6  ;;  %v1545_v20 = vld [vmem:[%s1633_s29 + $0x30] sm:$0xff]   ;;  %v1547_v22 = vld [vmem:[%s1633_s29 + $0x38] sm:$0xff]  }
  0x16   : > { %v1546_v21 = vld [vmem:[%s1633_s29 + $0x70] sm:$0xff]   ;;  %v1548_v23 = vld [vmem:[%s1633_s29 + $0x78] sm:$0xff]  }
  0x18   : > { %1446 = vmatpush3.bf16.msra.mxu0 %v1529_v6  ;;  %1497 = vmatpush3.bf16.msra.mxu1 %v1529_v6 }
  0x19   : > { %1447 = vmatprep.subr.bf16.mxu0 %v1530_v7  ;;  %1490 = vmatprep.subr.bf16.mxu1 %v1530_v7 }
  0x1c   : > { %1448 = vmatpush3.bf16.msra.mxu0 %v1530_v7  ;;  %1498 = vmatpush3.bf16.msra.mxu1 %v1530_v7 }
  0x1d   : > { %1449 = vmatprep.subr.bf16.mxu0 %v1531_v8  ;;  %1491 = vmatprep.subr.bf16.mxu1 %v1531_v8 }
  0x20   : > { %1450 = vmatpush3.bf16.msra.mxu0 %v1531_v8  ;;  %1499 = vmatpush3.bf16.msra.mxu1 %v1531_v8 }
  0x21   : > { %1451 = vmatprep.subr.bf16.mxu0 %v1532_v9  ;;  %1492 = vmatprep.subr.bf16.mxu1 %v1532_v9 }
  0x24   : > { %1452 = vmatpush3.bf16.msra.mxu0 %v1532_v9  ;;  %1500 = vmatpush3.bf16.msra.mxu1 %v1532_v9 }
  0x27   : > { %1454 = vmatmul.mubr.bf16.vlgmr.msra.gmra.mrb[0].mxu0 %v1535_v10  ;;  %1470 = vmatmul.mubr.bf16.vlgmr.msra.gmra.mrb[0].mxu1 %v1536_v11 }
  0x28   : > { %1457 = vmatprep.mubr.bf16.mxu0 %v1537_v12  ;;  %1473 = vmatprep.mubr.bf16.mxu1 %v1538_v13 }
  0x2f   : > { %1458 = vmatmul.mubr.bf16.gmra.mrb[4].mxu0 %v1539_v14  ;;  %1474 = vmatmul.mubr.bf16.gmra.mrb[4].mxu1 %v1540_v15 }
  0x30   : > { %1461 = vmatprep.mubr.bf16.mxu0 %v1541_v16  ;;  %1477 = vmatprep.mubr.bf16.mxu1 %v1542_v17 }
  0x37   : > { %1462 = vmatmul.mubr.bf16.gmra.mrb[8].mxu0 %v1543_v18  ;;  %1478 = vmatmul.mubr.bf16.gmra.mrb[8].mxu1 %v1544_v19 }
  0x38   : > { %1465 = vmatprep.mubr.bf16.mxu0 %v1545_v20  ;;  %1481 = vmatprep.mubr.bf16.mxu1 %v1546_v21 }
  0x3f   : > { %1466 = vmatmul.mubr.bf16.gmra.mrb[12].mxu0 %v1547_v22  ;;  %1482 = vmatmul.mubr.bf16.gmra.mrb[12].mxu1 %v1548_v23 }
  0xfa   : > { %v1455_v25 = vpop.f32.mrb[0].mxu0  ;;  %v1471_v27 = vpop.f32.mrb[0].mxu1 }
  0xfb   : > { %v830_v28 = vmul.f32 %v1455_v25, %v1669_v24  ;;  %v846_v29 = vmul.f32 %v1471_v27, %v1669_v24  ;;  %v595_v30 = vpop.f32.mrb[1].mxu0  ;;  %v659_v31 = vpop.f32.mrb[1].mxu1 }
  0xfc   : > { %v828_v32 = vmul.f32 %v1669_v24, %v595_v30  ;;  %v844_v33 = vmul.f32 %v1669_v24, %v659_v31  ;;  %v1456_v34 = vpop.f32.mrb[2].mxu0  ;;  %v1472_v35 = vpop.f32.mrb[2].mxu1 }
  0xfd   : > { %v869_v36 = vadd.f32 %v1674_v26, %v830_v28  ;;  %v885_v37 = vadd.f32 %v1674_v26, %v846_v29  ;;  %v831_v38 = vmul.f32 %v1456_v34, %v1669_v24  ;;  %v847_v39 = vmul.f32 %v1472_v35, %v1669_v24  ;;  %v598_v40 = vpop.f32.mrb[3].mxu0  ;;  %v662_v41 = vpop.f32.mrb[3].mxu1 }
  0xfe   : > { %v867_v42 = vadd.f32 %v1674_v26, %v828_v32  ;;  %v883_v43 = vadd.f32 %v1674_v26, %v844_v33  ;;  %v829_v44 = vmul.f32 %v1669_v24, %v598_v40  ;;  %v845_v45 = vmul.f32 %v1669_v24, %v662_v41 }
  0xff   : > { %v870_v46 = vadd.f32 %v1674_v26, %v831_v38  ;;  %v886_v47 = vadd.f32 %v1674_v26, %v847_v39  ;;  %v901_v50 = vmax.f32 %v869_v36, 0.0  ;;  %v917_v51 = vmax.f32 %v885_v37, 0.0 }
 0x100   : > { %v868_v48 = vadd.f32 %v1674_v26, %v829_v44  ;;  %v884_v49 = vadd.f32 %v1674_v26, %v845_v45  ;;  %v899_v54 = vmax.f32 %v867_v42, 0.0  ;;  %v915_v55 = vmax.f32 %v883_v43, 0.0 }
 0x101   : > { %v902_v52 = vmax.f32 %v870_v46, 0.0  ;;  %v918_v53 = vmax.f32 %v886_v47, 0.0 }
 0x102   : > { %v900_v56 = vmax.f32 %v868_v48, 0.0  ;;  %v916_v57 = vmax.f32 %v884_v49, 0.0  ;;  %v1459_v58 = vpop.f32.mrb[4].mxu0  ;;  %v1475_v59 = vpop.f32.mrb[4].mxu1 }
 0x103   : > { %v1326_v60 = vpack.c.bf16 %v902_v52, %v901_v50  ;;  %v1366_v61 = vpack.c.bf16 %v918_v53, %v917_v51  ;;  %v834_v62 = vmul.f32 %v1459_v58, %v1669_v24  ;;  %v850_v63 = vmul.f32 %v1475_v59, %v1669_v24  ;;  %v611_v0 = vpop.f32.mrb[5].mxu0  ;;  %v675_v1 = vpop.f32.mrb[5].mxu1 }
 0x104   : > { %v1321_v2 = vpack.c.bf16 %v900_v56, %v899_v54  ;;  %v1361_v3 = vpack.c.bf16 %v916_v57, %v915_v55  ;;  %v832_v4 = vmul.f32 %v1669_v24, %v611_v0  ;;  %v848_v5 = vmul.f32 %v1669_v24, %v675_v1  ;;  %v1460_v6 = vpop.f32.mrb[6].mxu0  ;;  %v1476_v7 = vpop.f32.mrb[6].mxu1 }
 0x105   : > { %1398 = vst [vmem:[%s1697_s24 + $0x8] sm:$0xff] %v1326_v60   ;;  %1406 = vst [vmem:[%s1697_s24 + $0x48] sm:$0xff] %v1366_v61   ;;  %v873_v8 = vadd.f32 %v1674_v26, %v834_v62  ;;  %v889_v9 = vadd.f32 %v1674_v26, %v850_v63  ;;  %v835_v10 = vmul.f32 %v1460_v6, %v1669_v24  ;;  %v614_v12 = vpop.f32.mrb[7].mxu0  ;;  %v678_v13 = vpop.f32.mrb[7].mxu1 }
 0x106   : > { %v851_v11 = vmul.f32 %v1476_v7, %v1669_v24  ;;  %1322 = vst [vmem:[%s1697_s24] sm:$0xff] %v1321_v2   ;;  %1405 = vst [vmem:[%s1697_s24 + $0x40] sm:$0xff] %v1361_v3   ;;  %v871_v14 = vadd.f32 %v1674_v26, %v832_v4  ;;  %v887_v15 = vadd.f32 %v1674_v26, %v848_v5 }
 0x107   : > { %v833_v16 = vmul.f32 %v1669_v24, %v614_v12  ;;  %v849_v17 = vmul.f32 %v1669_v24, %v678_v13  ;;  %v874_v18 = vadd.f32 %v1674_v26, %v835_v10  ;;  %v905_v22 = vmax.f32 %v873_v8, 0.0 }
 0x108   : > { %v890_v19 = vadd.f32 %v1674_v26, %v851_v11  ;;  %v921_v23 = vmax.f32 %v889_v9, 0.0  ;;  %v903_v28 = vmax.f32 %v871_v14, 0.0  ;;  %v919_v29 = vmax.f32 %v887_v15, 0.0 }
 0x109   : > { %v872_v20 = vadd.f32 %v1674_v26, %v833_v16  ;;  %v888_v21 = vadd.f32 %v1674_v26, %v849_v17  ;;  %v906_v25 = vmax.f32 %v874_v18, 0.0 }
 0x10a   : > { %v922_v27 = vmax.f32 %v890_v19, 0.0  ;;  %v1463_v32 = vpop.f32.mrb[8].mxu0  ;;  %v1479_v33 = vpop.f32.mrb[8].mxu1 }
 0x10b   : > { %v904_v30 = vmax.f32 %v872_v20, 0.0  ;;  %v920_v31 = vmax.f32 %v888_v21, 0.0  ;;  %v1336_v34 = vpack.c.bf16 %v906_v25, %v905_v22  ;;  %v838_v36 = vmul.f32 %v1463_v32, %v1669_v24  ;;  %v627_v38 = vpop.f32.mrb[9].mxu0  ;;  %v691_v39 = vpop.f32.mrb[9].mxu1 }
 0x10c   : > { %v1376_v35 = vpack.c.bf16 %v922_v27, %v921_v23  ;;  %v854_v37 = vmul.f32 %v1479_v33, %v1669_v24  ;;  %v836_v42 = vmul.f32 %v1669_v24, %v627_v38  ;;  %v852_v43 = vmul.f32 %v1669_v24, %v691_v39  ;;  %v1464_v44 = vpop.f32.mrb[10].mxu0  ;;  %v1480_v45 = vpop.f32.mrb[10].mxu1 }
 0x10d   : > { %v1331_v40 = vpack.c.bf16 %v904_v30, %v903_v28  ;;  %v1371_v41 = vpack.c.bf16 %v920_v31, %v919_v29  ;;  %1400 = vst [vmem:[%s1697_s24 + $0x18] sm:$0xff] %v1336_v34   ;;  %v877_v46 = vadd.f32 %v1674_v26, %v838_v36  ;;  %v839_v48 = vmul.f32 %v1464_v44, %v1669_v24  ;;  %v630_v50 = vpop.f32.mrb[11].mxu0  ;;  %v694_v51 = vpop.f32.mrb[11].mxu1 }
 0x10e   : > { %1408 = vst [vmem:[%s1697_s24 + $0x58] sm:$0xff] %v1376_v35   ;;  %v893_v47 = vadd.f32 %v1674_v26, %v854_v37  ;;  %v855_v49 = vmul.f32 %v1480_v45, %v1669_v24  ;;  %v875_v52 = vadd.f32 %v1674_v26, %v836_v42  ;;  %v891_v53 = vadd.f32 %v1674_v26, %v852_v43 }
 0x10f   : > { %1399 = vst [vmem:[%s1697_s24 + $0x10] sm:$0xff] %v1331_v40   ;;  %1407 = vst [vmem:[%s1697_s24 + $0x50] sm:$0xff] %v1371_v41   ;;  %v837_v54 = vmul.f32 %v1669_v24, %v630_v50  ;;  %v853_v55 = vmul.f32 %v1669_v24, %v694_v51  ;;  %v878_v56 = vadd.f32 %v1674_v26, %v839_v48  ;;  %v909_v60 = vmax.f32 %v877_v46, 0.0 }
 0x110   : > { %v894_v57 = vadd.f32 %v1674_v26, %v855_v49  ;;  %v925_v61 = vmax.f32 %v893_v47, 0.0  ;;  %v907_v0 = vmax.f32 %v875_v52, 0.0  ;;  %v923_v1 = vmax.f32 %v891_v53, 0.0 }
 0x111   : > { %v876_v58 = vadd.f32 %v1674_v26, %v837_v54  ;;  %v892_v59 = vadd.f32 %v1674_v26, %v853_v55  ;;  %v910_v62 = vmax.f32 %v878_v56, 0.0 }
 0x112   : > { %v926_v63 = vmax.f32 %v894_v57, 0.0  ;;  %v1467_v4 = vpop.f32.mrb[12].mxu0  ;;  %v1483_v5 = vpop.f32.mrb[12].mxu1 }
 0x113   : > { %v908_v2 = vmax.f32 %v876_v58, 0.0  ;;  %v924_v3 = vmax.f32 %v892_v59, 0.0  ;;  %v1346_v6 = vpack.c.bf16 %v910_v62, %v909_v60  ;;  %v842_v8 = vmul.f32 %v1467_v4, %v1669_v24  ;;  %v643_v10 = vpop.f32.mrb[13].mxu0  ;;  %v707_v11 = vpop.f32.mrb[13].mxu1 }
 0x114   : > { %v1386_v7 = vpack.c.bf16 %v926_v63, %v925_v61  ;;  %v858_v9 = vmul.f32 %v1483_v5, %v1669_v24  ;;  %v840_v14 = vmul.f32 %v1669_v24, %v643_v10  ;;  %v856_v15 = vmul.f32 %v1669_v24, %v707_v11  ;;  %v1468_v16 = vpop.f32.mrb[14].mxu0  ;;  %v1484_v17 = vpop.f32.mrb[14].mxu1 }
 0x115   : > { %v1341_v12 = vpack.c.bf16 %v908_v2, %v907_v0  ;;  %v1381_v13 = vpack.c.bf16 %v924_v3, %v923_v1  ;;  %1402 = vst [vmem:[%s1697_s24 + $0x28] sm:$0xff] %v1346_v6   ;;  %v881_v18 = vadd.f32 %v1674_v26, %v842_v8  ;;  %v843_v20 = vmul.f32 %v1468_v16, %v1669_v24  ;;  %v646_v22 = vpop.f32.mrb[15].mxu0  ;;  %v710_v23 = vpop.f32.mrb[15].mxu1 }
 0x116   : > { %1410 = vst [vmem:[%s1697_s24 + $0x68] sm:$0xff] %v1386_v7   ;;  %v897_v19 = vadd.f32 %v1674_v26, %v858_v9  ;;  %v859_v21 = vmul.f32 %v1484_v17, %v1669_v24  ;;  %v879_v25 = vadd.f32 %v1674_v26, %v840_v14  ;;  %v895_v27 = vadd.f32 %v1674_v26, %v856_v15 }
 0x117   : > { %1401 = vst [vmem:[%s1697_s24 + $0x20] sm:$0xff] %v1341_v12   ;;  %1409 = vst [vmem:[%s1697_s24 + $0x60] sm:$0xff] %v1381_v13   ;;  %v841_v28 = vmul.f32 %v1669_v24, %v646_v22  ;;  %v857_v29 = vmul.f32 %v1669_v24, %v710_v23  ;;  %v882_v30 = vadd.f32 %v1674_v26, %v843_v20  ;;  %v913_v34 = vmax.f32 %v881_v18, 0.0 }
 0x118   : > { %v898_v31 = vadd.f32 %v1674_v26, %v859_v21  ;;  %v929_v35 = vmax.f32 %v897_v19, 0.0  ;;  %v911_v38 = vmax.f32 %v879_v25, 0.0  ;;  %v927_v39 = vmax.f32 %v895_v27, 0.0 }
 0x119   : > { %v880_v32 = vadd.f32 %v1674_v26, %v841_v28  ;;  %v896_v33 = vadd.f32 %v1674_v26, %v857_v29  ;;  %v914_v36 = vmax.f32 %v882_v30, 0.0 }
 0x11a   : > { %v930_v37 = vmax.f32 %v898_v31, 0.0 }
 0x11b   : > { %v912_v40 = vmax.f32 %v880_v32, 0.0  ;;  %v928_v24 = vmax.f32 %v896_v33, 0.0  ;;  %v1356_v41 = vpack.c.bf16 %v914_v36, %v913_v34 }
 0x11c   : > { %v1396_v42 = vpack.c.bf16 %v930_v37, %v929_v35 }
 0x11d   : > { %v1351_v43 = vpack.c.bf16 %v912_v40, %v911_v38  ;;  %v1391_v44 = vpack.c.bf16 %v928_v24, %v927_v39  ;;  %1404 = vst [vmem:[%s1697_s24 + $0x38] sm:$0xff] %v1356_v41  }
 0x11e   : > { %1412 = vst [vmem:[%s1697_s24 + $0x78] sm:$0xff] %v1396_v42  }
 0x11f   : > { %1403 = vst [vmem:[%s1697_s24 + $0x30] sm:$0xff] %v1351_v43   ;;  %1411 = vst [vmem:[%s1697_s24 + $0x70] sm:$0xff] %v1391_v44  }
 0x120 PF: > { %s14_s17 = sadd.s32 1, %s1571_s17   ;;  %s1777_s15 = smov %s1567_s16 }
 0x121   : > { %p11_p5 = scmp.ge.s32.totalorder %s14_s17, 4   ;;  %s1778_s16 = smov %s1780_s18 }
 0x123   :  { %13 = sbr.rel (!%p11_p5) target bundleno = 2 (0x2), region = 83 }

// kernel: resnet_forward.16
= control target key start
LH: loop header
LB: loop body
LE: loop exit
PB: predicated region body
PF: predicated region fallthrough
CT: control target
= control target key end

     0   :  { %s1855_s18 = smov 0   ;;  %s1857_s19 = smov 0   ;;  %s2148_s0 = inlined_call_operand.vmem [shape: bf16[512,128], index: 0, kind: input, shape index: {}]   ;;  %s2149_s1 = inlined_call_operand.vmem [shape: bf16[128,128], index: 1, kind: input, shape index: {}]   ;;  %s2150_s2 = inlined_call_operand.vmem [shape: f32[1,128], index: 2, kind: input, shape index: {}]   ;;  %s2151_s3 = inlined_call_operand.vmem [shape: f32[1,128], index: 3, kind: input, shape index: {}]   ;;  %s2152_s4 = inlined_call_operand.vmem [shape: bf16[512,128], index: 4, kind: input, shape index: {}, may-alias: {4,5}]   ;;  %s2153_s5 = inlined_call_operand.vmem [shape: bf16[512,128], index: 5, kind: output, shape index: {}, may-alias: {4,5}]  }
   0x1   :  { %s1859_s20 = smov 0  }
   0x2 LB: > { %s34_s21 = sadd.s32 1, %s1819_s19  ;;  %p1392_p0 = scmp.ge.s32.totalorder %s1823_s20, 1  ;;  %s1823_s20 = sphi %s1859_s20, %s15_s20   ;;  %s1819_s19 = sphi %s1857_s19, %s2155_s19   ;;  %s1815_s18 = sphi %s1855_s18, %s2154_s18  }
   0x3   : > { %p36_p1 = scmp.ge.s32.totalorder %s34_s21, 2  ;;  %p262_p2 = scmp.lt.s32.totalorder %s1823_s20, 3 }
   0x5   : > { %s2157_s21 = smov (%p36_p1, %s34_s21), 0  ;;  %p263_p3 = pnand %p1392_p0, %p262_p2 }
   0x6   : > { %v1777_v0 = vld [vmem:[%s2149_s1] sm:$0xff] (!%p263_p3)   ;;  %s1393_s24 = sshll.u32 (!%p263_p3), %s1815_s18, 5  ;;  %v1778_v1 = vld [vmem:[%s2149_s1 + $0x8] sm:$0xff] (!%p263_p3)   ;;  %v1779_v2 = vld [vmem:[%s2149_s1 + $0x10] sm:$0xff] (!%p263_p3)  }
   0x7   : > { %266 = sbr.rel (%p263_p3) target bundleno = 295 (0x127), region = 40  ;;  %p319_p4 = scmp.lt.s32.totalorder (!%p263_p3), %s1393_s24, 63  ;;  %1689 = vmatprep.subr.bf16.mxu0 (!%p263_p3), %v1777_v0  ;;  %1737 = vmatprep.subr.bf16.mxu1 (!%p263_p3), %v1777_v0  ;;  %v1780_v3 = vld [vmem:[%s2149_s1 + $0x18] sm:$0xff] (!%p263_p3)   ;;  %v1781_v6 = vld [vmem:[%s2149_s1 + $0x20] sm:$0xff] (!%p263_p3)   ;;  %v1782_v7 = vld [vmem:[%s2149_s1 + $0x28] sm:$0xff] (!%p263_p3)  }
   0x8   : > { %1690 = vmatpush3.bf16.msra.mxu0 (!%p263_p3), %v1777_v0  ;;  %1745 = vmatpush3.bf16.msra.mxu1 (!%p263_p3), %v1777_v0  ;;  %v1783_v8 = vld [vmem:[%s2149_s1 + $0x30] sm:$0xff] (!%p263_p3)   ;;  %v1784_v9 = vld [vmem:[%s2149_s1 + $0x38] sm:$0xff] (!%p263_p3)   ;;  %v1962_v40 = vld [vmem:[%s2150_s2] ss:$0 sm:$0xff] (!%p263_p3) }
   0x9   : > { %1691 = vmatprep.subr.bf16.mxu0 (!%p263_p3), %v1778_v1  ;;  %1738 = vmatprep.subr.bf16.mxu1 (!%p263_p3), %v1778_v1  ;;  %v1987_v54 = vld [vmem:[%s2151_s3] ss:$0 sm:$0xff] (!%p263_p3) }
   0xc   : > { %1692 = vmatpush3.bf16.msra.mxu0 (!%p263_p3), %v1778_v1  ;;  %1746 = vmatpush3.bf16.msra.mxu1 (!%p263_p3), %v1778_v1 }
   0xd   : > { %1693 = vmatprep.subr.bf16.mxu0 (!%p263_p3), %v1779_v2  ;;  %1739 = vmatprep.subr.bf16.mxu1 (!%p263_p3), %v1779_v2 }
   0xe   : > { %s2159_s24 = smov (!%p319_p4, %s1393_s24), 63 }
   0xf   : > { %s1882_s29 = sshll.u32 %s2159_s24, 2 }
  0x10   : > { %s1888_s7 = scalar_lea.vmem %s2148_s0, %s1882_s29  ;;  %1694 = vmatpush3.bf16.msra.mxu0 %v1779_v2  ;;  %1747 = vmatpush3.bf16.msra.mxu1 %v1779_v2  ;;  %s1925_s23 = scalar_lea.vmem %s2152_s4, %s1882_s29 }
  0x11   : > { %v1785_v4 = vld [vmem:[%s1888_s7] sm:$0xff]   ;;  %1695 = vmatprep.subr.bf16.mxu0 %v1780_v3  ;;  %1740 = vmatprep.subr.bf16.mxu1 %v1780_v3  ;;  %v1787_v10 = vld [vmem:[%s1888_s7 + $0x8] sm:$0xff]   ;;  %v1789_v12 = vld [vmem:[%s1888_s7 + $0x10] sm:$0xff]   ;;  %s2030_s6 = scalar_lea.vmem %s2153_s5, %s1882_s29 }
  0x12   : > { %v1786_v5 = vld [vmem:[%s1888_s7 + $0x40] sm:$0xff]   ;;  %1705 = vmatprep.mubr.bf16.mxu0 %v1785_v4  ;;  %v1788_v11 = vld [vmem:[%s1888_s7 + $0x48] sm:$0xff]   ;;  %v1790_v13 = vld [vmem:[%s1888_s7 + $0x50] sm:$0xff]  }
  0x13   : > { %1721 = vmatprep.mubr.bf16.mxu1 %v1786_v5  ;;  %v1791_v14 = vld [vmem:[%s1888_s7 + $0x18] sm:$0xff]   ;;  %v1793_v16 = vld [vmem:[%s1888_s7 + $0x20] sm:$0xff]   ;;  %v1795_v18 = vld [vmem:[%s1888_s7 + $0x28] sm:$0xff]  }
  0x14   : > { %1696 = vmatpush3.bf16.msra.mxu0 %v1780_v3  ;;  %1748 = vmatpush3.bf16.msra.mxu1 %v1780_v3  ;;  %v1792_v15 = vld [vmem:[%s1888_s7 + $0x58] sm:$0xff]   ;;  %v1794_v17 = vld [vmem:[%s1888_s7 + $0x60] sm:$0xff]   ;;  %v1796_v19 = vld [vmem:[%s1888_s7 + $0x68] sm:$0xff]  }
  0x15   : > { %1697 = vmatprep.subr.bf16.mxu0 %v1781_v6  ;;  %1741 = vmatprep.subr.bf16.mxu1 %v1781_v6  ;;  %v1797_v20 = vld [vmem:[%s1888_s7 + $0x30] sm:$0xff]   ;;  %v1799_v22 = vld [vmem:[%s1888_s7 + $0x38] sm:$0xff]   ;;  %v1928_v24 = vld [vmem:[%s1925_s23 + $0x8] sm:$0xff]  }
  0x16   : > { %v1798_v21 = vld [vmem:[%s1888_s7 + $0x70] sm:$0xff]   ;;  %v1800_v23 = vld [vmem:[%s1888_s7 + $0x78] sm:$0xff]   ;;  %v1931_v25 = vld [vmem:[%s1925_s23 + $0x48] sm:$0xff]   ;;  %v1497_v32 = vunpack.c.l.bf16 %v1928_v24  ;;  %v1498_v36 = vunpack.c.h.bf16 %v1928_v24 }
  0x17   : > { %v1934_v26 = vld [vmem:[%s1925_s23] sm:$0xff]   ;;  %v1940_v28 = vld [vmem:[%s1925_s23 + $0x18] sm:$0xff]   ;;  %v1946_v30 = vld [vmem:[%s1925_s23 + $0x10] sm:$0xff]   ;;  %v1529_v33 = vunpack.c.l.bf16 %v1931_v25  ;;  %v1530_v37 = vunpack.c.h.bf16 %v1931_v25 }
  0x18   : > { %1698 = vmatpush3.bf16.msra.mxu0 %v1781_v6  ;;  %1749 = vmatpush3.bf16.msra.mxu1 %v1781_v6  ;;  %v1937_v27 = vld [vmem:[%s1925_s23 + $0x40] sm:$0xff]   ;;  %v1943_v29 = vld [vmem:[%s1925_s23 + $0x58] sm:$0xff]   ;;  %v1949_v31 = vld [vmem:[%s1925_s23 + $0x50] sm:$0xff]   ;;  %v1493_v34 = vunpack.c.l.bf16 %v1934_v26  ;;  %v1494_v38 = vunpack.c.h.bf16 %v1934_v26  ;;  %v1505_v41 = vunpack.c.l.bf16 %v1940_v28  ;;  %v1501_v43 = vunpack.c.l.bf16 %v1946_v30 }
  0x19   : > { %1699 = vmatprep.subr.bf16.mxu0 %v1782_v7  ;;  %1742 = vmatprep.subr.bf16.mxu1 %v1782_v7  ;;  %v1525_v35 = vunpack.c.l.bf16 %v1937_v27  ;;  %v1526_v39 = vunpack.c.h.bf16 %v1937_v27  ;;  %v1537_v42 = vunpack.c.l.bf16 %v1943_v29  ;;  %v1533_v44 = vunpack.c.l.bf16 %v1949_v31  ;;  %v1969_v45 = vld [vmem:[%s1925_s23 + $0x28] sm:$0xff]   ;;  %v1979_v51 = vld [vmem:[%s1925_s23 + $0x20] sm:$0xff]  }
  0x1a   : > { %v1506_v46 = vunpack.c.h.bf16 %v1940_v28  ;;  %v1538_v47 = vunpack.c.h.bf16 %v1943_v29  ;;  %v1502_v48 = vunpack.c.h.bf16 %v1946_v30  ;;  %v1534_v49 = vunpack.c.h.bf16 %v1949_v31  ;;  %v1976_v50 = vld [vmem:[%s1925_s23 + $0x68] sm:$0xff]   ;;  %v1982_v52 = vld [vmem:[%s1925_s23 + $0x60] sm:$0xff]  }
  0x1b   : > { %v1513_v56 = vunpack.c.l.bf16 %v1969_v45  ;;  %v1545_v57 = vunpack.c.l.bf16 %v1976_v50  ;;  %v1509_v58 = vunpack.c.l.bf16 %v1979_v51  ;;  %v1541_v59 = vunpack.c.l.bf16 %v1982_v52 }
  0x1c   : > { %1700 = vmatpush3.bf16.msra.mxu0 %v1782_v7  ;;  %1750 = vmatpush3.bf16.msra.mxu1 %v1782_v7  ;;  %v1514_v0 = vunpack.c.h.bf16 %v1969_v45  ;;  %v1546_v1 = vunpack.c.h.bf16 %v1976_v50  ;;  %v1510_v6 = vunpack.c.h.bf16 %v1979_v51  ;;  %v1542_v7 = vunpack.c.h.bf16 %v1982_v52 }
  0x1d   : > { %1701 = vmatprep.subr.bf16.mxu0 %v1783_v8  ;;  %1743 = vmatprep.subr.bf16.mxu1 %v1783_v8 }
  0x20   : > { %1702 = vmatpush3.bf16.msra.mxu0 %v1783_v8  ;;  %1751 = vmatpush3.bf16.msra.mxu1 %v1783_v8 }
  0x21   : > { %1703 = vmatprep.subr.bf16.mxu0 %v1784_v9  ;;  %1744 = vmatprep.subr.bf16.mxu1 %v1784_v9 }
  0x24   : > { %1704 = vmatpush3.bf16.msra.mxu0 %v1784_v9  ;;  %1752 = vmatpush3.bf16.msra.mxu1 %v1784_v9 }
  0x27   : > { %1706 = vmatmul.mubr.bf16.vlgmr.msra.gmra.mrb[0].mxu0 %v1787_v10  ;;  %1722 = vmatmul.mubr.bf16.vlgmr.msra.gmra.mrb[0].mxu1 %v1788_v11 }
  0x28   : > { %1709 = vmatprep.mubr.bf16.mxu0 %v1789_v12  ;;  %1725 = vmatprep.mubr.bf16.mxu1 %v1790_v13 }
  0x2f   : > { %1710 = vmatmul.mubr.bf16.gmra.mrb[4].mxu0 %v1791_v14  ;;  %1726 = vmatmul.mubr.bf16.gmra.mrb[4].mxu1 %v1792_v15 }
  0x30   : > { %1713 = vmatprep.mubr.bf16.mxu0 %v1793_v16  ;;  %1729 = vmatprep.mubr.bf16.mxu1 %v1794_v17 }
  0x37   : > { %1714 = vmatmul.mubr.bf16.gmra.mrb[8].mxu0 %v1795_v18  ;;  %1730 = vmatmul.mubr.bf16.gmra.mrb[8].mxu1 %v1796_v19 }
  0x38   : > { %1717 = vmatprep.mubr.bf16.mxu0 %v1797_v20  ;;  %1733 = vmatprep.mubr.bf16.mxu1 %v1798_v21 }
  0x3f   : > { %1718 = vmatmul.mubr.bf16.gmra.mrb[12].mxu0 %v1799_v22  ;;  %1734 = vmatmul.mubr.bf16.gmra.mrb[12].mxu1 %v1800_v23 }
  0xfa   : > { %v1707_v53 = vpop.f32.mrb[0].mxu0  ;;  %v1723_v55 = vpop.f32.mrb[0].mxu1 }
  0xfb   : > { %v890_v60 = vmul.f32 %v1707_v53, %v1962_v40  ;;  %v906_v61 = vmul.f32 %v1723_v55, %v1962_v40  ;;  %v655_v62 = vpop.f32.mrb[1].mxu0  ;;  %v719_v63 = vpop.f32.mrb[1].mxu1 }
  0xfc   : > { %v888_v2 = vmul.f32 %v1962_v40, %v655_v62  ;;  %v904_v3 = vmul.f32 %v1962_v40, %v719_v63  ;;  %v1708_v4 = vpop.f32.mrb[2].mxu0  ;;  %v1724_v5 = vpop.f32.mrb[2].mxu1 }
  0xfd   : > { %v929_v8 = vadd.f32 %v1987_v54, %v890_v60  ;;  %v945_v9 = vadd.f32 %v1987_v54, %v906_v61  ;;  %v891_v10 = vmul.f32 %v1708_v4, %v1962_v40  ;;  %v907_v11 = vmul.f32 %v1724_v5, %v1962_v40  ;;  %v658_v12 = vpop.f32.mrb[3].mxu0  ;;  %v722_v13 = vpop.f32.mrb[3].mxu1 }
  0xfe   : > { %v927_v14 = vadd.f32 %v1987_v54, %v888_v2  ;;  %v943_v15 = vadd.f32 %v1987_v54, %v904_v3  ;;  %v889_v16 = vmul.f32 %v1962_v40, %v658_v12  ;;  %v905_v17 = vmul.f32 %v1962_v40, %v722_v13  ;;  %v2024_v12 = vld [vmem:[%s1925_s23 + $0x30] sm:$0xff]  }
  0xff   : > { %v1025_v18 = vadd.f32 %v1497_v32, %v929_v8  ;;  %v1041_v19 = vadd.f32 %v1529_v33, %v945_v9  ;;  %v930_v20 = vadd.f32 %v1987_v54, %v891_v10  ;;  %v946_v21 = vadd.f32 %v1987_v54, %v907_v11  ;;  %v2016_v8 = vld [vmem:[%s1925_s23 + $0x38] sm:$0xff]   ;;  %v2033_v13 = vld [vmem:[%s1925_s23 + $0x70] sm:$0xff]  }
 0x100   : > { %v1023_v22 = vadd.f32 %v1493_v34, %v927_v14  ;;  %v1039_v23 = vadd.f32 %v1525_v35, %v943_v15  ;;  %v928_v24 = vadd.f32 %v1987_v54, %v889_v16  ;;  %v944_v25 = vadd.f32 %v1987_v54, %v905_v17 }
 0x101   : > { %v1057_v26 = vmax.f32 %v1025_v18, 0.0  ;;  %v1073_v27 = vmax.f32 %v1041_v19, 0.0  ;;  %v1026_v53 = vadd.f32 %v1498_v36, %v930_v20  ;;  %v1042_v55 = vadd.f32 %v1530_v37, %v946_v21  ;;  %v2019_v36 = vld [vmem:[%s1925_s23 + $0x78] sm:$0xff]  }
 0x102   : > { %v1055_v60 = vmax.f32 %v1023_v22, 0.0  ;;  %v1071_v61 = vmax.f32 %v1039_v23, 0.0  ;;  %v1024_v32 = vadd.f32 %v1494_v38, %v928_v24  ;;  %v1040_v33 = vadd.f32 %v1526_v39, %v944_v25  ;;  %v1711_v62 = vpop.f32.mrb[4].mxu0  ;;  %v1727_v63 = vpop.f32.mrb[4].mxu1 }
 0x103   : > { %v1058_v34 = vmax.f32 %v1026_v53, 0.0  ;;  %v1074_v35 = vmax.f32 %v1042_v55, 0.0  ;;  %v894_v2 = vmul.f32 %v1711_v62, %v1962_v40  ;;  %v910_v3 = vmul.f32 %v1727_v63, %v1962_v40  ;;  %v671_v4 = vpop.f32.mrb[5].mxu0  ;;  %v735_v5 = vpop.f32.mrb[5].mxu1 }
 0x104   : > { %v1056_v37 = vmax.f32 %v1024_v32, 0.0  ;;  %v1072_v38 = vmax.f32 %v1040_v33, 0.0  ;;  %v892_v39 = vmul.f32 %v1962_v40, %v671_v4  ;;  %v908_v9 = vmul.f32 %v1962_v40, %v735_v5  ;;  %v1712_v10 = vpop.f32.mrb[6].mxu0  ;;  %v1728_v11 = vpop.f32.mrb[6].mxu1 }
 0x105   : > { %v1563_v14 = vpack.c.bf16 %v1058_v34, %v1057_v26  ;;  %v1603_v15 = vpack.c.bf16 %v1074_v35, %v1073_v27  ;;  %v933_v16 = vadd.f32 %v1987_v54, %v894_v2  ;;  %v949_v17 = vadd.f32 %v1987_v54, %v910_v3  ;;  %v674_v18 = vpop.f32.mrb[7].mxu0  ;;  %v738_v19 = vpop.f32.mrb[7].mxu1 }
 0x106   : > { %v1558_v20 = vpack.c.bf16 %v1056_v37, %v1055_v60  ;;  %v1598_v21 = vpack.c.bf16 %v1072_v38, %v1071_v61  ;;  %v931_v22 = vadd.f32 %v1987_v54, %v892_v39  ;;  %v947_v23 = vadd.f32 %v1987_v54, %v908_v9 }
 0x107   : > { %v1029_v24 = vadd.f32 %v1505_v41, %v933_v16  ;;  %v1045_v25 = vadd.f32 %v1537_v42, %v949_v17  ;;  %v895_v26 = vmul.f32 %v1712_v10, %v1962_v40  ;;  %v911_v27 = vmul.f32 %v1728_v11, %v1962_v40  ;;  %1650 = vst [vmem:[%s2030_s6 + $0x8] sm:$0xff] %v1563_v14  }
 0x108   : > { %1658 = vst [vmem:[%s2030_s6 + $0x48] sm:$0xff] %v1603_v15   ;;  %v1027_v53 = vadd.f32 %v1501_v43, %v931_v22  ;;  %v1043_v55 = vadd.f32 %v1533_v44, %v947_v23  ;;  %v893_v60 = vmul.f32 %v1962_v40, %v674_v18  ;;  %v909_v61 = vmul.f32 %v1962_v40, %v738_v19 }
 0x109   : > { %1559 = vst [vmem:[%s2030_s6] sm:$0xff] %v1558_v20   ;;  %1657 = vst [vmem:[%s2030_s6 + $0x40] sm:$0xff] %v1598_v21   ;;  %v1061_v41 = vmax.f32 %v1029_v24, 0.0  ;;  %v1077_v42 = vmax.f32 %v1045_v25, 0.0  ;;  %v934_v32 = vadd.f32 %v1987_v54, %v895_v26  ;;  %v950_v33 = vadd.f32 %v1987_v54, %v911_v27 }
 0x10a   : > { %v1059_v62 = vmax.f32 %v1027_v53, 0.0  ;;  %v1075_v63 = vmax.f32 %v1043_v55, 0.0  ;;  %v932_v34 = vadd.f32 %v1987_v54, %v893_v60  ;;  %v948_v43 = vadd.f32 %v1987_v54, %v909_v61  ;;  %v1715_v35 = vpop.f32.mrb[8].mxu0  ;;  %v1731_v44 = vpop.f32.mrb[8].mxu1 }
 0x10b   : > { %v1030_v2 = vadd.f32 %v1506_v46, %v934_v32  ;;  %v1046_v3 = vadd.f32 %v1538_v47, %v950_v33  ;;  %v898_v4 = vmul.f32 %v1715_v35, %v1962_v40  ;;  %v914_v5 = vmul.f32 %v1731_v44, %v1962_v40  ;;  %v687_v37 = vpop.f32.mrb[9].mxu0  ;;  %v751_v38 = vpop.f32.mrb[9].mxu1 }
 0x10c   : > { %v1028_v39 = vadd.f32 %v1502_v48, %v932_v34  ;;  %v1044_v9 = vadd.f32 %v1534_v49, %v948_v43  ;;  %v896_v10 = vmul.f32 %v1962_v40, %v687_v37  ;;  %v912_v28 = vmul.f32 %v1962_v40, %v751_v38  ;;  %v1716_v46 = vpop.f32.mrb[10].mxu0  ;;  %v1732_v11 = vpop.f32.mrb[10].mxu1 }
 0x10d   : > { %v1062_v29 = vmax.f32 %v1030_v2, 0.0  ;;  %v1078_v47 = vmax.f32 %v1046_v3, 0.0  ;;  %v937_v14 = vadd.f32 %v1987_v54, %v898_v4  ;;  %v953_v15 = vadd.f32 %v1987_v54, %v914_v5  ;;  %v690_v16 = vpop.f32.mrb[11].mxu0  ;;  %v754_v17 = vpop.f32.mrb[11].mxu1 }
 0x10e   : > { %v1060_v18 = vmax.f32 %v1028_v39, 0.0  ;;  %v1076_v30 = vmax.f32 %v1044_v9, 0.0  ;;  %v935_v31 = vadd.f32 %v1987_v54, %v896_v10  ;;  %v951_v48 = vadd.f32 %v1987_v54, %v912_v28 }
 0x10f   : > { %v1573_v49 = vpack.c.bf16 %v1062_v29, %v1061_v41  ;;  %v1613_v19 = vpack.c.bf16 %v1078_v47, %v1077_v42  ;;  %v1521_v20 = vunpack.c.l.bf16 %v2016_v8  ;;  %v1553_v21 = vunpack.c.l.bf16 %v2019_v36 }
 0x110   : > { %v1568_v22 = vpack.c.bf16 %v1060_v18, %v1059_v62  ;;  %v1608_v23 = vpack.c.bf16 %v1076_v30, %v1075_v63  ;;  %v1517_v24 = vunpack.c.l.bf16 %v2024_v12  ;;  %v1549_v25 = vunpack.c.l.bf16 %v2033_v13 }
 0x111   : > { %v1033_v26 = vadd.f32 %v1513_v56, %v937_v14  ;;  %v1049_v27 = vadd.f32 %v1545_v57, %v953_v15  ;;  %v899_v53 = vmul.f32 %v1716_v46, %v1962_v40  ;;  %v915_v55 = vmul.f32 %v1732_v11, %v1962_v40  ;;  %1652 = vst [vmem:[%s2030_s6 + $0x18] sm:$0xff] %v1573_v49  }
 0x112   : > { %1660 = vst [vmem:[%s2030_s6 + $0x58] sm:$0xff] %v1613_v19   ;;  %v1031_v60 = vadd.f32 %v1509_v58, %v935_v31  ;;  %v1047_v61 = vadd.f32 %v1541_v59, %v951_v48  ;;  %v897_v41 = vmul.f32 %v1962_v40, %v690_v16  ;;  %v913_v42 = vmul.f32 %v1962_v40, %v754_v17  ;;  %v1719_v56 = vpop.f32.mrb[12].mxu0  ;;  %v1735_v32 = vpop.f32.mrb[12].mxu1 }
 0x113   : > { %1651 = vst [vmem:[%s2030_s6 + $0x10] sm:$0xff] %v1568_v22   ;;  %1659 = vst [vmem:[%s2030_s6 + $0x50] sm:$0xff] %v1608_v23   ;;  %v938_v57 = vadd.f32 %v1987_v54, %v899_v53  ;;  %v954_v33 = vadd.f32 %v1987_v54, %v915_v55  ;;  %v902_v62 = vmul.f32 %v1719_v56, %v1962_v40  ;;  %v703_v58 = vpop.f32.mrb[13].mxu0  ;;  %v767_v34 = vpop.f32.mrb[13].mxu1  ;;  %v1065_v4 = vmax.f32 %v1033_v26, 0.0 }
 0x114   : > { %v918_v63 = vmul.f32 %v1735_v32, %v1962_v40  ;;  %v936_v59 = vadd.f32 %v1987_v54, %v897_v41  ;;  %v952_v43 = vadd.f32 %v1987_v54, %v913_v42  ;;  %v900_v35 = vmul.f32 %v1962_v40, %v703_v58  ;;  %v1720_v2 = vpop.f32.mrb[14].mxu0  ;;  %v1736_v3 = vpop.f32.mrb[14].mxu1 }
 0x115   : > { %v916_v44 = vmul.f32 %v1962_v40, %v767_v34  ;;  %v1081_v5 = vmax.f32 %v1049_v27, 0.0  ;;  %v1034_v37 = vadd.f32 %v1514_v0, %v938_v57  ;;  %v1050_v38 = vadd.f32 %v1546_v1, %v954_v33  ;;  %v706_v39 = vpop.f32.mrb[15].mxu0  ;;  %v770_v9 = vpop.f32.mrb[15].mxu1 }
 0x116   : > { %v1063_v10 = vmax.f32 %v1031_v60, 0.0  ;;  %v1079_v28 = vmax.f32 %v1047_v61, 0.0  ;;  %v1032_v46 = vadd.f32 %v1510_v6, %v936_v59  ;;  %v1048_v11 = vadd.f32 %v1542_v7, %v952_v43 }
 0x117   : > { %v1066_v29 = vmax.f32 %v1034_v37, 0.0  ;;  %v1082_v47 = vmax.f32 %v1050_v38, 0.0  ;;  %v941_v45 = vadd.f32 %v1987_v54, %v902_v62  ;;  %v957_v0 = vadd.f32 %v1987_v54, %v918_v63 }
 0x118   : > { %v1064_v50 = vmax.f32 %v1032_v46, 0.0  ;;  %v1080_v1 = vmax.f32 %v1048_v11, 0.0  ;;  %v939_v14 = vadd.f32 %v1987_v54, %v900_v35  ;;  %v955_v15 = vadd.f32 %v1987_v54, %v916_v44 }
 0x119   : > { %v1583_v16 = vpack.c.bf16 %v1066_v29, %v1065_v4  ;;  %v1623_v51 = vpack.c.bf16 %v1082_v47, %v1081_v5  ;;  %v1522_v6 = vunpack.c.h.bf16 %v2016_v8  ;;  %v1554_v52 = vunpack.c.h.bf16 %v2019_v36 }
 0x11a   : > { %v1578_v7 = vpack.c.bf16 %v1064_v50, %v1063_v10  ;;  %v1618_v17 = vpack.c.bf16 %v1080_v1, %v1079_v28  ;;  %v1518_v18 = vunpack.c.h.bf16 %v2024_v12  ;;  %v1550_v30 = vunpack.c.h.bf16 %v2033_v13 }
 0x11b   : > { %1654 = vst [vmem:[%s2030_s6 + $0x28] sm:$0xff] %v1583_v16   ;;  %1662 = vst [vmem:[%s2030_s6 + $0x68] sm:$0xff] %v1623_v51   ;;  %v903_v31 = vmul.f32 %v1720_v2, %v1962_v40  ;;  %v919_v48 = vmul.f32 %v1736_v3, %v1962_v40  ;;  %v901_v49 = vmul.f32 %v1962_v40, %v706_v39 }
 0x11c   : > { %v917_v19 = vmul.f32 %v1962_v40, %v770_v9  ;;  %v1037_v22 = vadd.f32 %v1521_v20, %v941_v45  ;;  %v1053_v23 = vadd.f32 %v1553_v21, %v957_v0  ;;  %v1035_v26 = vadd.f32 %v1517_v24, %v939_v14  ;;  %1653 = vst [vmem:[%s2030_s6 + $0x20] sm:$0xff] %v1578_v7  }
 0x11d   : > { %v1051_v12 = vadd.f32 %v1549_v25, %v955_v15  ;;  %1661 = vst [vmem:[%s2030_s6 + $0x60] sm:$0xff] %v1618_v17   ;;  %v942_v13 = vadd.f32 %v1987_v54, %v903_v31  ;;  %v958_v27 = vadd.f32 %v1987_v54, %v919_v48  ;;  %v940_v53 = vadd.f32 %v1987_v54, %v901_v49 }
 0x11e   : > { %v956_v55 = vadd.f32 %v1987_v54, %v917_v19  ;;  %v1069_v20 = vmax.f32 %v1037_v22, 0.0  ;;  %v1085_v21 = vmax.f32 %v1053_v23, 0.0  ;;  %v1067_v24 = vmax.f32 %v1035_v26, 0.0 }
 0x11f   : > { %v1038_v60 = vadd.f32 %v1522_v6, %v942_v13  ;;  %v1054_v40 = vadd.f32 %v1554_v52, %v958_v27  ;;  %v1036_v8 = vadd.f32 %v1518_v18, %v940_v53  ;;  %v1083_v25 = vmax.f32 %v1051_v12, 0.0 }
 0x120   : > { %v1052_v36 = vadd.f32 %v1550_v30, %v956_v55 }
 0x121   : > { %v1070_v61 = vmax.f32 %v1038_v60, 0.0  ;;  %v1086_v41 = vmax.f32 %v1054_v40, 0.0  ;;  %v1068_v42 = vmax.f32 %v1036_v8, 0.0 }
 0x122   : > { %v1084_v56 = vmax.f32 %v1052_v36, 0.0 }
 0x123   : > { %v1593_v32 = vpack.c.bf16 %v1070_v61, %v1069_v20  ;;  %v1633_v57 = vpack.c.bf16 %v1086_v41, %v1085_v21  ;;  %v1588_v33 = vpack.c.bf16 %v1068_v42, %v1067_v24 }
 0x124   : > { %v1628_v54 = vpack.c.bf16 %v1084_v56, %v1083_v25 }
 0x125   : > { %1656 = vst [vmem:[%s2030_s6 + $0x38] sm:$0xff] %v1593_v32   ;;  %1664 = vst [vmem:[%s2030_s6 + $0x78] sm:$0xff] %v1633_v57  }
 0x126   : > { %1655 = vst [vmem:[%s2030_s6 + $0x30] sm:$0xff] %v1588_v33   ;;  %1663 = vst [vmem:[%s2030_s6 + $0x70] sm:$0xff] %v1628_v54  }
 0x127 PF: > { %s15_s20 = sadd.s32 1, %s1823_s20   ;;  %s2154_s18 = smov %s1819_s19 }
 0x128   : > { %p12_p5 = scmp.ge.s32.totalorder %s15_s20, 4   ;;  %s2155_s19 = smov %s2157_s21 }
 0x12a   :  { %14 = sbr.rel (!%p12_p5) target bundleno = 2 (0x2), region = 90 }

// kernel: resnet_forward.17
= control target key start
LH: loop header
LB: loop body
LE: loop exit
PB: predicated region body
PF: predicated region fallthrough
CT: control target
= control target key end

     0   :  { %s774_s1 = inlined_call_operand.vmem [shape: bf16[128,128], index: 1, kind: input, shape index: {}]   ;;  %s775_s0 = inlined_call_operand.vmem [shape: bf16[128,128], index: 0, kind: input, shape index: {}]   ;;  %s776_s2 = inlined_call_operand.vmem [shape: f32[1,128], index: 2, kind: input, shape index: {}]   ;;  %s777_s3 = inlined_call_operand.vmem [shape: f32[1,128], index: 3, kind: input, shape index: {}]   ;;  %s778_s4 = inlined_call_operand.vmem [shape: bf16[128,128], index: 4, kind: output, shape index: {}]  }
   0x1   :  { %v637_v0 = vld [vmem:[%s774_s1] sm:$0xff]   ;;  %v638_v1 = vld [vmem:[%s774_s1 + $0x8] sm:$0xff]   ;;  %v639_v2 = vld [vmem:[%s774_s1 + $0x10] sm:$0xff]  }
   0x2   :  { %589 = vmatprep.subr.bf16.mxu0 %v637_v0  ;;  %621 = vmatprep.subr.bf16.mxu1 %v637_v0  ;;  %v640_v3 = vld [vmem:[%s774_s1 + $0x18] sm:$0xff]   ;;  %v645_v4 = vld [vmem:[%s775_s0] sm:$0xff]   ;;  %v642_v7 = vld [vmem:[%s774_s1 + $0x28] sm:$0xff]  }
   0x3   :  { %590 = vmatpush3.bf16.msra.mxu0 %v637_v0  ;;  %629 = vmatpush3.bf16.msra.mxu1 %v637_v0  ;;  %v646_v5 = vld [vmem:[%s775_s0 + $0x20] sm:$0xff]   ;;  %v643_v8 = vld [vmem:[%s774_s1 + $0x30] sm:$0xff]   ;;  %v644_v9 = vld [vmem:[%s774_s1 + $0x38] sm:$0xff]  }
   0x4   :  { %591 = vmatprep.subr.bf16.mxu0 %v638_v1  ;;  %622 = vmatprep.subr.bf16.mxu1 %v638_v1  ;;  %v641_v6 = vld [vmem:[%s774_s1 + $0x20] sm:$0xff]   ;;  %v647_v10 = vld [vmem:[%s775_s0 + $0x8] sm:$0xff]   ;;  %v649_v12 = vld [vmem:[%s775_s0 + $0x10] sm:$0xff]  }
   0x5   :  { %605 = vmatprep.mubr.bf16.mxu0 %v645_v4  ;;  %613 = vmatprep.mubr.bf16.mxu1 %v646_v5  ;;  %v648_v11 = vld [vmem:[%s775_s0 + $0x28] sm:$0xff]   ;;  %v650_v13 = vld [vmem:[%s775_s0 + $0x30] sm:$0xff]   ;;  %v651_v14 = vld [vmem:[%s775_s0 + $0x18] sm:$0xff]  }
   0x6   :  { %v652_v15 = vld [vmem:[%s775_s0 + $0x38] sm:$0xff]   ;;  %v492_v16 = vld [vmem:[%s776_s2] ss:$0 sm:$0xff] }
   0x7   :  { %592 = vmatpush3.bf16.msra.mxu0 %v638_v1  ;;  %630 = vmatpush3.bf16.msra.mxu1 %v638_v1  ;;  %v732_v18 = vld [vmem:[%s777_s3] ss:$0 sm:$0xff] }
   0x8   :  { %593 = vmatprep.subr.bf16.mxu0 %v639_v2  ;;  %623 = vmatprep.subr.bf16.mxu1 %v639_v2 }
   0xb   :  { %594 = vmatpush3.bf16.msra.mxu0 %v639_v2  ;;  %631 = vmatpush3.bf16.msra.mxu1 %v639_v2 }
   0xc   :  { %595 = vmatprep.subr.bf16.mxu0 %v640_v3  ;;  %624 = vmatprep.subr.bf16.mxu1 %v640_v3 }
   0xf   :  { %596 = vmatpush3.bf16.msra.mxu0 %v640_v3  ;;  %632 = vmatpush3.bf16.msra.mxu1 %v640_v3 }
  0x10   :  { %597 = vmatprep.subr.bf16.mxu0 %v641_v6  ;;  %625 = vmatprep.subr.bf16.mxu1 %v641_v6 }
  0x13   :  { %598 = vmatpush3.bf16.msra.mxu0 %v641_v6  ;;  %633 = vmatpush3.bf16.msra.mxu1 %v641_v6 }
  0x14   :  { %599 = vmatprep.subr.bf16.mxu0 %v642_v7  ;;  %626 = vmatprep.subr.bf16.mxu1 %v642_v7 }
  0x17   :  { %600 = vmatpush3.bf16.msra.mxu0 %v642_v7  ;;  %634 = vmatpush3.bf16.msra.mxu1 %v642_v7 }
  0x18   :  { %601 = vmatprep.subr.bf16.mxu0 %v643_v8  ;;  %627 = vmatprep.subr.bf16.mxu1 %v643_v8 }
  0x1b   :  { %602 = vmatpush3.bf16.msra.mxu0 %v643_v8  ;;  %635 = vmatpush3.bf16.msra.mxu1 %v643_v8 }
  0x1c   :  { %603 = vmatprep.subr.bf16.mxu0 %v644_v9  ;;  %628 = vmatprep.subr.bf16.mxu1 %v644_v9 }
  0x1f   :  { %604 = vmatpush3.bf16.msra.mxu0 %v644_v9  ;;  %636 = vmatpush3.bf16.msra.mxu1 %v644_v9 }
  0x22   :  { %606 = vmatmul.mubr.bf16.vlgmr.msra.gmra.mrb[0].mxu0 %v647_v10  ;;  %614 = vmatmul.mubr.bf16.vlgmr.msra.gmra.mrb[0].mxu1 %v648_v11 }
  0x23   :  { %609 = vmatprep.mubr.bf16.mxu0 %v649_v12  ;;  %617 = vmatprep.mubr.bf16.mxu1 %v650_v13 }
  0x2a   :  { %610 = vmatmul.mubr.bf16.gmra.mrb[4].mxu0 %v651_v14  ;;  %618 = vmatmul.mubr.bf16.gmra.mrb[4].mxu1 %v652_v15 }
  0xf5   :  { %v607_v17 = vpop.f32.mrb[0].mxu0  ;;  %v615_v19 = vpop.f32.mrb[0].mxu1 }
  0xf6   :  { %v339_v20 = vmul.f32 %v607_v17, %v492_v16  ;;  %v347_v21 = vmul.f32 %v615_v19, %v492_v16  ;;  %v216_v22 = vpop.f32.mrb[1].mxu0  ;;  %v248_v23 = vpop.f32.mrb[1].mxu1 }
  0xf7   :  { %v337_v24 = vmul.f32 %v492_v16, %v216_v22  ;;  %v345_v25 = vmul.f32 %v492_v16, %v248_v23  ;;  %v608_v26 = vpop.f32.mrb[2].mxu0  ;;  %v616_v27 = vpop.f32.mrb[2].mxu1 }
  0xf8   :  { %v362_v28 = vadd.f32 %v732_v18, %v339_v20  ;;  %v370_v29 = vadd.f32 %v732_v18, %v347_v21  ;;  %v340_v30 = vmul.f32 %v608_v26, %v492_v16  ;;  %v348_v31 = vmul.f32 %v616_v27, %v492_v16  ;;  %v219_v32 = vpop.f32.mrb[3].mxu0  ;;  %v251_v33 = vpop.f32.mrb[3].mxu1 }
  0xf9   :  { %v360_v34 = vadd.f32 %v732_v18, %v337_v24  ;;  %v368_v35 = vadd.f32 %v732_v18, %v345_v25  ;;  %v338_v36 = vmul.f32 %v492_v16, %v219_v32  ;;  %v346_v37 = vmul.f32 %v492_v16, %v251_v33 }
  0xfa   :  { %v363_v38 = vadd.f32 %v732_v18, %v340_v30  ;;  %v371_v39 = vadd.f32 %v732_v18, %v348_v31  ;;  %v378_v42 = vmax.f32 %v362_v28, 0.0  ;;  %v386_v43 = vmax.f32 %v370_v29, 0.0 }
  0xfb   :  { %v361_v40 = vadd.f32 %v732_v18, %v338_v36  ;;  %v369_v41 = vadd.f32 %v732_v18, %v346_v37  ;;  %v376_v46 = vmax.f32 %v360_v34, 0.0  ;;  %v384_v47 = vmax.f32 %v368_v35, 0.0 }
  0xfc   :  { %v379_v44 = vmax.f32 %v363_v38, 0.0  ;;  %v387_v45 = vmax.f32 %v371_v39, 0.0 }
  0xfd   :  { %v377_v48 = vmax.f32 %v361_v40, 0.0  ;;  %v385_v49 = vmax.f32 %v369_v41, 0.0  ;;  %v611_v50 = vpop.f32.mrb[4].mxu0  ;;  %v619_v51 = vpop.f32.mrb[4].mxu1 }
  0xfe   :  { %v534_v52 = vpack.c.bf16 %v379_v44, %v378_v42  ;;  %v554_v53 = vpack.c.bf16 %v387_v45, %v386_v43  ;;  %v343_v54 = vmul.f32 %v611_v50, %v492_v16  ;;  %v351_v55 = vmul.f32 %v619_v51, %v492_v16  ;;  %v232_v56 = vpop.f32.mrb[5].mxu0  ;;  %v264_v57 = vpop.f32.mrb[5].mxu1 }
  0xff   :  { %v529_v58 = vpack.c.bf16 %v377_v48, %v376_v46  ;;  %v549_v59 = vpack.c.bf16 %v385_v49, %v384_v47  ;;  %v341_v60 = vmul.f32 %v492_v16, %v232_v56  ;;  %v349_v61 = vmul.f32 %v492_v16, %v264_v57  ;;  %v612_v62 = vpop.f32.mrb[6].mxu0  ;;  %v620_v63 = vpop.f32.mrb[6].mxu1 }
 0x100   :  { %566 = vst [vmem:[%s778_s4 + $0x8] sm:$0xff] %v534_v52   ;;  %570 = vst [vmem:[%s778_s4 + $0x28] sm:$0xff] %v554_v53   ;;  %v366_v0 = vadd.f32 %v732_v18, %v343_v54  ;;  %v374_v1 = vadd.f32 %v732_v18, %v351_v55  ;;  %v344_v2 = vmul.f32 %v612_v62, %v492_v16  ;;  %v235_v4 = vpop.f32.mrb[7].mxu0  ;;  %v267_v5 = vpop.f32.mrb[7].mxu1 }
 0x101   :  { %v352_v3 = vmul.f32 %v620_v63, %v492_v16  ;;  %530 = vst [vmem:[%s778_s4] sm:$0xff] %v529_v58   ;;  %569 = vst [vmem:[%s778_s4 + $0x20] sm:$0xff] %v549_v59   ;;  %v364_v6 = vadd.f32 %v732_v18, %v341_v60  ;;  %v372_v7 = vadd.f32 %v732_v18, %v349_v61 }
 0x102   :  { %v342_v8 = vmul.f32 %v492_v16, %v235_v4  ;;  %v350_v9 = vmul.f32 %v492_v16, %v267_v5  ;;  %v367_v10 = vadd.f32 %v732_v18, %v344_v2  ;;  %v382_v14 = vmax.f32 %v366_v0, 0.0 }
 0x103   :  { %v375_v11 = vadd.f32 %v732_v18, %v352_v3  ;;  %v390_v15 = vmax.f32 %v374_v1, 0.0  ;;  %v380_v20 = vmax.f32 %v364_v6, 0.0  ;;  %v388_v21 = vmax.f32 %v372_v7, 0.0 }
 0x104   :  { %v365_v12 = vadd.f32 %v732_v18, %v342_v8  ;;  %v373_v13 = vadd.f32 %v732_v18, %v350_v9  ;;  %v383_v17 = vmax.f32 %v367_v10, 0.0 }
 0x105   :  { %v391_v19 = vmax.f32 %v375_v11, 0.0 }
 0x106   :  { %v381_v22 = vmax.f32 %v365_v12, 0.0  ;;  %v389_v23 = vmax.f32 %v373_v13, 0.0  ;;  %v544_v24 = vpack.c.bf16 %v383_v17, %v382_v14 }
 0x107   :  { %v564_v25 = vpack.c.bf16 %v391_v19, %v390_v15 }
 0x108   :  { %v539_v26 = vpack.c.bf16 %v381_v22, %v380_v20  ;;  %v559_v16 = vpack.c.bf16 %v389_v23, %v388_v21  ;;  %568 = vst [vmem:[%s778_s4 + $0x18] sm:$0xff] %v544_v24  }
 0x109   :  { %572 = vst [vmem:[%s778_s4 + $0x38] sm:$0xff] %v564_v25  }
 0x10a   :  { %567 = vst [vmem:[%s778_s4 + $0x10] sm:$0xff] %v539_v26   ;;  %571 = vst [vmem:[%s778_s4 + $0x30] sm:$0xff] %v559_v16  }

// kernel: resnet_forward.18
= control target key start
LH: loop header
LB: loop body
LE: loop exit
PB: predicated region body
PF: predicated region fallthrough
CT: control target
= control target key end

     0   :  { %s740_s1 = inlined_call_operand.vmem [shape: bf16[128,128], index: 1, kind: input, shape index: {}]   ;;  %s741_s0 = inlined_call_operand.vmem [shape: bf16[128,128], index: 0, kind: input, shape index: {}]   ;;  %s742_s2 = inlined_call_operand.vmem [shape: f32[1,128], index: 2, kind: input, shape index: {}]   ;;  %s743_s3 = inlined_call_operand.vmem [shape: f32[1,128], index: 3, kind: input, shape index: {}]   ;;  %s744_s4 = inlined_call_operand.vmem [shape: bf16[128,128], index: 4, kind: output, shape index: {}]  }
   0x1   :  { %v621_v0 = vld [vmem:[%s740_s1] sm:$0xff]   ;;  %v622_v1 = vld [vmem:[%s740_s1 + $0x8] sm:$0xff]   ;;  %v623_v2 = vld [vmem:[%s740_s1 + $0x10] sm:$0xff]  }
   0x2   :  { %573 = vmatprep.subr.bf16.mxu0 %v621_v0  ;;  %605 = vmatprep.subr.bf16.mxu1 %v621_v0  ;;  %v624_v3 = vld [vmem:[%s740_s1 + $0x18] sm:$0xff]   ;;  %v629_v4 = vld [vmem:[%s741_s0] sm:$0xff]   ;;  %v626_v7 = vld [vmem:[%s740_s1 + $0x28] sm:$0xff]  }
   0x3   :  { %574 = vmatpush3.bf16.msra.mxu0 %v621_v0  ;;  %613 = vmatpush3.bf16.msra.mxu1 %v621_v0  ;;  %v630_v5 = vld [vmem:[%s741_s0 + $0x20] sm:$0xff]   ;;  %v627_v8 = vld [vmem:[%s740_s1 + $0x30] sm:$0xff]   ;;  %v628_v9 = vld [vmem:[%s740_s1 + $0x38] sm:$0xff]  }
   0x4   :  { %575 = vmatprep.subr.bf16.mxu0 %v622_v1  ;;  %606 = vmatprep.subr.bf16.mxu1 %v622_v1  ;;  %v625_v6 = vld [vmem:[%s740_s1 + $0x20] sm:$0xff]   ;;  %v631_v10 = vld [vmem:[%s741_s0 + $0x8] sm:$0xff]   ;;  %v633_v12 = vld [vmem:[%s741_s0 + $0x10] sm:$0xff]  }
   0x5   :  { %589 = vmatprep.mubr.bf16.mxu0 %v629_v4  ;;  %597 = vmatprep.mubr.bf16.mxu1 %v630_v5  ;;  %v632_v11 = vld [vmem:[%s741_s0 + $0x28] sm:$0xff]   ;;  %v634_v13 = vld [vmem:[%s741_s0 + $0x30] sm:$0xff]   ;;  %v635_v14 = vld [vmem:[%s741_s0 + $0x18] sm:$0xff]  }
   0x6   :  { %v636_v15 = vld [vmem:[%s741_s0 + $0x38] sm:$0xff]   ;;  %v476_v16 = vld [vmem:[%s742_s2] ss:$0 sm:$0xff] }
   0x7   :  { %576 = vmatpush3.bf16.msra.mxu0 %v622_v1  ;;  %614 = vmatpush3.bf16.msra.mxu1 %v622_v1  ;;  %v477_v23 = vld [vmem:[%s743_s3] ss:$0 sm:$0xff] }
   0x8   :  { %577 = vmatprep.subr.bf16.mxu0 %v623_v2  ;;  %607 = vmatprep.subr.bf16.mxu1 %v623_v2 }
   0xb   :  { %578 = vmatpush3.bf16.msra.mxu0 %v623_v2  ;;  %615 = vmatpush3.bf16.msra.mxu1 %v623_v2 }
   0xc   :  { %579 = vmatprep.subr.bf16.mxu0 %v624_v3  ;;  %608 = vmatprep.subr.bf16.mxu1 %v624_v3 }
   0xf   :  { %580 = vmatpush3.bf16.msra.mxu0 %v624_v3  ;;  %616 = vmatpush3.bf16.msra.mxu1 %v624_v3 }
  0x10   :  { %581 = vmatprep.subr.bf16.mxu0 %v625_v6  ;;  %609 = vmatprep.subr.bf16.mxu1 %v625_v6 }
  0x13   :  { %582 = vmatpush3.bf16.msra.mxu0 %v625_v6  ;;  %617 = vmatpush3.bf16.msra.mxu1 %v625_v6 }
  0x14   :  { %583 = vmatprep.subr.bf16.mxu0 %v626_v7  ;;  %610 = vmatprep.subr.bf16.mxu1 %v626_v7 }
  0x17   :  { %584 = vmatpush3.bf16.msra.mxu0 %v626_v7  ;;  %618 = vmatpush3.bf16.msra.mxu1 %v626_v7 }
  0x18   :  { %585 = vmatprep.subr.bf16.mxu0 %v627_v8  ;;  %611 = vmatprep.subr.bf16.mxu1 %v627_v8 }
  0x1b   :  { %586 = vmatpush3.bf16.msra.mxu0 %v627_v8  ;;  %619 = vmatpush3.bf16.msra.mxu1 %v627_v8 }
  0x1c   :  { %587 = vmatprep.subr.bf16.mxu0 %v628_v9  ;;  %612 = vmatprep.subr.bf16.mxu1 %v628_v9 }
  0x1f   :  { %588 = vmatpush3.bf16.msra.mxu0 %v628_v9  ;;  %620 = vmatpush3.bf16.msra.mxu1 %v628_v9 }
  0x22   :  { %590 = vmatmul.mubr.bf16.vlgmr.msra.gmra.mrb[0].mxu0 %v631_v10  ;;  %598 = vmatmul.mubr.bf16.vlgmr.msra.gmra.mrb[0].mxu1 %v632_v11 }
  0x23   :  { %593 = vmatprep.mubr.bf16.mxu0 %v633_v12  ;;  %601 = vmatprep.mubr.bf16.mxu1 %v634_v13 }
  0x2a   :  { %594 = vmatmul.mubr.bf16.gmra.mrb[4].mxu0 %v635_v14  ;;  %602 = vmatmul.mubr.bf16.gmra.mrb[4].mxu1 %v636_v15 }
  0xf5   :  { %v591_v17 = vpop.f32.mrb[0].mxu0  ;;  %v599_v18 = vpop.f32.mrb[0].mxu1 }
  0xf6   :  { %v339_v19 = vmul.f32 %v591_v17, %v476_v16  ;;  %v347_v20 = vmul.f32 %v599_v18, %v476_v16  ;;  %v216_v21 = vpop.f32.mrb[1].mxu0  ;;  %v248_v22 = vpop.f32.mrb[1].mxu1 }
  0xf7   :  { %v337_v24 = vmul.f32 %v476_v16, %v216_v21  ;;  %v345_v25 = vmul.f32 %v476_v16, %v248_v22  ;;  %v592_v26 = vpop.f32.mrb[2].mxu0  ;;  %v600_v27 = vpop.f32.mrb[2].mxu1 }
  0xf8   :  { %v340_v28 = vmul.f32 %v592_v26, %v476_v16  ;;  %v348_v29 = vmul.f32 %v600_v27, %v476_v16  ;;  %v219_v30 = vpop.f32.mrb[3].mxu0  ;;  %v251_v31 = vpop.f32.mrb[3].mxu1  ;;  %v362_v34 = vadd.f32 %v477_v23, %v339_v19  ;;  %v370_v35 = vadd.f32 %v477_v23, %v347_v20 }
  0xf9   :  { %v338_v32 = vmul.f32 %v476_v16, %v219_v30  ;;  %v346_v33 = vmul.f32 %v476_v16, %v251_v31  ;;  %v360_v38 = vadd.f32 %v477_v23, %v337_v24  ;;  %v368_v39 = vadd.f32 %v477_v23, %v345_v25 }
  0xfa   :  { %v363_v36 = vadd.f32 %v477_v23, %v340_v28  ;;  %v371_v37 = vadd.f32 %v477_v23, %v348_v29 }
  0xfb   :  { %v361_v40 = vadd.f32 %v477_v23, %v338_v32  ;;  %v369_v41 = vadd.f32 %v477_v23, %v346_v33 }
  0xfc   :  { %v518_v42 = vpack.c.bf16 %v363_v36, %v362_v34  ;;  %v538_v43 = vpack.c.bf16 %v371_v37, %v370_v35 }
  0xfd   :  { %v513_v44 = vpack.c.bf16 %v361_v40, %v360_v38  ;;  %v533_v45 = vpack.c.bf16 %v369_v41, %v368_v39  ;;  %v595_v46 = vpop.f32.mrb[4].mxu0  ;;  %v603_v47 = vpop.f32.mrb[4].mxu1 }
  0xfe   :  { %550 = vst [vmem:[%s744_s4 + $0x8] sm:$0xff] %v518_v42   ;;  %554 = vst [vmem:[%s744_s4 + $0x28] sm:$0xff] %v538_v43   ;;  %v343_v48 = vmul.f32 %v595_v46, %v476_v16  ;;  %v351_v49 = vmul.f32 %v603_v47, %v476_v16  ;;  %v232_v50 = vpop.f32.mrb[5].mxu0  ;;  %v264_v51 = vpop.f32.mrb[5].mxu1 }
  0xff   :  { %514 = vst [vmem:[%s744_s4] sm:$0xff] %v513_v44   ;;  %553 = vst [vmem:[%s744_s4 + $0x20] sm:$0xff] %v533_v45   ;;  %v341_v52 = vmul.f32 %v476_v16, %v232_v50  ;;  %v349_v53 = vmul.f32 %v476_v16, %v264_v51  ;;  %v596_v54 = vpop.f32.mrb[6].mxu0  ;;  %v604_v55 = vpop.f32.mrb[6].mxu1 }
 0x100   :  { %v344_v56 = vmul.f32 %v596_v54, %v476_v16  ;;  %v352_v57 = vmul.f32 %v604_v55, %v476_v16  ;;  %v235_v58 = vpop.f32.mrb[7].mxu0  ;;  %v267_v59 = vpop.f32.mrb[7].mxu1  ;;  %v366_v62 = vadd.f32 %v477_v23, %v343_v48  ;;  %v374_v63 = vadd.f32 %v477_v23, %v351_v49 }
 0x101   :  { %v342_v60 = vmul.f32 %v476_v16, %v235_v58  ;;  %v350_v61 = vmul.f32 %v476_v16, %v267_v59  ;;  %v364_v2 = vadd.f32 %v477_v23, %v341_v52  ;;  %v372_v3 = vadd.f32 %v477_v23, %v349_v53 }
 0x102   :  { %v367_v0 = vadd.f32 %v477_v23, %v344_v56  ;;  %v375_v1 = vadd.f32 %v477_v23, %v352_v57 }
 0x103   :  { %v365_v4 = vadd.f32 %v477_v23, %v342_v60  ;;  %v373_v5 = vadd.f32 %v477_v23, %v350_v61 }
 0x104   :  { %v528_v6 = vpack.c.bf16 %v367_v0, %v366_v62  ;;  %v548_v7 = vpack.c.bf16 %v375_v1, %v374_v63 }
 0x105   :  { %v523_v8 = vpack.c.bf16 %v365_v4, %v364_v2  ;;  %v543_v9 = vpack.c.bf16 %v373_v5, %v372_v3 }
 0x106   :  { %552 = vst [vmem:[%s744_s4 + $0x18] sm:$0xff] %v528_v6   ;;  %556 = vst [vmem:[%s744_s4 + $0x38] sm:$0xff] %v548_v7  }
 0x107   :  { %551 = vst [vmem:[%s744_s4 + $0x10] sm:$0xff] %v523_v8   ;;  %555 = vst [vmem:[%s744_s4 + $0x30] sm:$0xff] %v543_v9  }

// kernel: resnet_forward.19
= control target key start
LH: loop header
LB: loop body
LE: loop exit
PB: predicated region body
PF: predicated region fallthrough
CT: control target
= control target key end

     0   :  { %s935_s1 = inlined_call_operand.vmem [shape: bf16[128,128], index: 1, kind: input, shape index: {}]   ;;  %s936_s0 = inlined_call_operand.vmem [shape: bf16[128,128], index: 0, kind: input, shape index: {}]   ;;  %s937_s4 = inlined_call_operand.vmem [shape: bf16[128,128], index: 4, kind: input, shape index: {}, may-alias: {4,5}]   ;;  %s938_s2 = inlined_call_operand.vmem [shape: f32[1,128], index: 2, kind: input, shape index: {}]   ;;  %s939_s3 = inlined_call_operand.vmem [shape: f32[1,128], index: 3, kind: input, shape index: {}]   ;;  %s940_s5 = inlined_call_operand.vmem [shape: bf16[128,128], index: 5, kind: output, shape index: {}, may-alias: {4,5}]  }
   0x1   :  { %v727_v0 = vld [vmem:[%s935_s1] sm:$0xff]   ;;  %v728_v1 = vld [vmem:[%s935_s1 + $0x8] sm:$0xff]   ;;  %v729_v2 = vld [vmem:[%s935_s1 + $0x10] sm:$0xff]  }
   0x2   :  { %679 = vmatprep.subr.bf16.mxu0 %v727_v0  ;;  %711 = vmatprep.subr.bf16.mxu1 %v727_v0  ;;  %v730_v3 = vld [vmem:[%s935_s1 + $0x18] sm:$0xff]   ;;  %v735_v4 = vld [vmem:[%s936_s0] sm:$0xff]   ;;  %v732_v7 = vld [vmem:[%s935_s1 + $0x28] sm:$0xff]  }
   0x3   :  { %680 = vmatpush3.bf16.msra.mxu0 %v727_v0  ;;  %719 = vmatpush3.bf16.msra.mxu1 %v727_v0  ;;  %v736_v5 = vld [vmem:[%s936_s0 + $0x20] sm:$0xff]   ;;  %v733_v8 = vld [vmem:[%s935_s1 + $0x30] sm:$0xff]   ;;  %v734_v9 = vld [vmem:[%s935_s1 + $0x38] sm:$0xff]  }
   0x4   :  { %681 = vmatprep.subr.bf16.mxu0 %v728_v1  ;;  %712 = vmatprep.subr.bf16.mxu1 %v728_v1  ;;  %v731_v6 = vld [vmem:[%s935_s1 + $0x20] sm:$0xff]   ;;  %v737_v10 = vld [vmem:[%s936_s0 + $0x8] sm:$0xff]   ;;  %v739_v12 = vld [vmem:[%s936_s0 + $0x10] sm:$0xff]  }
   0x5   :  { %695 = vmatprep.mubr.bf16.mxu0 %v735_v4  ;;  %703 = vmatprep.mubr.bf16.mxu1 %v736_v5  ;;  %v738_v11 = vld [vmem:[%s936_s0 + $0x28] sm:$0xff]   ;;  %v740_v13 = vld [vmem:[%s936_s0 + $0x30] sm:$0xff]   ;;  %v741_v14 = vld [vmem:[%s936_s0 + $0x18] sm:$0xff]  }
   0x6   :  { %v742_v15 = vld [vmem:[%s936_s0 + $0x38] sm:$0xff]   ;;  %v649_v16 = vld [vmem:[%s937_s4 + $0x8] sm:$0xff]   ;;  %v578_v18 = vld [vmem:[%s937_s4] sm:$0xff]  }
   0x7   :  { %682 = vmatpush3.bf16.msra.mxu0 %v728_v1  ;;  %720 = vmatpush3.bf16.msra.mxu1 %v728_v1  ;;  %v653_v17 = vld [vmem:[%s937_s4 + $0x28] sm:$0xff]   ;;  %v652_v19 = vld [vmem:[%s937_s4 + $0x20] sm:$0xff]   ;;  %v841_v21 = vld [vmem:[%s937_s4 + $0x18] sm:$0xff]   ;;  %v583_v23 = vunpack.c.l.bf16 %v649_v16  ;;  %v579_v25 = vunpack.c.l.bf16 %v578_v18  ;;  %v584_v32 = vunpack.c.h.bf16 %v649_v16  ;;  %v580_v34 = vunpack.c.h.bf16 %v578_v18 }
   0x8   :  { %683 = vmatprep.subr.bf16.mxu0 %v729_v2  ;;  %713 = vmatprep.subr.bf16.mxu1 %v729_v2  ;;  %v836_v20 = vld [vmem:[%s938_s2] ss:$0 sm:$0xff]  ;;  %v846_v22 = vld [vmem:[%s937_s4 + $0x38] sm:$0xff]   ;;  %v599_v24 = vunpack.c.l.bf16 %v653_v17  ;;  %v595_v26 = vunpack.c.l.bf16 %v652_v19  ;;  %v851_v27 = vld [vmem:[%s937_s4 + $0x10] sm:$0xff]   ;;  %v600_v33 = vunpack.c.h.bf16 %v653_v17  ;;  %v596_v35 = vunpack.c.h.bf16 %v652_v19 }
   0x9   :  { %v856_v28 = vld [vmem:[%s937_s4 + $0x30] sm:$0xff]   ;;  %v861_v30 = vld [vmem:[%s939_s3] ss:$0 sm:$0xff]  ;;  %v591_v40 = vunpack.c.l.bf16 %v841_v21  ;;  %v607_v41 = vunpack.c.l.bf16 %v846_v22  ;;  %v587_v46 = vunpack.c.l.bf16 %v851_v27 }
   0xa   :  { %v603_v47 = vunpack.c.l.bf16 %v856_v28 }
   0xb   :  { %684 = vmatpush3.bf16.msra.mxu0 %v729_v2  ;;  %721 = vmatpush3.bf16.msra.mxu1 %v729_v2 }
   0xc   :  { %685 = vmatprep.subr.bf16.mxu0 %v730_v3  ;;  %714 = vmatprep.subr.bf16.mxu1 %v730_v3 }
   0xf   :  { %686 = vmatpush3.bf16.msra.mxu0 %v730_v3  ;;  %722 = vmatpush3.bf16.msra.mxu1 %v730_v3 }
  0x10   :  { %687 = vmatprep.subr.bf16.mxu0 %v731_v6  ;;  %715 = vmatprep.subr.bf16.mxu1 %v731_v6 }
  0x13   :  { %688 = vmatpush3.bf16.msra.mxu0 %v731_v6  ;;  %723 = vmatpush3.bf16.msra.mxu1 %v731_v6 }
  0x14   :  { %689 = vmatprep.subr.bf16.mxu0 %v732_v7  ;;  %716 = vmatprep.subr.bf16.mxu1 %v732_v7 }
  0x17   :  { %690 = vmatpush3.bf16.msra.mxu0 %v732_v7  ;;  %724 = vmatpush3.bf16.msra.mxu1 %v732_v7 }
  0x18   :  { %691 = vmatprep.subr.bf16.mxu0 %v733_v8  ;;  %717 = vmatprep.subr.bf16.mxu1 %v733_v8 }
  0x1b   :  { %692 = vmatpush3.bf16.msra.mxu0 %v733_v8  ;;  %725 = vmatpush3.bf16.msra.mxu1 %v733_v8 }
  0x1c   :  { %693 = vmatprep.subr.bf16.mxu0 %v734_v9  ;;  %718 = vmatprep.subr.bf16.mxu1 %v734_v9 }
  0x1f   :  { %694 = vmatpush3.bf16.msra.mxu0 %v734_v9  ;;  %726 = vmatpush3.bf16.msra.mxu1 %v734_v9 }
  0x22   :  { %696 = vmatmul.mubr.bf16.vlgmr.msra.gmra.mrb[0].mxu0 %v737_v10  ;;  %704 = vmatmul.mubr.bf16.vlgmr.msra.gmra.mrb[0].mxu1 %v738_v11 }
  0x23   :  { %699 = vmatprep.mubr.bf16.mxu0 %v739_v12  ;;  %707 = vmatprep.mubr.bf16.mxu1 %v740_v13 }
  0x2a   :  { %700 = vmatmul.mubr.bf16.gmra.mrb[4].mxu0 %v741_v14  ;;  %708 = vmatmul.mubr.bf16.gmra.mrb[4].mxu1 %v742_v15 }
  0xf5   :  { %v697_v29 = vpop.f32.mrb[0].mxu0  ;;  %v705_v31 = vpop.f32.mrb[0].mxu1 }
  0xf6   :  { %v342_v36 = vmul.f32 %v697_v29, %v836_v20  ;;  %v350_v37 = vmul.f32 %v705_v31, %v836_v20  ;;  %v219_v38 = vpop.f32.mrb[1].mxu0  ;;  %v251_v39 = vpop.f32.mrb[1].mxu1 }
  0xf7   :  { %v340_v42 = vmul.f32 %v836_v20, %v219_v38  ;;  %v348_v43 = vmul.f32 %v836_v20, %v251_v39  ;;  %v698_v44 = vpop.f32.mrb[2].mxu0  ;;  %v706_v45 = vpop.f32.mrb[2].mxu1 }
  0xf8   :  { %v365_v48 = vadd.f32 %v861_v30, %v342_v36  ;;  %v373_v49 = vadd.f32 %v861_v30, %v350_v37  ;;  %v343_v50 = vmul.f32 %v698_v44, %v836_v20  ;;  %v351_v51 = vmul.f32 %v706_v45, %v836_v20  ;;  %v222_v52 = vpop.f32.mrb[3].mxu0  ;;  %v254_v53 = vpop.f32.mrb[3].mxu1 }
  0xf9   :  { %v363_v54 = vadd.f32 %v861_v30, %v340_v42  ;;  %v371_v55 = vadd.f32 %v861_v30, %v348_v43  ;;  %v341_v56 = vmul.f32 %v836_v20, %v222_v52  ;;  %v349_v57 = vmul.f32 %v836_v20, %v254_v53 }
  0xfa   :  { %v413_v58 = vadd.f32 %v583_v23, %v365_v48  ;;  %v421_v59 = vadd.f32 %v599_v24, %v373_v49  ;;  %v366_v60 = vadd.f32 %v861_v30, %v343_v50  ;;  %v374_v61 = vadd.f32 %v861_v30, %v351_v51 }
  0xfb   :  { %v411_v62 = vadd.f32 %v579_v25, %v363_v54  ;;  %v419_v63 = vadd.f32 %v595_v26, %v371_v55  ;;  %v364_v0 = vadd.f32 %v861_v30, %v341_v56  ;;  %v372_v1 = vadd.f32 %v861_v30, %v349_v57 }
  0xfc   :  { %v429_v2 = vmax.f32 %v413_v58, 0.0  ;;  %v437_v3 = vmax.f32 %v421_v59, 0.0  ;;  %v414_v4 = vadd.f32 %v584_v32, %v366_v60  ;;  %v422_v5 = vadd.f32 %v600_v33, %v374_v61 }
  0xfd   :  { %v427_v6 = vmax.f32 %v411_v62, 0.0  ;;  %v435_v7 = vmax.f32 %v419_v63, 0.0  ;;  %v412_v8 = vadd.f32 %v580_v34, %v364_v0  ;;  %v420_v9 = vadd.f32 %v596_v35, %v372_v1  ;;  %v701_v10 = vpop.f32.mrb[4].mxu0  ;;  %v709_v11 = vpop.f32.mrb[4].mxu1 }
  0xfe   :  { %v430_v12 = vmax.f32 %v414_v4, 0.0  ;;  %v438_v13 = vmax.f32 %v422_v5, 0.0  ;;  %v346_v14 = vmul.f32 %v701_v10, %v836_v20  ;;  %v354_v15 = vmul.f32 %v709_v11, %v836_v20  ;;  %v235_v16 = vpop.f32.mrb[5].mxu0  ;;  %v267_v17 = vpop.f32.mrb[5].mxu1 }
  0xff   :  { %v428_v18 = vmax.f32 %v412_v8, 0.0  ;;  %v436_v19 = vmax.f32 %v420_v9, 0.0  ;;  %v344_v23 = vmul.f32 %v836_v20, %v235_v16  ;;  %v352_v24 = vmul.f32 %v836_v20, %v267_v17  ;;  %v702_v25 = vpop.f32.mrb[6].mxu0  ;;  %v710_v26 = vpop.f32.mrb[6].mxu1 }
 0x100   :  { %v617_v29 = vpack.c.bf16 %v430_v12, %v429_v2  ;;  %v637_v31 = vpack.c.bf16 %v438_v13, %v437_v3  ;;  %v369_v32 = vadd.f32 %v861_v30, %v346_v14  ;;  %v377_v33 = vadd.f32 %v861_v30, %v354_v15  ;;  %v238_v34 = vpop.f32.mrb[7].mxu0  ;;  %v270_v35 = vpop.f32.mrb[7].mxu1 }
 0x101   :  { %v612_v36 = vpack.c.bf16 %v428_v18, %v427_v6  ;;  %v632_v37 = vpack.c.bf16 %v436_v19, %v435_v7  ;;  %v367_v38 = vadd.f32 %v861_v30, %v344_v23  ;;  %v375_v39 = vadd.f32 %v861_v30, %v352_v24 }
 0x102   :  { %656 = vst [vmem:[%s940_s5 + $0x8] sm:$0xff] %v617_v29   ;;  %660 = vst [vmem:[%s940_s5 + $0x28] sm:$0xff] %v637_v31   ;;  %v347_v42 = vmul.f32 %v702_v25, %v836_v20  ;;  %v592_v43 = vunpack.c.h.bf16 %v841_v21  ;;  %v355_v44 = vmul.f32 %v710_v26, %v836_v20  ;;  %v608_v45 = vunpack.c.h.bf16 %v846_v22 }
 0x103   :  { %613 = vst [vmem:[%s940_s5] sm:$0xff] %v612_v36   ;;  %659 = vst [vmem:[%s940_s5 + $0x20] sm:$0xff] %v632_v37   ;;  %v345_v48 = vmul.f32 %v836_v20, %v238_v34  ;;  %v588_v49 = vunpack.c.h.bf16 %v851_v27  ;;  %v353_v50 = vmul.f32 %v836_v20, %v270_v35  ;;  %v604_v51 = vunpack.c.h.bf16 %v856_v28 }
 0x104   :  { %v417_v52 = vadd.f32 %v591_v40, %v369_v32  ;;  %v425_v53 = vadd.f32 %v607_v41, %v377_v33  ;;  %v370_v54 = vadd.f32 %v861_v30, %v347_v42  ;;  %v378_v55 = vadd.f32 %v861_v30, %v355_v44 }
 0x105   :  { %v415_v56 = vadd.f32 %v587_v46, %v367_v38  ;;  %v423_v57 = vadd.f32 %v603_v47, %v375_v39  ;;  %v368_v20 = vadd.f32 %v861_v30, %v345_v48  ;;  %v376_v58 = vadd.f32 %v861_v30, %v353_v50 }
 0x106   :  { %v418_v59 = vadd.f32 %v592_v43, %v370_v54  ;;  %v426_v21 = vadd.f32 %v608_v45, %v378_v55  ;;  %v433_v22 = vmax.f32 %v417_v52, 0.0  ;;  %v441_v41 = vmax.f32 %v425_v53, 0.0 }
 0x107   :  { %v416_v40 = vadd.f32 %v588_v49, %v368_v20  ;;  %v424_v60 = vadd.f32 %v604_v51, %v376_v58  ;;  %v431_v63 = vmax.f32 %v415_v56, 0.0  ;;  %v439_v0 = vmax.f32 %v423_v57, 0.0 }
 0x108   :  { %v434_v61 = vmax.f32 %v418_v59, 0.0  ;;  %v442_v62 = vmax.f32 %v426_v21, 0.0 }
 0x109   :  { %v432_v1 = vmax.f32 %v416_v40, 0.0  ;;  %v440_v27 = vmax.f32 %v424_v60, 0.0 }
 0x10a   :  { %v627_v46 = vpack.c.bf16 %v434_v61, %v433_v22  ;;  %v647_v2 = vpack.c.bf16 %v442_v62, %v441_v41 }
 0x10b   :  { %v622_v28 = vpack.c.bf16 %v432_v1, %v431_v63  ;;  %v642_v47 = vpack.c.bf16 %v440_v27, %v439_v0 }
 0x10c   :  { %658 = vst [vmem:[%s940_s5 + $0x18] sm:$0xff] %v627_v46   ;;  %662 = vst [vmem:[%s940_s5 + $0x38] sm:$0xff] %v647_v2  }
 0x10d   :  { %657 = vst [vmem:[%s940_s5 + $0x10] sm:$0xff] %v622_v28   ;;  %661 = vst [vmem:[%s940_s5 + $0x30] sm:$0xff] %v642_v47  }

// kernel: resnet_forward.20
= control target key start
LH: loop header
LB: loop body
LE: loop exit
PB: predicated region body
PF: predicated region fallthrough
CT: control target
= control target key end

     0   :  { %s362_s1 = inlined_call_operand.vmem [shape: bf16[128,128], index: 1, kind: input, shape index: {}]   ;;  %s363_s0 = inlined_call_operand.vmem [shape: bf16[32,128], index: 0, kind: input, shape index: {}]   ;;  %s364_s2 = inlined_call_operand.vmem [shape: f32[1,128], index: 2, kind: input, shape index: {}]   ;;  %s365_s3 = inlined_call_operand.vmem [shape: f32[1,128], index: 3, kind: input, shape index: {}]   ;;  %s366_s4 = inlined_call_operand.vmem [shape: bf16[32,128], index: 4, kind: output, shape index: {}]  }
   0x1   :  { %v285_v0 = vld [vmem:[%s362_s1] sm:$0xff]   ;;  %v286_v1 = vld [vmem:[%s362_s1 + $0x8] sm:$0xff]   ;;  %v287_v2 = vld [vmem:[%s362_s1 + $0x10] sm:$0xff]  }
   0x2   :  { %265 = vmatprep.subr.bf16.mxu0 %v285_v0  ;;  %v288_v3 = vld [vmem:[%s362_s1 + $0x18] sm:$0xff]   ;;  %v293_v4 = vld [vmem:[%s363_s0] sm:$0xff]   ;;  %v290_v6 = vld [vmem:[%s362_s1 + $0x28] sm:$0xff]  }
   0x3   :  { %266 = vmatpush3.bf16.msra.mxu0 %v285_v0  ;;  %281 = vmatprep.mubr.bf16.mxu0 %v293_v4  ;;  %v289_v5 = vld [vmem:[%s362_s1 + $0x20] sm:$0xff]   ;;  %v291_v7 = vld [vmem:[%s362_s1 + $0x30] sm:$0xff]   ;;  %v292_v8 = vld [vmem:[%s362_s1 + $0x38] sm:$0xff]  }
   0x4   :  { %267 = vmatprep.subr.bf16.mxu0 %v286_v1  ;;  %v294_v9 = vld [vmem:[%s363_s0 + $0x8] sm:$0xff]   ;;  %v234_v10 = vld [vmem:[%s364_s2] ss:$0 sm:$0xff] }
   0x5   :  { %v235_v12 = vld [vmem:[%s365_s3] ss:$0 sm:$0xff] }
   0x7   :  { %268 = vmatpush3.bf16.msra.mxu0 %v286_v1 }
   0x8   :  { %269 = vmatprep.subr.bf16.mxu0 %v287_v2 }
   0xb   :  { %270 = vmatpush3.bf16.msra.mxu0 %v287_v2 }
   0xc   :  { %271 = vmatprep.subr.bf16.mxu0 %v288_v3 }
   0xf   :  { %272 = vmatpush3.bf16.msra.mxu0 %v288_v3 }
  0x10   :  { %273 = vmatprep.subr.bf16.mxu0 %v289_v5 }
  0x13   :  { %274 = vmatpush3.bf16.msra.mxu0 %v289_v5 }
  0x14   :  { %275 = vmatprep.subr.bf16.mxu0 %v290_v6 }
  0x17   :  { %276 = vmatpush3.bf16.msra.mxu0 %v290_v6 }
  0x18   :  { %277 = vmatprep.subr.bf16.mxu0 %v291_v7 }
  0x1b   :  { %278 = vmatpush3.bf16.msra.mxu0 %v291_v7 }
  0x1c   :  { %279 = vmatprep.subr.bf16.mxu0 %v292_v8 }
  0x1f   :  { %280 = vmatpush3.bf16.msra.mxu0 %v292_v8 }
  0x22   :  { %282 = vmatmul.mubr.bf16.vlgmr.msra.gmra.mrb[0].mxu0 %v294_v9 }
  0xf5   :  { %v283_v11 = vpop.f32.mrb[0].mxu0 }
  0xf6   :  { %v183_v13 = vmul.f32 %v283_v11, %v234_v10  ;;  %v144_v14 = vpop.f32.mrb[1].mxu0 }
  0xf7   :  { %v181_v15 = vmul.f32 %v234_v10, %v144_v14  ;;  %v284_v16 = vpop.f32.mrb[2].mxu0 }
  0xf8   :  { %v194_v17 = vadd.f32 %v235_v12, %v183_v13  ;;  %v184_v18 = vmul.f32 %v284_v16, %v234_v10  ;;  %v147_v19 = vpop.f32.mrb[3].mxu0 }
  0xf9   :  { %v192_v20 = vadd.f32 %v235_v12, %v181_v15  ;;  %v182_v21 = vmul.f32 %v234_v10, %v147_v19 }
  0xfa   :  { %v195_v22 = vadd.f32 %v235_v12, %v184_v18  ;;  %v198_v24 = vmax.f32 %v194_v17, 0.0 }
  0xfb   :  { %v193_v23 = vadd.f32 %v235_v12, %v182_v21  ;;  %v196_v26 = vmax.f32 %v192_v20, 0.0 }
  0xfc   :  { %v199_v25 = vmax.f32 %v195_v22, 0.0 }
  0xfd   :  { %v197_v27 = vmax.f32 %v193_v23, 0.0 }
  0xfe   :  { %v252_v28 = vpack.c.bf16 %v199_v25, %v198_v24 }
  0xff   :  { %v247_v29 = vpack.c.bf16 %v197_v27, %v196_v26 }
 0x100   :  { %254 = vst [vmem:[%s366_s4 + $0x8] sm:$0xff] %v252_v28  }
 0x101   :  { %248 = vst [vmem:[%s366_s4] sm:$0xff] %v247_v29  }

// kernel: resnet_forward.21
= control target key start
LH: loop header
LB: loop body
LE: loop exit
PB: predicated region body
PF: predicated region fallthrough
CT: control target
= control target key end

     0   :  { %s358_s1 = inlined_call_operand.vmem [shape: bf16[128,128], index: 1, kind: input, shape index: {}]   ;;  %s359_s0 = inlined_call_operand.vmem [shape: bf16[32,128], index: 0, kind: input, shape index: {}]   ;;  %s360_s2 = inlined_call_operand.vmem [shape: f32[1,128], index: 2, kind: input, shape index: {}]   ;;  %s361_s3 = inlined_call_operand.vmem [shape: f32[1,128], index: 3, kind: input, shape index: {}]   ;;  %s362_s4 = inlined_call_operand.vmem [shape: bf16[32,128], index: 4, kind: output, shape index: {}]  }
   0x1   :  { %v281_v0 = vld [vmem:[%s358_s1] sm:$0xff]   ;;  %v282_v1 = vld [vmem:[%s358_s1 + $0x8] sm:$0xff]   ;;  %v283_v2 = vld [vmem:[%s358_s1 + $0x10] sm:$0xff]  }
   0x2   :  { %261 = vmatprep.subr.bf16.mxu0 %v281_v0  ;;  %v284_v3 = vld [vmem:[%s358_s1 + $0x18] sm:$0xff]   ;;  %v289_v4 = vld [vmem:[%s359_s0] sm:$0xff]   ;;  %v286_v6 = vld [vmem:[%s358_s1 + $0x28] sm:$0xff]  }
   0x3   :  { %262 = vmatpush3.bf16.msra.mxu0 %v281_v0  ;;  %277 = vmatprep.mubr.bf16.mxu0 %v289_v4  ;;  %v285_v5 = vld [vmem:[%s358_s1 + $0x20] sm:$0xff]   ;;  %v287_v7 = vld [vmem:[%s358_s1 + $0x30] sm:$0xff]   ;;  %v288_v8 = vld [vmem:[%s358_s1 + $0x38] sm:$0xff]  }
   0x4   :  { %263 = vmatprep.subr.bf16.mxu0 %v282_v1  ;;  %v290_v9 = vld [vmem:[%s359_s0 + $0x8] sm:$0xff]   ;;  %v230_v10 = vld [vmem:[%s360_s2] ss:$0 sm:$0xff] }
   0x5   :  { %v231_v14 = vld [vmem:[%s361_s3] ss:$0 sm:$0xff] }
   0x7   :  { %264 = vmatpush3.bf16.msra.mxu0 %v282_v1 }
   0x8   :  { %265 = vmatprep.subr.bf16.mxu0 %v283_v2 }
   0xb   :  { %266 = vmatpush3.bf16.msra.mxu0 %v283_v2 }
   0xc   :  { %267 = vmatprep.subr.bf16.mxu0 %v284_v3 }
   0xf   :  { %268 = vmatpush3.bf16.msra.mxu0 %v284_v3 }
  0x10   :  { %269 = vmatprep.subr.bf16.mxu0 %v285_v5 }
  0x13   :  { %270 = vmatpush3.bf16.msra.mxu0 %v285_v5 }
  0x14   :  { %271 = vmatprep.subr.bf16.mxu0 %v286_v6 }
  0x17   :  { %272 = vmatpush3.bf16.msra.mxu0 %v286_v6 }
  0x18   :  { %273 = vmatprep.subr.bf16.mxu0 %v287_v7 }
  0x1b   :  { %274 = vmatpush3.bf16.msra.mxu0 %v287_v7 }
  0x1c   :  { %275 = vmatprep.subr.bf16.mxu0 %v288_v8 }
  0x1f   :  { %276 = vmatpush3.bf16.msra.mxu0 %v288_v8 }
  0x22   :  { %278 = vmatmul.mubr.bf16.vlgmr.msra.gmra.mrb[0].mxu0 %v290_v9 }
  0xf5   :  { %v279_v11 = vpop.f32.mrb[0].mxu0 }
  0xf6   :  { %v183_v12 = vmul.f32 %v279_v11, %v230_v10  ;;  %v144_v13 = vpop.f32.mrb[1].mxu0 }
  0xf7   :  { %v181_v15 = vmul.f32 %v230_v10, %v144_v13  ;;  %v280_v16 = vpop.f32.mrb[2].mxu0 }
  0xf8   :  { %v184_v17 = vmul.f32 %v280_v16, %v230_v10  ;;  %v147_v18 = vpop.f32.mrb[3].mxu0  ;;  %v194_v20 = vadd.f32 %v231_v14, %v183_v12 }
  0xf9   :  { %v182_v19 = vmul.f32 %v230_v10, %v147_v18  ;;  %v192_v22 = vadd.f32 %v231_v14, %v181_v15 }
  0xfa   :  { %v195_v21 = vadd.f32 %v231_v14, %v184_v17 }
  0xfb   :  { %v193_v23 = vadd.f32 %v231_v14, %v182_v19 }
  0xfc   :  { %v248_v24 = vpack.c.bf16 %v195_v21, %v194_v20 }
  0xfd   :  { %v243_v25 = vpack.c.bf16 %v193_v23, %v192_v22 }
  0xfe   :  { %250 = vst [vmem:[%s362_s4 + $0x8] sm:$0xff] %v248_v24  }
  0xff   :  { %244 = vst [vmem:[%s362_s4] sm:$0xff] %v243_v25  }

// kernel: resnet_forward.22
= control target key start
LH: loop header
LB: loop body
LE: loop exit
PB: predicated region body
PF: predicated region fallthrough
CT: control target
= control target key end

     0   :  { %s535_s1 = inlined_call_operand.vmem [shape: bf16[256,128], index: 1, kind: input, shape index: {}]   ;;  %s536_s0 = inlined_call_operand.vmem [shape: bf16[32,256], index: 0, kind: input, shape index: {}]   ;;  %s537_s4 = inlined_call_operand.vmem [shape: bf16[32,128], index: 4, kind: input, shape index: {}, may-alias: {4,5}]   ;;  %s538_s2 = inlined_call_operand.vmem [shape: f32[1,128], index: 2, kind: input, shape index: {}]   ;;  %s539_s3 = inlined_call_operand.vmem [shape: f32[1,128], index: 3, kind: input, shape index: {}]   ;;  %s540_s5 = inlined_call_operand.vmem [shape: bf16[32,128], index: 5, kind: output, shape index: {}, may-alias: {4,5}]  }
   0x1   :  { %v405_v0 = vld [vmem:[%s535_s1 + $0x40] sm:$0xff]   ;;  %v407_v2 = vld [vmem:[%s535_s1 + $0x48] sm:$0xff]   ;;  %v409_v4 = vld [vmem:[%s535_s1 + $0x50] sm:$0xff]  }
   0x2   :  { %v406_v1 = vld [vmem:[%s535_s1] sm:$0xff]   ;;  %361 = vmatprep.subr.bf16.mxu0 %v405_v0  ;;  %389 = vmatprep.subr.bf16.mxu1 %v405_v0  ;;  %v408_v3 = vld [vmem:[%s535_s1 + $0x8] sm:$0xff]   ;;  %v410_v5 = vld [vmem:[%s535_s1 + $0x10] sm:$0xff]  }
   0x3   :  { %362 = vmatpush3.bf16.msra.mxu0 %v406_v1  ;;  %397 = vmatpush3.bf16.msra.mxu1 %v406_v1  ;;  %v411_v6 = vld [vmem:[%s535_s1 + $0x58] sm:$0xff]   ;;  %v413_v8 = vld [vmem:[%s535_s1 + $0x60] sm:$0xff]   ;;  %v415_v10 = vld [vmem:[%s535_s1 + $0x68] sm:$0xff]  }
   0x4   :  { %363 = vmatprep.subr.bf16.mxu0 %v407_v2  ;;  %390 = vmatprep.subr.bf16.mxu1 %v407_v2  ;;  %v412_v7 = vld [vmem:[%s535_s1 + $0x18] sm:$0xff]   ;;  %v414_v9 = vld [vmem:[%s535_s1 + $0x20] sm:$0xff]   ;;  %v416_v13 = vld [vmem:[%s535_s1 + $0x28] sm:$0xff]  }
   0x5   :  { %v423_v11 = vld [vmem:[%s536_s0 + $0x4] ss:$8 sps:$4 sm:$0xff]   ;;  %v426_v12 = vld [vmem:[%s536_s0 + $0x14] ss:$8 sps:$4 sm:$0xff]   ;;  %v421_v18 = vld [vmem:[%s536_s0] ss:$8 sps:$4 sm:$0xff]  }
   0x6   :  { %v417_v14 = vld [vmem:[%s535_s1 + $0x70] sm:$0xff]   ;;  %217 = vmatprep.mubr.bf16.mxu0 %v423_v11  ;;  %225 = vmatprep.mubr.bf16.mxu1 %v426_v12  ;;  %v419_v16 = vld [vmem:[%s535_s1 + $0x78] sm:$0xff]   ;;  %v342_v22 = vld [vmem:[%s537_s4] sm:$0xff]  }
   0x7   :  { %364 = vmatpush3.bf16.msra.mxu0 %v408_v3  ;;  %398 = vmatpush3.bf16.msra.mxu1 %v408_v3  ;;  %v418_v15 = vld [vmem:[%s535_s1 + $0x30] sm:$0xff]   ;;  %v420_v17 = vld [vmem:[%s535_s1 + $0x38] sm:$0xff]   ;;  %v359_v23 = vld [vmem:[%s537_s4 + $0x8] sm:$0xff]   ;;  %v343_v32 = vunpack.c.l.bf16 %v342_v22  ;;  %v344_v40 = vunpack.c.h.bf16 %v342_v22 }
   0x8   :  { %365 = vmatprep.subr.bf16.mxu0 %v409_v4  ;;  %391 = vmatprep.subr.bf16.mxu1 %v409_v4  ;;  %v424_v19 = vld [vmem:[%s536_s0 + $0x10] ss:$8 sps:$4 sm:$0xff]   ;;  %v331_v25 = vld [vmem:[%s538_s2] ss:$0 sm:$0xff]  ;;  %v347_v33 = vunpack.c.l.bf16 %v359_v23  ;;  %v348_v41 = vunpack.c.h.bf16 %v359_v23 }
   0x9   :  { %v332_v31 = vld [vmem:[%s539_s3] ss:$0 sm:$0xff] }
   0xb   :  { %366 = vmatpush3.bf16.msra.mxu0 %v410_v5  ;;  %399 = vmatpush3.bf16.msra.mxu1 %v410_v5 }
   0xc   :  { %367 = vmatprep.subr.bf16.mxu0 %v411_v6  ;;  %392 = vmatprep.subr.bf16.mxu1 %v411_v6 }
   0xf   :  { %368 = vmatpush3.bf16.msra.mxu0 %v412_v7  ;;  %400 = vmatpush3.bf16.msra.mxu1 %v412_v7 }
  0x10   :  { %369 = vmatprep.subr.bf16.mxu0 %v413_v8  ;;  %393 = vmatprep.subr.bf16.mxu1 %v413_v8 }
  0x13   :  { %370 = vmatpush3.bf16.msra.mxu0 %v414_v9  ;;  %401 = vmatpush3.bf16.msra.mxu1 %v414_v9 }
  0x14   :  { %371 = vmatprep.subr.bf16.mxu0 %v415_v10  ;;  %394 = vmatprep.subr.bf16.mxu1 %v415_v10 }
  0x17   :  { %372 = vmatpush3.bf16.msra.mxu0 %v416_v13  ;;  %402 = vmatpush3.bf16.msra.mxu1 %v416_v13 }
  0x18   :  { %373 = vmatprep.subr.bf16.mxu0 %v417_v14  ;;  %395 = vmatprep.subr.bf16.mxu1 %v417_v14 }
  0x1b   :  { %374 = vmatpush3.bf16.msra.mxu0 %v418_v15  ;;  %403 = vmatpush3.bf16.msra.mxu1 %v418_v15 }
  0x1c   :  { %375 = vmatprep.subr.bf16.mxu0 %v419_v16  ;;  %396 = vmatprep.subr.bf16.mxu1 %v419_v16 }
  0x1f   :  { %376 = vmatpush3.bf16.msra.mxu0 %v420_v17  ;;  %404 = vmatpush3.bf16.msra.mxu1 %v420_v17 }
  0x22   :  { %218 = vmatmul.mubr.bf16.vlgmr.msra.gmra.mrb[0].mxu0 %v421_v18  ;;  %226 = vmatmul.mubr.bf16.vlgmr.msra.gmra.mrb[0].mxu1 %v424_v19 }
  0xf5   :  { %v377_v20 = vpop.f32.mrb[0].mxu0  ;;  %v383_v21 = vpop.f32.mrb[0].mxu1 }
  0xf6   :  { %v378_v24 = vpop.f32.mrb[1].mxu0  ;;  %v384_v26 = vpop.f32.mrb[1].mxu1 }
  0xf7   :  { %v379_v27 = vadd.f32 %v378_v24, %v377_v20  ;;  %v385_v28 = vadd.f32 %v384_v26, %v383_v21  ;;  %v380_v29 = vpop.f32.mrb[2].mxu0  ;;  %v386_v30 = vpop.f32.mrb[2].mxu1 }
  0xf8   :  { %v381_v34 = vpop.f32.mrb[3].mxu0  ;;  %v387_v35 = vpop.f32.mrb[3].mxu1 }
  0xf9   :  { %v256_v36 = vmul.f32 %v379_v27, %v331_v25  ;;  %v258_v37 = vmul.f32 %v385_v28, %v331_v25  ;;  %v382_v38 = vadd.f32 %v381_v34, %v380_v29  ;;  %v388_v39 = vadd.f32 %v387_v35, %v386_v30 }
  0xfb   :  { %v267_v42 = vadd.f32 %v332_v31, %v256_v36  ;;  %v269_v43 = vadd.f32 %v332_v31, %v258_v37  ;;  %v257_v44 = vmul.f32 %v382_v38, %v331_v25  ;;  %v259_v45 = vmul.f32 %v388_v39, %v331_v25 }
  0xfd   :  { %v279_v46 = vadd.f32 %v343_v32, %v267_v42  ;;  %v281_v47 = vadd.f32 %v347_v33, %v269_v43  ;;  %v268_v48 = vadd.f32 %v332_v31, %v257_v44  ;;  %v270_v49 = vadd.f32 %v332_v31, %v259_v45 }
  0xff   :  { %v280_v50 = vadd.f32 %v344_v40, %v268_v48  ;;  %v282_v51 = vadd.f32 %v348_v41, %v270_v49  ;;  %v283_v52 = vmax.f32 %v279_v46, 0.0  ;;  %v285_v53 = vmax.f32 %v281_v47, 0.0 }
 0x101   :  { %v284_v54 = vmax.f32 %v280_v50, 0.0  ;;  %v286_v55 = vmax.f32 %v282_v51, 0.0 }
 0x103   :  { %v352_v56 = vpack.c.bf16 %v284_v54, %v283_v52  ;;  %v357_v57 = vpack.c.bf16 %v286_v55, %v285_v53 }
 0x105   :  { %353 = vst [vmem:[%s540_s5] sm:$0xff] %v352_v56   ;;  %360 = vst [vmem:[%s540_s5 + $0x8] sm:$0xff] %v357_v57  }

// kernel: resnet_forward.23
= control target key start
LH: loop header
LB: loop body
LE: loop exit
PB: predicated region body
PF: predicated region fallthrough
CT: control target
= control target key end

     0   :  { %s374_s1 = inlined_call_operand.vmem [shape: bf16[256,128], index: 1, kind: input, shape index: {}]   ;;  %s375_s0 = inlined_call_operand.vmem [shape: bf16[8,256], index: 0, kind: input, shape index: {}]   ;;  %s376_s2 = inlined_call_operand.vmem [shape: f32[1,128], index: 2, kind: input, shape index: {}]   ;;  %s377_s3 = inlined_call_operand.vmem [shape: f32[1,128], index: 3, kind: input, shape index: {}]   ;;  %s378_s4 = inlined_call_operand.vmem [shape: bf16[8,128], index: 4, kind: output, shape index: {}]  }
   0x1   :  { %v271_v0 = vld [vmem:[%s374_s1 + $0x40] sm:$0xff]   ;;  %v273_v2 = vld [vmem:[%s374_s1 + $0x48] sm:$0xff]   ;;  %v275_v4 = vld [vmem:[%s374_s1 + $0x50] sm:$0xff]  }
   0x2   :  { %v272_v1 = vld [vmem:[%s374_s1] sm:$0xff]   ;;  %249 = vmatprep.subr.bf16.mxu0 %v271_v0  ;;  %v274_v3 = vld [vmem:[%s374_s1 + $0x8] sm:$0xff]   ;;  %v276_v5 = vld [vmem:[%s374_s1 + $0x10] sm:$0xff]  }
   0x3   :  { %250 = vmatpush3.bf16.msra.mxu0 %v272_v1  ;;  %v277_v6 = vld [vmem:[%s374_s1 + $0x58] sm:$0xff]   ;;  %v279_v8 = vld [vmem:[%s374_s1 + $0x60] sm:$0xff]   ;;  %v281_v10 = vld [vmem:[%s374_s1 + $0x68] sm:$0xff]  }
   0x4   :  { %251 = vmatprep.subr.bf16.mxu0 %v273_v2  ;;  %v278_v7 = vld [vmem:[%s374_s1 + $0x18] sm:$0xff]   ;;  %v280_v9 = vld [vmem:[%s374_s1 + $0x20] sm:$0xff]   ;;  %v282_v13 = vld [vmem:[%s374_s1 + $0x28] sm:$0xff]  }
   0x5   :  { %v24_v11 = vld [vmem:[%s375_s0] sm:$0xff]  ;;  %v283_v14 = vld [vmem:[%s374_s1 + $0x70] sm:$0xff]   ;;  %v285_v16 = vld [vmem:[%s374_s1 + $0x78] sm:$0xff]  }
   0x6   :  { %v230_v12 = vcombine.high %v24_v11, %v24_v11  ;;  %v284_v15 = vld [vmem:[%s374_s1 + $0x30] sm:$0xff]   ;;  %v286_v17 = vld [vmem:[%s374_s1 + $0x38] sm:$0xff]   ;;  %v229_v18 = vcombine.low %v24_v11, %v24_v11  ;;  %v247_v21 = vld [vmem:[%s376_s2] ss:$0 sm:$0xff] }
   0x7   :  { %252 = vmatpush3.bf16.msra.mxu0 %v274_v3  ;;  %v248_v24 = vld [vmem:[%s377_s3] ss:$0 sm:$0xff] }
   0x8   :  { %253 = vmatprep.subr.bf16.mxu0 %v275_v4  ;;  %192 = vmatprep.mubr.bf16.mxu0 %v230_v12 }
   0xb   :  { %254 = vmatpush3.bf16.msra.mxu0 %v276_v5 }
   0xc   :  { %255 = vmatprep.subr.bf16.mxu0 %v277_v6 }
   0xf   :  { %256 = vmatpush3.bf16.msra.mxu0 %v278_v7 }
  0x10   :  { %257 = vmatprep.subr.bf16.mxu0 %v279_v8 }
  0x13   :  { %258 = vmatpush3.bf16.msra.mxu0 %v280_v9 }
  0x14   :  { %259 = vmatprep.subr.bf16.mxu0 %v281_v10 }
  0x17   :  { %260 = vmatpush3.bf16.msra.mxu0 %v282_v13 }
  0x18   :  { %261 = vmatprep.subr.bf16.mxu0 %v283_v14 }
  0x1b   :  { %262 = vmatpush3.bf16.msra.mxu0 %v284_v15 }
  0x1c   :  { %263 = vmatprep.subr.bf16.mxu0 %v285_v16 }
  0x1f   :  { %264 = vmatpush3.bf16.msra.mxu0 %v286_v17 }
  0x22   :  { %193 = vmatmul.mubr.bf16.vlgmr.msra.gmra.mrb[0].mxu0 %v229_v18 }
  0xf5   :  { %v265_v19 = vpop.f32.mrb[0].mxu0 }
  0xf6   :  { %v266_v20 = vpop.f32.mrb[1].mxu0 }
  0xf7   :  { %v267_v22 = vadd.f32 %v266_v20, %v265_v19  ;;  %v268_v23 = vpop.f32.mrb[2].mxu0 }
  0xf8   :  { %v269_v25 = vpop.f32.mrb[3].mxu0 }
  0xf9   :  { %v213_v26 = vmul.f32 %v267_v22, %v247_v21 }
  0xfb   :  { %v221_v27 = vadd.f32 %v248_v24, %v213_v26 }
  0xfd   :  { %v222_v28 = vmax.f32 %v221_v27, 0.0 }
  0xff   :  { %v223_v29 = vpack.c.bf16 %v222_v28, %v222_v28 }
 0x101   :  { %224 = vst [vmem:[%s378_s4] sm:$0xf] %v223_v29 }

// kernel: resnet_forward.25
= control target key start
LH: loop header
LB: loop body
LE: loop exit
PB: predicated region body
PF: predicated region fallthrough
CT: control target
= control target key end

     0   :  { %v453_v1 = vmov 0.0   ;;  %vm454_vm0 = vmmov 0   ;;  %s575_s1 = inlined_call_operand.vmem [shape: bf16[384,128], index: 1, kind: input, shape index: {}]   ;;  %s576_s0 = inlined_call_operand.vmem [shape: bf16[8,384], index: 0, kind: input, shape index: {}]   ;;  %s577_s2 = inlined_call_operand.vmem [shape: f32[1,128], index: 2, kind: input, shape index: {}]   ;;  %s578_s4 = inlined_call_operand.vmem [shape: bf16[8,128], index: 4, kind: input, shape index: {}, may-alias: {4,5}]   ;;  %s579_s3 = inlined_call_operand.vmem [shape: f32[1,128], index: 3, kind: input, shape index: {}]   ;;  %s580_s5 = inlined_call_operand.vmem [shape: bf16[8,128], index: 5, kind: output, shape index: {}, may-alias: {4,5}]  }
   0x1   :  { %v426_v0 = vld [vmem:[%s575_s1 + $0x40] sm:$0xff]   ;;  %404 = vmatprep.subr.bf16.mxu1 %v453_v1  ;;  %420 = vmatprep.mubr.msk.bf16.mxu1 %vm454_vm0, %v453_v1  ;;  %v429_v4 = vld [vmem:[%s575_s1 + $0x48] sm:$0xff]   ;;  %v432_v7 = vld [vmem:[%s575_s1 + $0x50] sm:$0xff]  }
   0x2   :  { %v427_v2 = vld [vmem:[%s575_s1] sm:$0xff]   ;;  %373 = vmatprep.subr.bf16.mxu0 %v426_v0  ;;  %v430_v5 = vld [vmem:[%s575_s1 + $0x8] sm:$0xff]   ;;  %v433_v8 = vld [vmem:[%s575_s1 + $0x10] sm:$0xff]  }
   0x3   :  { %v428_v3 = vld [vmem:[%s575_s1 + $0x80] sm:$0xff]   ;;  %374 = vmatpush3.bf16.msra.mxu0 %v427_v2  ;;  %v431_v6 = vld [vmem:[%s575_s1 + $0x88] sm:$0xff]   ;;  %v434_v9 = vld [vmem:[%s575_s1 + $0x90] sm:$0xff]  }
   0x4   :  { %405 = vmatpush3.bf16.msra.mxu1 %v428_v3  ;;  %375 = vmatprep.subr.bf16.mxu0 %v429_v4  ;;  %v435_v10 = vld [vmem:[%s575_s1 + $0x58] sm:$0xff]   ;;  %v438_v13 = vld [vmem:[%s575_s1 + $0x60] sm:$0xff]   ;;  %v441_v16 = vld [vmem:[%s575_s1 + $0x68] sm:$0xff]  }
   0x5   :  { %406 = vmatprep.subr.bf16.mxu1 %v453_v1  ;;  %v436_v11 = vld [vmem:[%s575_s1 + $0x18] sm:$0xff]   ;;  %v439_v14 = vld [vmem:[%s575_s1 + $0x20] sm:$0xff]   ;;  %v442_v17 = vld [vmem:[%s575_s1 + $0x28] sm:$0xff]  }
   0x6   :  { %v437_v12 = vld [vmem:[%s575_s1 + $0x98] sm:$0xff]   ;;  %v440_v15 = vld [vmem:[%s575_s1 + $0xa0] sm:$0xff]   ;;  %v443_v18 = vld [vmem:[%s575_s1 + $0xa8] sm:$0xff]  }
   0x7   :  { %376 = vmatpush3.bf16.msra.mxu0 %v430_v5  ;;  %v444_v19 = vld [vmem:[%s575_s1 + $0x70] sm:$0xff]   ;;  %v447_v22 = vld [vmem:[%s575_s1 + $0x78] sm:$0xff]   ;;  %v27_v23 = vld [vmem:[%s576_s0] sm:$0xff] }
   0x8   :  { %407 = vmatpush3.bf16.msra.mxu1 %v431_v6  ;;  %377 = vmatprep.subr.bf16.mxu0 %v432_v7  ;;  %v445_v20 = vld [vmem:[%s575_s1 + $0x30] sm:$0xff]   ;;  %v345_v24 = vcombine.high %v27_v23, %v27_v23  ;;  %v448_v25 = vld [vmem:[%s575_s1 + $0x38] sm:$0xff]   ;;  %v344_v27 = vcombine.low %v27_v23, %v27_v23  ;;  %v452_v28 = vld [vmem:[%s576_s0 + $0x8] ss:$0 sps:$4 sm:$0xff]  }
   0x9   :  { %408 = vmatprep.subr.bf16.mxu1 %v453_v1  ;;  %v446_v21 = vld [vmem:[%s575_s1 + $0xb0] sm:$0xff]   ;;  %v449_v26 = vld [vmem:[%s575_s1 + $0xb8] sm:$0xff]   ;;  %v371_v35 = vld [vmem:[%s577_s2] ss:$0 sm:$0xff] }
   0xa   :  { %264 = vmatprep.mubr.bf16.mxu0 %v345_v24  ;;  %v334_v36 = vld [vmem:[%s578_s4] sm:$0xf] }
   0xb   :  { %378 = vmatpush3.bf16.msra.mxu0 %v433_v8  ;;  %v372_v41 = vld [vmem:[%s579_s3] ss:$0 sm:$0xff]  ;;  %v335_v43 = vunpack.c.l.bf16 %v334_v36 }
   0xc   :  { %409 = vmatpush3.bf16.msra.mxu1 %v434_v9  ;;  %379 = vmatprep.subr.bf16.mxu0 %v435_v10 }
   0xd   :  { %410 = vmatprep.subr.bf16.mxu1 %v453_v1 }
   0xf   :  { %380 = vmatpush3.bf16.msra.mxu0 %v436_v11 }
  0x10   :  { %411 = vmatpush3.bf16.msra.mxu1 %v437_v12  ;;  %381 = vmatprep.subr.bf16.mxu0 %v438_v13 }
  0x11   :  { %412 = vmatprep.subr.bf16.mxu1 %v453_v1 }
  0x13   :  { %382 = vmatpush3.bf16.msra.mxu0 %v439_v14 }
  0x14   :  { %413 = vmatpush3.bf16.msra.mxu1 %v440_v15  ;;  %383 = vmatprep.subr.bf16.mxu0 %v441_v16 }
  0x15   :  { %414 = vmatprep.subr.bf16.mxu1 %v453_v1 }
  0x17   :  { %384 = vmatpush3.bf16.msra.mxu0 %v442_v17 }
  0x18   :  { %415 = vmatpush3.bf16.msra.mxu1 %v443_v18  ;;  %385 = vmatprep.subr.bf16.mxu0 %v444_v19 }
  0x19   :  { %416 = vmatprep.subr.bf16.mxu1 %v453_v1 }
  0x1b   :  { %386 = vmatpush3.bf16.msra.mxu0 %v445_v20 }
  0x1c   :  { %417 = vmatpush3.bf16.msra.mxu1 %v446_v21  ;;  %387 = vmatprep.subr.bf16.mxu0 %v447_v22 }
  0x1d   :  { %418 = vmatprep.subr.bf16.mxu1 %v453_v1 }
  0x1f   :  { %388 = vmatpush3.bf16.msra.mxu0 %v448_v25 }
  0x20   :  { %419 = vmatpush3.bf16.msra.mxu1 %v449_v26 }
  0x22   :  { %265 = vmatmul.mubr.bf16.vlgmr.msra.gmra.mrb[0].mxu0 %v344_v27 }
  0x23   :  { %421 = vmatmul.mubr.bf16.vlgmr.msra.gmra.mrb[0].mxu1 %v452_v28 }
  0xf5   :  { %v389_v29 = vpop.f32.mrb[0].mxu0 }
  0xf6   :  { %v306_v30 = vpop.f32.mrb[0].mxu1  ;;  %v390_v31 = vpop.f32.mrb[1].mxu0 }
  0xf7   :  { %v391_v32 = vadd.f32 %v390_v31, %v389_v29  ;;  %v422_v33 = vpop.f32.mrb[1].mxu1  ;;  %v392_v34 = vpop.f32.mrb[2].mxu0 }
  0xf8   :  { %v309_v37 = vpop.f32.mrb[2].mxu1  ;;  %v393_v38 = vpop.f32.mrb[3].mxu0 }
  0xf9   :  { %v307_v39 = vadd.f32 %v391_v32, %v306_v30  ;;  %v423_v40 = vpop.f32.mrb[3].mxu1 }
  0xfb   :  { %v325_v42 = vmul.f32 %v371_v35, %v307_v39 }
  0xfd   :  { %v333_v44 = vadd.f32 %v372_v41, %v325_v42 }
  0xff   :  { %v336_v45 = vadd.f32 %v335_v43, %v333_v44 }
 0x101   :  { %v337_v46 = vmax.f32 %v336_v45, 0.0 }
 0x103   :  { %v338_v47 = vpack.c.bf16 %v337_v46, %v337_v46 }
 0x105   :  { %339 = vst [vmem:[%s580_s5] sm:$0xf] %v338_v47 }

// kernel: resnet_forward.26
= control target key start
LH: loop header
LB: loop body
LE: loop exit
PB: predicated region body
PF: predicated region fallthrough
CT: control target
= control target key end

     0   :  { %s258_s6 = smov 0   ;;  %s283_s0 = inlined_call_operand.vmem [shape: bf16[2,2,2,32], index: 0, kind: input, shape index: {}]   ;;  %s284_s1 = inlined_call_operand.vmem [shape: f32[2,2,2,32], index: 1, kind: output, shape index: {}]  }
   0x1 LB: > { %s220_s7 = sadd.s32 4294967295, %s246_s6   ;;  %p224_p0 = scmp.ge.s32.totalorder %s246_s6, 1  ;;  %s246_s6 = sphi %s258_s6, %s11_s6  }
   0x2   : > { %p86_p1 = scmp.lt.s32.totalorder %s246_s6, 3 }
   0x4   : > { %p87_p2 = pnand %p224_p0, %p86_p1 }
   0x5   : > { %p105_p3 = scmp.lt.s32.totalorder (!%p87_p2), %s220_s7, 1  ;;  %vm118_vm0 = vcmask (!%p87_p2), 254976   ;;  %vm155_vm1 = vcmask (!%p87_p2), 1041409  }
   0x6   : > { %90 = sbr.rel (%p87_p2) target bundleno = 53 (0x35), region = 24 }
   0xd   : > { %s286_s7 = smov (!%p105_p3, %s220_s7), 1 }
   0xe   : > { %s225_s8 = sshll.u32 %s286_s7, 1  ;;  %s231_s12 = sshll.u32 %s286_s7, 2 }
   0xf   : > { %s108_s11 = scalar_lea.vmem %s283_s0, %s225_s8  ;;  %s113_s15 = scalar_lea.vmem %s284_s1, %s231_s12 }
  0x10   : > { %v114_v0 = vld [vmem:[%s108_s11] sm:$0x1]  ;;  %v115_v1 = vld [vmem:[%s108_s11 + $0x1] sm:$0x1] }
  0x11   : > { %v116_v2 = vunpack.c.l.bf16 %v114_v0  ;;  %v117_v3 = vunpack.c.l.bf16 %v115_v1 }
  0x13   : > { %v119_v4 = vsel %vm118_vm0, %v116_v2, 0.0  ;;  %v126_v5 = vsel %vm118_vm0, %v117_v3, 0.0 }
  0x14   : > { %v120_v6 = vrot.slane %v119_v4, 4  ;;  %v127_v7 = vrot.slane %v126_v5, 4 }
  0x16   : > { %v121_v8 = vadd.f32 %v120_v6, %v119_v4  ;;  %v128_v9 = vadd.f32 %v127_v7, %v126_v5 }
  0x18   : > { %v122_v10 = vrot.slane %v121_v8, 2  ;;  %v129_v11 = vrot.slane %v128_v9, 2 }
  0x1a   : > { %v123_v12 = vadd.f32 %v122_v10, %v121_v8  ;;  %v130_v13 = vadd.f32 %v129_v11, %v128_v9 }
  0x1c   : > { %v124_v14 = vrot.slane %v123_v12, 1  ;;  %v131_v15 = vrot.slane %v130_v13, 1 }
  0x1e   : > { %v125_v16 = vadd.f32 %v124_v14, %v123_v12  ;;  %v132_v17 = vadd.f32 %v131_v15, %v130_v13 }
  0x20   : > { %v133_v18 = vmul.f32 0.5, %v125_v16  ;;  %v134_v19 = vmul.f32 0.5, %v132_v17 }
  0x22   : > { %v135_v20 = vsub.f32 %v116_v2, %v133_v18  ;;  %v136_v21 = vsub.f32 %v117_v3, %v134_v19  ;;  %v156_v22 = vsel %vm155_vm1, %v134_v19, %v133_v18 }
  0x23   : > { %158 = vst.msk [vmem:[%s113_s15] sm:$0x3] %vm118_vm0, %v156_v22 }
  0x24   : > { %v137_v23 = vmul.f32 %v135_v20, %v135_v20  ;;  %v138_v24 = vmul.f32 %v136_v21, %v136_v21 }
  0x26   : > { %v139_v25 = vsel %vm118_vm0, %v137_v23, 0.0  ;;  %v146_v26 = vsel %vm118_vm0, %v138_v24, 0.0 }
  0x27   : > { %v140_v27 = vrot.slane %v139_v25, 4  ;;  %v147_v28 = vrot.slane %v146_v26, 4 }
  0x29   : > { %v141_v29 = vadd.f32 %v140_v27, %v139_v25  ;;  %v148_v30 = vadd.f32 %v147_v28, %v146_v26 }
  0x2b   : > { %v142_v31 = vrot.slane %v141_v29, 2  ;;  %v149_v32 = vrot.slane %v148_v30, 2 }
  0x2d   : > { %v143_v33 = vadd.f32 %v142_v31, %v141_v29  ;;  %v150_v34 = vadd.f32 %v149_v32, %v148_v30 }
  0x2f   : > { %v144_v35 = vrot.slane %v143_v33, 1  ;;  %v151_v36 = vrot.slane %v150_v34, 1 }
  0x31   : > { %v145_v37 = vadd.f32 %v144_v35, %v143_v33  ;;  %v152_v38 = vadd.f32 %v151_v36, %v150_v34 }
  0x33   : > { %v161_v39 = vsel %vm155_vm1, %v152_v38, %v145_v37 }
  0x34   : > { %228 = vst.msk [vmem:[%s113_s15 + $0x2] sm:$0x3] %vm118_vm0, %v161_v39 }
  0x35 PF: > { %s11_s6 = sadd.s32 1, %s246_s6  }
  0x36   : > { %p8_p4 = scmp.ge.s32.totalorder %s11_s6, 4  }
  0x38   :  { %10 = sbr.rel (!%p8_p4) target bundleno = 1 (0x1), region = 55 }

// kernel: resnet_forward.24
= control target key start
LH: loop header
LB: loop body
LE: loop exit
PB: predicated region body
PF: predicated region fallthrough
CT: control target
= control target key end

     0   :  { %v206_v0 = vmov 0.0   ;;  %vm207_vm0 = vmmov 0   ;;  %s269_s1 = inlined_call_operand.vmem [shape: bf16[128,128], index: 1, kind: input, shape index: {}]   ;;  %s270_s0 = inlined_call_operand.vmem [shape: bf16[8,128], index: 0, kind: input, shape index: {}]   ;;  %s271_s2 = inlined_call_operand.vmem [shape: f32[1,128], index: 2, kind: input, shape index: {}]   ;;  %s272_s3 = inlined_call_operand.vmem [shape: f32[1,128], index: 3, kind: input, shape index: {}]   ;;  %s273_s4 = inlined_call_operand.vmem [shape: bf16[8,128], index: 4, kind: output, shape index: {}]  }
   0x1   :  { %176 = vmatprep.subr.bf16.mxu0 %v206_v0  ;;  %v198_v1 = vld [vmem:[%s269_s1] sm:$0xff]   ;;  %192 = vmatprep.mubr.msk.bf16.mxu0 %vm207_vm0, %v206_v0  ;;  %v199_v2 = vld [vmem:[%s269_s1 + $0x8] sm:$0xff]   ;;  %v200_v3 = vld [vmem:[%s269_s1 + $0x10] sm:$0xff]  }
   0x2   :  { %177 = vmatpush3.bf16.msra.mxu0 %v198_v1  ;;  %v201_v4 = vld [vmem:[%s269_s1 + $0x18] sm:$0xff]   ;;  %v202_v5 = vld [vmem:[%s269_s1 + $0x20] sm:$0xff]   ;;  %v203_v6 = vld [vmem:[%s269_s1 + $0x28] sm:$0xff]  }
   0x3   :  { %178 = vmatprep.subr.bf16.mxu0 %v206_v0  ;;  %v204_v7 = vld [vmem:[%s269_s1 + $0x30] sm:$0xff]   ;;  %v205_v8 = vld [vmem:[%s269_s1 + $0x38] sm:$0xff]   ;;  %v24_v9 = vld [vmem:[%s270_s0] sm:$0xf] }
   0x4   :  { %v165_v10 = vld [vmem:[%s271_s2] ss:$0 sm:$0xff] }
   0x5   :  { %v166_v12 = vld [vmem:[%s272_s3] ss:$0 sm:$0xff] }
   0x6   :  { %179 = vmatpush3.bf16.msra.mxu0 %v199_v2 }
   0x7   :  { %180 = vmatprep.subr.bf16.mxu0 %v206_v0 }
   0xa   :  { %181 = vmatpush3.bf16.msra.mxu0 %v200_v3 }
   0xb   :  { %182 = vmatprep.subr.bf16.mxu0 %v206_v0 }
   0xe   :  { %183 = vmatpush3.bf16.msra.mxu0 %v201_v4 }
   0xf   :  { %184 = vmatprep.subr.bf16.mxu0 %v206_v0 }
  0x12   :  { %185 = vmatpush3.bf16.msra.mxu0 %v202_v5 }
  0x13   :  { %186 = vmatprep.subr.bf16.mxu0 %v206_v0 }
  0x16   :  { %187 = vmatpush3.bf16.msra.mxu0 %v203_v6 }
  0x17   :  { %188 = vmatprep.subr.bf16.mxu0 %v206_v0 }
  0x1a   :  { %189 = vmatpush3.bf16.msra.mxu0 %v204_v7 }
  0x1b   :  { %190 = vmatprep.subr.bf16.mxu0 %v206_v0 }
  0x1e   :  { %191 = vmatpush3.bf16.msra.mxu0 %v205_v8 }
  0x21   :  { %193 = vmatmul.mubr.bf16.vlgmr.msra.gmra.mrb[0].mxu0 %v24_v9 }
  0xf4   :  { %v123_v11 = vpop.f32.mrb[0].mxu0 }
  0xf5   :  { %v142_v13 = vmul.f32 %v165_v10, %v123_v11  ;;  %v194_v14 = vpop.f32.mrb[1].mxu0 }
  0xf6   :  { %v126_v15 = vpop.f32.mrb[2].mxu0 }
  0xf7   :  { %v150_v16 = vadd.f32 %v166_v12, %v142_v13  ;;  %v195_v17 = vpop.f32.mrb[3].mxu0 }
  0xf9   :  { %v151_v18 = vpack.c.bf16 %v150_v16, %v150_v16 }
  0xfb   :  { %152 = vst [vmem:[%s273_s4] sm:$0xf] %v151_v18 }

// kernel: resnet_forward.27
= control target key start
LH: loop header
LB: loop body
LE: loop exit
PB: predicated region body
PF: predicated region fallthrough
CT: control target
= control target key end

     0   :  { %v205_v0 = vmov 0.0   ;;  %vm206_vm0 = vmmov 0   ;;  %s268_s1 = inlined_call_operand.vmem [shape: bf16[128,128], index: 1, kind: input, shape index: {}]   ;;  %s269_s0 = inlined_call_operand.vmem [shape: bf16[8,128], index: 0, kind: input, shape index: {}]   ;;  %s270_s2 = inlined_call_operand.vmem [shape: f32[1,128], index: 2, kind: input, shape index: {}]   ;;  %s271_s3 = inlined_call_operand.vmem [shape: f32[1,128], index: 3, kind: input, shape index: {}]   ;;  %s272_s4 = inlined_call_operand.vmem [shape: f32[8,128], index: 4, kind: output, shape index: {}]  }
   0x1   :  { %175 = vmatprep.subr.bf16.mxu0 %v205_v0  ;;  %v197_v1 = vld [vmem:[%s268_s1] sm:$0xff]   ;;  %191 = vmatprep.mubr.msk.bf16.mxu0 %vm206_vm0, %v205_v0  ;;  %v198_v2 = vld [vmem:[%s268_s1 + $0x8] sm:$0xff]   ;;  %v199_v3 = vld [vmem:[%s268_s1 + $0x10] sm:$0xff]  }
   0x2   :  { %176 = vmatpush3.bf16.msra.mxu0 %v197_v1  ;;  %v200_v4 = vld [vmem:[%s268_s1 + $0x18] sm:$0xff]   ;;  %v201_v5 = vld [vmem:[%s268_s1 + $0x20] sm:$0xff]   ;;  %v202_v6 = vld [vmem:[%s268_s1 + $0x28] sm:$0xff]  }
   0x3   :  { %177 = vmatprep.subr.bf16.mxu0 %v205_v0  ;;  %v203_v7 = vld [vmem:[%s268_s1 + $0x30] sm:$0xff]   ;;  %v204_v8 = vld [vmem:[%s268_s1 + $0x38] sm:$0xff]   ;;  %v24_v9 = vld [vmem:[%s269_s0] sm:$0xf] }
   0x4   :  { %v164_v10 = vld [vmem:[%s270_s2] ss:$0 sm:$0xff] }
   0x5   :  { %v165_v12 = vld [vmem:[%s271_s3] ss:$0 sm:$0xff] }
   0x6   :  { %178 = vmatpush3.bf16.msra.mxu0 %v198_v2 }
   0x7   :  { %179 = vmatprep.subr.bf16.mxu0 %v205_v0 }
   0xa   :  { %180 = vmatpush3.bf16.msra.mxu0 %v199_v3 }
   0xb   :  { %181 = vmatprep.subr.bf16.mxu0 %v205_v0 }
   0xe   :  { %182 = vmatpush3.bf16.msra.mxu0 %v200_v4 }
   0xf   :  { %183 = vmatprep.subr.bf16.mxu0 %v205_v0 }
  0x12   :  { %184 = vmatpush3.bf16.msra.mxu0 %v201_v5 }
  0x13   :  { %185 = vmatprep.subr.bf16.mxu0 %v205_v0 }
  0x16   :  { %186 = vmatpush3.bf16.msra.mxu0 %v202_v6 }
  0x17   :  { %187 = vmatprep.subr.bf16.mxu0 %v205_v0 }
  0x1a   :  { %188 = vmatpush3.bf16.msra.mxu0 %v203_v7 }
  0x1b   :  { %189 = vmatprep.subr.bf16.mxu0 %v205_v0 }
  0x1e   :  { %190 = vmatpush3.bf16.msra.mxu0 %v204_v8 }
  0x21   :  { %192 = vmatmul.mubr.bf16.vlgmr.msra.gmra.mrb[0].mxu0 %v24_v9 }
  0xf4   :  { %v123_v11 = vpop.f32.mrb[0].mxu0 }
  0xf5   :  { %v142_v13 = vmul.f32 %v164_v10, %v123_v11  ;;  %v193_v14 = vpop.f32.mrb[1].mxu0 }
  0xf6   :  { %v126_v15 = vpop.f32.mrb[2].mxu0 }
  0xf7   :  { %v150_v16 = vadd.f32 %v165_v12, %v142_v13  ;;  %v194_v17 = vpop.f32.mrb[3].mxu0 }
  0xf9   :  { %151 = vst [vmem:[%s272_s4] sm:$0xff] %v150_v16 }

</bundles_post_ra>
